<compile_context>
chip_gen: v7x
topology: tpu7x:2x2x1
jax: 0.10.0
libtpu: 0.0.40
codegen_flags: <defaults>
</compile_context>

<pallas_src>
import functools

import jax
import jax.numpy as jnp
import numpy as np
from jax.experimental import pallas as pl
from jax.experimental.pallas import tpu as pltpu

INF = 1e30  # large finite "infinity"; invalid DP cells are re-clamped to this every step


def _round_up(x, m):
    return ((x + m - 1) // m) * m


def _vmem_spec():
    return pl.BlockSpec(memory_space=pltpu.MemorySpace.VMEM)


# ----------------------------------------------------------------------------
# Start-up probes: verify pltpu.roll lowerings + semantics once; fall back to safe paths.
# ----------------------------------------------------------------------------
@functools.lru_cache(maxsize=None)
def _plain_roll_ok():
    """pltpu.roll(x, 1, axis=1) must match jnp.roll(x, 1, axis=1)."""
    try:
        x = (np.arange(3 * 256, dtype=np.float32) % 97.0).reshape(3, 256)

        def kern(x_ref, o_ref):
            o_ref[...] = pltpu.roll(x_ref[...], 1, 1)

        out = pl.pallas_call(
            kern, out_shape=jax.ShapeDtypeStruct(x.shape, jnp.float32),
            in_specs=[_vmem_spec()], out_specs=_vmem_spec())(x)
        out = np.asarray(jax.block_until_ready(out))
        return bool(np.array_equal(out, np.roll(x, 1, axis=1)))
    except Exception:
        return False


@functools.lru_cache(maxsize=None)
def _strided_skew_ok():
    """pltpu.roll(A, 0, 0, stride=1, stride_axis=1): column i rolled down by i (mod K)."""
    try:
        K, N = 24, 256
        x = (np.arange(K * N, dtype=np.float32) % 251.0).reshape(K, N)

        def kern(x_ref, o_ref):
            o_ref[...] = pltpu.roll(x_ref[...], 0, 0, stride=1, stride_axis=1)

        out = pl.pallas_call(
            kern, out_shape=jax.ShapeDtypeStruct(x.shape, jnp.float32),
            in_specs=[_vmem_spec()], out_specs=_vmem_spec())(x)
        out = np.asarray(jax.block_until_ready(out))
        kk = np.arange(K)[:, None]
        ii = np.arange(N)[None, :]
        want = x[(kk - ii) % K, ii]
        return bool(np.array_equal(out, want))
    except Exception:
        return False


# ----------------------------------------------------------------------------
# Single fused kernel: connector -> per-pair costs/IDM/skew -> sublane-batched soft-DTW
# ----------------------------------------------------------------------------
def _expert_kernel(f1_ref, f2_ref, w_ref, b_ref, o_ref,
                   sxy_ref, sxx_ref, syy_ref, *,
                   T1, T2, N_pad, K_pad, gamma, sigma, margin, alpha,
                   use_lav, use_tpu_roll, use_strided_skew):
    if use_tpu_roll:
        lane_roll1 = lambda x: pltpu.roll(x, 1, 1)      # single XLU lane rotate
    else:
        lane_roll1 = lambda x: jnp.roll(x, 1, axis=1)   # fallback (slice + concat)

    w = w_ref[...]
    bias = b_ref[...]

    # ---- connector (Linear) + row-wise L2 normalize (rsqrt -> EUP slot) -------------------
    def connect(feat):
        y = jnp.dot(feat, w, preferred_element_type=jnp.float32) + bias
        ss = jnp.sum(y * y, axis=1, keepdims=True)
        return y * jax.lax.rsqrt(jnp.maximum(ss, 1e-24))  # == y / max(||y||, 1e-12)

    f1 = connect(f1_ref[...])   # (N_pad, d_model); rows >= T are padding, always masked later
    f2 = connect(f2_ref[...])

    lane_k = jax.lax.broadcasted_iota(jnp.int32, (K_pad, N_pad), 1)

    # ---- one (y, x) pair at a time: raw cost -> optional IDM -> skew -> store -> drop -----
    def process_pair(y_seq, x_seq, M_valid, N_valid, s_ref, compute_idm):
        M8 = _round_up(M_valid, 8)               # halved raw height (vs ~2*Tmax before)
        yq = y_seq[0:M8, :]
        xq = x_seq
        row_j = jax.lax.broadcasted_iota(jnp.int32, (M8, N_pad), 0)
        col_i = jax.lax.broadcasted_iota(jnp.int32, (M8, N_pad), 1)
        ny = jnp.sum(yq * yq, axis=1, keepdims=True)                        # (M8, 1)
        nx = jax.lax.dot_general(jnp.ones((1, xq.shape[1]), jnp.float32), xq * xq,
                                 (((1,), (1,)), ((), ())),
                                 preferred_element_type=jnp.float32)        # (1, N_pad), MXU
        g = jax.lax.dot_general(yq, xq, (((1,), (1,)), ((), ())),
                                preferred_element_type=jnp.float32)         # (M8, N_pad), MXU
        raw = jnp.maximum(ny + nx - 2.0 * g, 0.0)       # raw[j, i] = ||x_i - y_j||^2
        valid = (row_j < M_valid) & (col_i < N_valid)

        idm_val = None
        if compute_idm:
            # Contrastive-IDM on one (normalized) sequence, reusing its self-cost matrix.
            # TODO(synk): mean reduction (sum / T^2) assumed for IDMContrastiveLoss.
            di = (row_j - col_i).astype(jnp.float32)
            d2 = di * di
            neg = jnp.abs(di) > sigma
            lm = jnp.where(neg,
                           (d2 + 1.0) * jnp.maximum(margin - raw, 0.0),  # push far frames apart
                           raw / (d2 + 1.0))                             # pull close frames together
            lm = jnp.where(valid, lm, 0.0)
            rowsum = jax.lax.dot_general(jnp.ones((1, M8), jnp.float32), lm,
                                         (((1,), (0,)), ((), ())),
                                         preferred_element_type=jnp.float32)  # MXU reduction
            idm_val = jnp.sum(rowsum, axis=1, keepdims=True) / float(M_valid * M_valid)

        A = jnp.where(valid, raw, INF)
        if M8 < K_pad:                                   # pad to K_pad rows with INF
            A = jnp.concatenate(
                [A, jnp.full((K_pad - M8, N_pad), INF, jnp.float32)], axis=0)

        # skew: S[k, i] = D[i, k - i] = A[(k - i) mod K_pad, i].  K_pad >= M + N - 1 and all
        # rows >= M_valid are INF, so the roll wrap-around only deposits INF into valid lanes.
        if use_strided_skew:
            S = pltpu.roll(A, 0, 0, stride=1, stride_axis=1)  # one XLU pass, per-column shift
        else:
            S = A
            s = 1
            while s < N_valid:                                 # log2(N) masked-roll ladder
                S = jnp.where((lane_k & s) != 0, jnp.roll(S, s, axis=0), S)
                s *= 2
        S = jnp.where(lane_k < N_valid, S, INF)                # robustness: padding lanes = INF
        s_ref[...] = S
        return idm_val

    idm1 = process_pair(f1, f1, T1, T1, sxx_ref, True)     # (1, 1)
    idm2 = process_pair(f2, f2, T2, T2, syy_ref, True)
    process_pair(f2, f1, T2, T1, sxy_ref, False)

    # ---- sublane-batched soft-DTW wavefront: xy / xx / yy stacked on 3 sublanes ------------
    sub = jax.lax.broadcasted_iota(jnp.int32, (3, N_pad), 0)
    lane = jax.lax.broadcasted_iota(jnp.int32, (3, N_pad), 1)
    is_lane0 = lane == 0
    sel_xy = sub == 0
    sel_xx = sub == 1
    tgt_lane = jnp.where(sel_xy, T1 - 1, jnp.where(sel_xx, T1 - 1, T2 - 1))
    tgt_diag = jnp.where(sel_xy, T1 + T2 - 2, jnp.where(sel_xx, 2 * T1 - 2, 2 * T2 - 2))
    cap_lane = lane == tgt_lane
    inv_gamma = 1.0 / float(gamma)
    inf_state = jnp.full((3, N_pad), INF, jnp.float32)

    def group_body(gidx, carry):
        r1, r2, acc = carry          # r1 = diag k-1, r2 = diag k-2, acc = captured R[N-1, M-1]
        base = pl.multiple_of(gidx * 8, 8)
        bxy = sxy_ref[pl.ds(base, 8), :]   # aligned full-tile (8, N_pad) block loads
        bxx = sxx_ref[pl.ds(base, 8), :]
        byy = syy_ref[pl.ds(base, 8), :]
        for j in range(8):                 # static unroll: straight-line code for the scheduler
            k = base + j
            d = jnp.where(sel_xy, jax.lax.slice_in_dim(bxy, j, j + 1, axis=0),
                          jnp.where(sel_xx, jax.lax.slice_in_dim(bxx, j, j + 1, axis=0),
                                    jax.lax.slice_in_dim(byy, j, j + 1, axis=0)))
            a = jnp.where(is_lane0, INF, lane_roll1(r1))                  # R[i-1, j]
            b = r1                                                        # R[i,   j-1]
            c0 = jnp.where(k == 0, jnp.float32(0.0), jnp.float32(INF))    # DP origin R[-1,-1]=0
            c = jnp.where(is_lane0, c0, lane_roll1(r2))                   # R[i-1, j-1]
            m = jnp.minimum(jnp.minimum(a, b), c)
            se = (jnp.exp((m - a) * inv_gamma) + jnp.exp((m - b) * inv_gamma)
                  + jnp.exp((m - c) * inv_gamma))
            r = jnp.minimum(d + (m - gamma * jnp.log(se)), INF)           # clamp keeps padding finite
            acc = acc + jnp.where(cap_lane & (tgt_diag == k), r, 0.0)
            r2 = r1
            r1 = r
        return r1, r2, acc

    _, _, acc = jax.lax.fori_loop(
        0, K_pad // 8, group_body,
        (inf_state, inf_state, jnp.zeros((3, N_pad), jnp.float32)))

    sums = jnp.sum(acc, axis=1, keepdims=True)   # (3, 1): [sdtw(x,y), sdtw(x,x), sdtw(y,y)]
    s_xy = sums[0:1, :]
    s_xx = sums[1:2, :]
    s_yy = sums[2:3, :]

    loss1 = s_xy - 0.5 * (s_xx + s_yy)           # SoftDTW(normalize=True)
    loss2 = idm1 + idm2
    loss = (loss1 + alpha * loss2) if use_lav else loss1

    lane8 = jax.lax.broadcasted_iota(jnp.int32, (1, 8), 1)
    out = jnp.zeros((1, 8), jnp.float32)
    for idx, v in enumerate((loss, loss1, loss2, s_xy, s_xx, s_yy, idm1, idm2)):
        out = out + jnp.where(lane8 == idx, v, 0.0)
    o_ref[...] = out


# ----------------------------------------------------------------------------
# DownstreamExpert.forward equivalent (single pallas_call)
# ----------------------------------------------------------------------------
def _vmem_capacity_bytes():
    try:
        cap = int(getattr(pltpu.get_tpu_info(), "vmem_capacity_bytes", 0))
        if cap > 0:
            return cap
    except Exception:
        pass
    return 64 * 1024 * 1024            # conservative (v7x-sized) default


def downstream_expert_forward(feat1, feat2, w, b, *, gamma, sigma, margin, alpha,
                              loss_type="softdtw_lav"):
    feat1 = jnp.asarray(feat1, jnp.float32)
    feat2 = jnp.asarray(feat2, jnp.float32)
    w = jnp.asarray(w, jnp.float32)
    b2d = jnp.asarray(b, jnp.float32).reshape(1, -1)

    T1, d_in = feat1.shape
    T2, _ = feat2.shape
    d_out = w.shape[1]
    Tmax = max(T1, T2)
    N_pad = _round_up(Tmax, 128)         # lane width of the (3, N_pad) DP state
    K_pad = _round_up(2 * Tmax - 1, 8)   # number of anti-diagonals, rounded to 8-row groups

    # pad raw features only to N_pad rows (connector / L2-norm run on N_pad rows, not ~2T)
    f1p = jnp.zeros((N_pad, d_in), jnp.float32).at[:T1].set(feat1)
    f2p = jnp.zeros((N_pad, d_in), jnp.float32).at[:T2].set(feat2)

    use_tpu_roll = _plain_roll_ok()
    use_strided_skew = _strided_skew_ok()

    kern = functools.partial(
        _expert_kernel, T1=T1, T2=T2, N_pad=N_pad, K_pad=K_pad,
        gamma=float(gamma), sigma=float(sigma), margin=float(margin), alpha=float(alpha),
        use_lav=(loss_type == "softdtw_lav"),
        use_tpu_roll=use_tpu_roll, use_strided_skew=use_strided_skew)

    # VMEM budget: 3 skewed planes (scratch) + skew temporaries for ONE live plane +
    # halved-height raw/lm temporaries + padded inputs/embeddings; capped below physical VMEM.
    M8max = _round_up(Tmax, 8)
    est = 4 * (3 * K_pad * N_pad          # scratch planes
               + 3 * K_pad * N_pad        # A_full + roll temp + store staging (one live plane)
               + 5 * M8max * N_pad        # raw / valid / lm / A temporaries
               + 8 * N_pad * (d_in + d_out))
    cap = _vmem_capacity_bytes()
    vmem_limit = min(max(32 * 1024 * 1024, int(est * 1.5)), cap - 8 * 1024 * 1024)
    # TODO(synk): band-stream the skewed cost from HBM (and split DPs across the two v7x
    # TensorCores) once 6*K_pad*N_pad*4 bytes no longer fits the per-core VMEM.

    out = pl.pallas_call(
        kern,
        out_shape=jax.ShapeDtypeStruct((1, 8), jnp.float32),
        in_specs=[_vmem_spec() for _ in range(4)],
        out_specs=_vmem_spec(),
        scratch_shapes=[pltpu.VMEM((K_pad, N_pad), jnp.float32) for _ in range(3)],
        compiler_params=pltpu.CompilerParams(vmem_limit_bytes=vmem_limit),
    )(f1p, f2p, w, b2d)
    # out[0] = [loss, loss1, loss2, sdtw_xy, sdtw_xx, sdtw_yy, idm1, idm2]
    return out


# ----------------------------------------------------------------------------
# Pure numpy reference (for correctness verification of the fused kernel)
# ----------------------------------------------------------------------------
def _reference_forward(feat1, feat2, w, b, *, gamma, sigma, margin, alpha,
                       loss_type="softdtw_lav"):
    f1 = np.asarray(feat1, np.float64) @ np.asarray(w, np.float64) + np.asarray(b, np.float64)
    f2 = np.asarray(feat2, np.float64) @ np.asarray(w, np.float64) + np.asarray(b, np.float64)

    def l2n(x):
        n = np.sqrt((x * x).sum(axis=1, keepdims=True))
        return x / np.maximum(n, 1e-12)

    f1, f2 = l2n(f1), l2n(f2)

    def sqd(a, c):
        return np.maximum((a * a).sum(1)[:, None] + (c * c).sum(1)[None, :]
                          - 2.0 * a @ c.T, 0.0)

    def sdtw(D):
        N, M = D.shape
        R = np.full((N + 1, M + 1), np.inf)
        R[0, 0] = 0.0
        for i in range(1, N + 1):
            for j in range(1, M + 1):
                r = np.array([R[i - 1, j - 1], R[i - 1, j], R[i, j - 1]])
                m = r.min()
                R[i, j] = D[i - 1, j - 1] + (m - gamma * np.log(np.exp(-(r - m) / gamma).sum()))
        return R[N, M]

    def idm(f):
        T = f.shape[0]
        d = sqd(f, f)
        idx = np.arange(T)
        di = (idx[:, None] - idx[None, :]).astype(np.float64)
        d2 = di * di
        neg = np.abs(di) > sigma
        lm = np.where(neg, (d2 + 1.0) * np.maximum(margin - d, 0.0), d / (d2 + 1.0))
        return lm.sum() / float(T * T)

    s_xy, s_xx, s_yy = sdtw(sqd(f1, f2)), sdtw(sqd(f1, f1)), sdtw(sqd(f2, f2))
    loss1 = s_xy - 0.5 * (s_xx + s_yy)
    loss2 = idm(f1) + idm(f2)
    loss = loss1 + alpha * loss2 if loss_type == "softdtw_lav" else loss1
    return np.array([loss, loss1, loss2, s_xy, s_xx, s_yy])


if __name__ == "__main__":
    key = jax.random.PRNGKey(0)
    k1, k2, k3, k4 = jax.random.split(key, 4)

    upstream_dim = 32   # upstream feature size
    input_dim = 16      # modelrc['input_dim'] (connector output)
    T1, T2 = 8, 12      # two utterances of different length

    feat1 = jax.random.normal(k1, (T1, upstream_dim), dtype=jnp.float32)
    feat2 = jax.random.normal(k2, (T2, upstream_dim), dtype=jnp.float32)
    w = jax.random.normal(k3, (upstream_dim, input_dim), dtype=jnp.float32) * 0.1
    b = jax.random.normal(k4, (input_dim,), dtype=jnp.float32) * 0.01

    hp = dict(gamma=0.1, sigma=2.0, margin=2.0, alpha=1.0, loss_type="softdtw_lav")

    out = downstream_expert_forward(feat1, feat2, w, b, **hp)
    out = jax.block_until_ready(out)
    got = np.asarray(out)[0]
    assert np.all(np.isfinite(got)), "non-finite outputs"

    want = _reference_forward(feat1, feat2, w, b, **hp)
    np.testing.assert_allclose(got[:6], want[:6], rtol=2e-3, atol=2e-3)

    print("KERNEL_OK")
</pallas_src>

<mosaic_0001>
module attributes {stable_mosaic.version = 11 : i64} {
  func.func @kern(%arg0: memref<3x256xf32, #tpu.memory_space<vmem>>, %arg1: memref<3x256xf32, #tpu.memory_space<vmem>>) attributes {dimension_semantics = [], scalar_prefetch = 0 : i64, scratch_operands = 0 : i64, tpu.core_type = #tpu.core_type<tc>} {
    %c0 = arith.constant 0 : index
    %c0_0 = arith.constant 0 : index
    %0 = vector.load %arg0[%c0, %c0_0] : memref<3x256xf32, #tpu.memory_space<vmem>>, vector<3x256xf32>
    %c1_i32 = arith.constant 1 : i32
    %1 = tpu.dynamic_rotate %0 by %c1_i32 dim 1 : vector<3x256xf32>, i32 -> vector<3x256xf32>
    %c0_1 = arith.constant 0 : index
    %c0_2 = arith.constant 0 : index
    %2 = vector.load %arg1[%c0_1, %c0_2] : memref<3x256xf32, #tpu.memory_space<vmem>>, vector<3x256xf32>
    tpu.vector_store %arg1[%c0_1, %c0_2], %1 {strides = array<i32>} : memref<3x256xf32, #tpu.memory_space<vmem>>, vector<3x256xf32>,
    return
  }
}

module attributes {stable_mosaic.version = 11 : i64} {
  func.func @kern(%arg0: memref<24x256xf32, #tpu.memory_space<vmem>>, %arg1: memref<24x256xf32, #tpu.memory_space<vmem>>) attributes {dimension_semantics = [], scalar_prefetch = 0 : i64, scratch_operands = 0 : i64, tpu.core_type = #tpu.core_type<tc>} {
    %c0 = arith.constant 0 : index
    %c0_0 = arith.constant 0 : index
    %0 = vector.load %arg0[%c0, %c0_0] : memref<24x256xf32, #tpu.memory_space<vmem>>, vector<24x256xf32>
    %c0_i32 = arith.constant 0 : i32
    %1 = tpu.dynamic_rotate %0 by %c0_i32 dim 0 {stride = 1 : si32, stride_dimension = 1 : si32} : vector<24x256xf32>, i32 -> vector<24x256xf32>
    %c0_1 = arith.constant 0 : index
    %c0_2 = arith.constant 0 : index
    %2 = vector.load %arg1[%c0_1, %c0_2] : memref<24x256xf32, #tpu.memory_space<vmem>>, vector<24x256xf32>
    tpu.vector_store %arg1[%c0_1, %c0_2], %1 {strides = array<i32>} : memref<24x256xf32, #tpu.memory_space<vmem>>, vector<24x256xf32>,
    return
  }
}

module attributes {stable_mosaic.version = 11 : i64} {
  func.func @_expert_kernel(%arg0: memref<128x32xf32, #tpu.memory_space<vmem>>, %arg1: memref<128x32xf32, #tpu.memory_space<vmem>>, %arg2: memref<32x16xf32, #tpu.memory_space<vmem>>, %arg3: memref<1x16xf32, #tpu.memory_space<vmem>>, %arg4: memref<1x8xf32, #tpu.memory_space<vmem>>, %arg5: memref<24x128xf32, #tpu.memory_space<vmem>>, %arg6: memref<24x128xf32, #tpu.memory_space<vmem>>, %arg7: memref<24x128xf32, #tpu.memory_space<vmem>>) attributes {dimension_semantics = [], scalar_prefetch = 0 : i64, scratch_operands = 3 : i64, tpu.core_type = #tpu.core_type<tc>} {
    %c0 = arith.constant 0 : index
    %c0_0 = arith.constant 0 : index
    %0 = vector.load %arg2[%c0, %c0_0] : memref<32x16xf32, #tpu.memory_space<vmem>>, vector<32x16xf32>
    %c0_1 = arith.constant 0 : index
    %c0_2 = arith.constant 0 : index
    %1 = vector.load %arg3[%c0_1, %c0_2] : memref<1x16xf32, #tpu.memory_space<vmem>>, vector<1x16xf32>
    %c0_3 = arith.constant 0 : index
    %c0_4 = arith.constant 0 : index
    %2 = vector.load %arg0[%c0_3, %c0_4] : memref<128x32xf32, #tpu.memory_space<vmem>>, vector<128x32xf32>
    %cst = arith.constant dense<0.000000e+00> : vector<128x16xf32>
    %3 = tpu.matmul %2, %0, %cst {dimension_numbers = #tpu.dot_dimension_numbers<[1], [0], [0], [1], [0, 0, 1, 1], [], []>} : vector<128x32xf32>, vector<32x16xf32>, vector<128x16xf32> -> vector<128x16xf32>
    %4 = vector.broadcast %1 : vector<1x16xf32> to vector<128x16xf32>
    %5 = arith.addf %3, %4 : vector<128x16xf32>
    %6 = arith.mulf %5, %5 : vector<128x16xf32>
    %cst_5 = arith.constant dense<0.000000e+00> : vector<128xf32>
    %7 = vector.multi_reduction <add>, %6, %cst_5 [1] : vector<128x16xf32> to vector<128xf32>
    %8 = vector.shape_cast %7 : vector<128xf32> to vector<128x1xf32>
    %cst_6 = arith.constant 1.000000e-24 : f32
    %9 = vector.broadcast %cst_6 : f32 to vector<128x1xf32>
    %10 = arith.maximumf %8, %9 : vector<128x1xf32>
    %11 = math.rsqrt %10 : vector<128x1xf32>
    %12 = vector.broadcast %11 : vector<128x1xf32> to vector<128x16xf32>
    %13 = arith.mulf %5, %12 : vector<128x16xf32>
    %c0_7 = arith.constant 0 : index
    %c0_8 = arith.constant 0 : index
    %14 = vector.load %arg1[%c0_7, %c0_8] : memref<128x32xf32, #tpu.memory_space<vmem>>, vector<128x32xf32>
    %cst_9 = arith.constant dense<0.000000e+00> : vector<128x16xf32>
    %15 = tpu.matmul %14, %0, %cst_9 {dimension_numbers = #tpu.dot_dimension_numbers<[1], [0], [0], [1], [0, 0, 1, 1], [], []>} : vector<128x32xf32>, vector<32x16xf32>, vector<128x16xf32> -> vector<128x16xf32>
    %16 = vector.broadcast %1 : vector<1x16xf32> to vector<128x16xf32>
    %17 = arith.addf %15, %16 : vector<128x16xf32>
    %18 = arith.mulf %17, %17 : vector<128x16xf32>
    %cst_10 = arith.constant dense<0.000000e+00> : vector<128xf32>
    %19 = vector.multi_reduction <add>, %18, %cst_10 [1] : vector<128x16xf32> to vector<128xf32>
    %20 = vector.shape_cast %19 : vector<128xf32> to vector<128x1xf32>
    %cst_11 = arith.constant 1.000000e-24 : f32
    %21 = vector.broadcast %cst_11 : f32 to vector<128x1xf32>
    %22 = arith.maximumf %20, %21 : vector<128x1xf32>
    %23 = math.rsqrt %22 : vector<128x1xf32>
    %24 = vector.broadcast %23 : vector<128x1xf32> to vector<128x16xf32>
    %25 = arith.mulf %17, %24 : vector<128x16xf32>
    %26 = tpu.iota {dimensions = array<i32: 1>} : vector<24x128xi32>
    %27 = vector.extract_strided_slice %13 {offsets = [0, 0], sizes = [8, 16], strides = [1, 1]} : vector<128x16xf32> to vector<8x16xf32>
    %28 = tpu.iota {dimensions = array<i32: 0>} : vector<8x128xi32>
    %29 = tpu.iota {dimensions = array<i32: 1>} : vector<8x128xi32>
    %30 = arith.mulf %27, %27 : vector<8x16xf32>
    %cst_12 = arith.constant dense<0.000000e+00> : vector<8xf32>
    %31 = vector.multi_reduction <add>, %30, %cst_12 [1] : vector<8x16xf32> to vector<8xf32>
    %32 = vector.shape_cast %31 : vector<8xf32> to vector<8x1xf32>
    %cst_13 = arith.constant 1.000000e+00 : f32
    %33 = vector.broadcast %cst_13 : f32 to vector<1x16xf32>
    %34 = arith.mulf %13, %13 : vector<128x16xf32>
    %cst_14 = arith.constant dense<0.000000e+00> : vector<1x128xf32>
    %35 = tpu.matmul %33, %34, %cst_14 {dimension_numbers = #tpu.dot_dimension_numbers<[1], [1], [0], [0], [0, 0, 1, 0], [], []>} : vector<1x16xf32>, vector<128x16xf32>, vector<1x128xf32> -> vector<1x128xf32>
    %cst_15 = arith.constant dense<0.000000e+00> : vector<8x128xf32>
    %36 = tpu.matmul %27, %13, %cst_15 {dimension_numbers = #tpu.dot_dimension_numbers<[1], [1], [0], [0], [0, 0, 1, 0], [], []>} : vector<8x16xf32>, vector<128x16xf32>, vector<8x128xf32> -> vector<8x128xf32>
    %37 = vector.broadcast %32 : vector<8x1xf32> to vector<8x128xf32>
    %38 = vector.broadcast %35 : vector<1x128xf32> to vector<8x128xf32>
    %39 = arith.addf %37, %38 : vector<8x128xf32>
    %cst_16 = arith.constant 2.000000e+00 : f32
    %40 = vector.broadcast %cst_16 : f32 to vector<8x128xf32>
    %41 = arith.mulf %40, %36 : vector<8x128xf32>
    %42 = arith.subf %39, %41 : vector<8x128xf32>
    %cst_17 = arith.constant 0.000000e+00 : f32
    %43 = vector.broadcast %cst_17 : f32 to vector<8x128xf32>
    %44 = arith.maximumf %42, %43 : vector<8x128xf32>
    %c8_i32 = arith.constant 8 : i32
    %45 = vector.broadcast %c8_i32 : i32 to vector<8x128xi32>
    %46 = arith.cmpi slt, %28, %45 : vector<8x128xi32>
    %c8_i32_18 = arith.constant 8 : i32
    %47 = vector.broadcast %c8_i32_18 : i32 to vector<8x128xi32>
    %48 = arith.cmpi slt, %29, %47 : vector<8x128xi32>
    %49 = arith.andi %46, %48 : vector<8x128xi1>
    %50 = arith.subi %28, %29 : vector<8x128xi32>
    %51 = arith.sitofp %50 : vector<8x128xi32> to vector<8x128xf32>
    %52 = arith.mulf %51, %51 : vector<8x128xf32>
    %53 = math.absf %51 : vector<8x128xf32>
    %cst_19 = arith.constant 2.000000e+00 : f32
    %54 = vector.broadcast %cst_19 : f32 to vector<8x128xf32>
    %55 = arith.cmpf ogt, %53, %54 : vector<8x128xf32>
    %cst_20 = arith.constant 1.000000e+00 : f32
    %56 = vector.broadcast %cst_20 : f32 to vector<8x128xf32>
    %57 = arith.addf %52, %56 : vector<8x128xf32>
    %cst_21 = arith.constant 2.000000e+00 : f32
    %58 = vector.broadcast %cst_21 : f32 to vector<8x128xf32>
    %59 = arith.subf %58, %44 : vector<8x128xf32>
    %cst_22 = arith.constant 0.000000e+00 : f32
    %60 = vector.broadcast %cst_22 : f32 to vector<8x128xf32>
    %61 = arith.maximumf %59, %60 : vector<8x128xf32>
    %62 = arith.mulf %57, %61 : vector<8x128xf32>
    %cst_23 = arith.constant 1.000000e+00 : f32
    %63 = vector.broadcast %cst_23 : f32 to vector<8x128xf32>
    %64 = arith.addf %52, %63 : vector<8x128xf32>
    %65 = arith.divf %44, %64 : vector<8x128xf32>
    %66 = arith.select %55, %62, %65 : vector<8x128xi1>, vector<8x128xf32>
    %cst_24 = arith.constant 0.000000e+00 : f32
    %67 = vector.broadcast %cst_24 : f32 to vector<8x128xf32>
    %68 = arith.select %49, %66, %67 : vector<8x128xi1>, vector<8x128xf32>
    %cst_25 = arith.constant 1.000000e+00 : f32
    %69 = vector.broadcast %cst_25 : f32 to vector<1x8xf32>
    %cst_26 = arith.constant dense<0.000000e+00> : vector<1x128xf32>
    %70 = tpu.matmul %69, %68, %cst_26 {dimension_numbers = #tpu.dot_dimension_numbers<[1], [0], [0], [1], [0, 0, 1, 1], [], []>} : vector<1x8xf32>, vector<8x128xf32>, vector<1x128xf32> -> vector<1x128xf32>
    %cst_27 = arith.constant dense<0.000000e+00> : vector<1xf32>
    %71 = vector.multi_reduction <add>, %70, %cst_27 [1] : vector<1x128xf32> to vector<1xf32>
    %72 = vector.shape_cast %71 : vector<1xf32> to vector<1x1xf32>
    %cst_28 = arith.constant 6.400000e+01 : f32
    %73 = vector.broadcast %cst_28 : f32 to vector<1x1xf32>
    %74 = arith.divf %72, %73 : vector<1x1xf32>
    %cst_29 = arith.constant 1.000000e+30 : f32
    %75 = vector.broadcast %cst_29 : f32 to vector<8x128xf32>
    %76 = arith.select %49, %44, %75 : vector<8x128xi1>, vector<8x128xf32>
    %cst_30 = arith.constant 1.000000e+30 : f32
    %77 = vector.broadcast %cst_30 : f32 to vector<16x128xf32>
    %78 = tpu.concatenate %76, %77 in 0 : vector<8x128xf32>, vector<16x128xf32> -> vector<24x128xf32>
    %c1_i32 = arith.constant 1 : i32
    %79 = vector.broadcast %c1_i32 : i32 to vector<24x128xi32>
    %80 = arith.andi %26, %79 : vector<24x128xi32>
    %c0_i32 = arith.constant 0 : i32
    %81 = vector.broadcast %c0_i32 : i32 to vector<24x128xi32>
    %82 = arith.cmpi ne, %80, %81 : vector<24x128xi32>
    %83 = vector.extract_strided_slice %78 {offsets = [23, 0], sizes = [1, 128], strides = [1, 1]} : vector<24x128xf32> to vector<1x128xf32>
    %84 = vector.extract_strided_slice %78 {offsets = [0, 0], sizes = [23, 128], strides = [1, 1]} : vector<24x128xf32> to vector<23x128xf32>
    %85 = tpu.concatenate %83, %84 in 0 : vector<1x128xf32>, vector<23x128xf32> -> vector<24x128xf32>
    %86 = arith.select %82, %85, %78 : vector<24x128xi1>, vector<24x128xf32>
    %c2_i32 = arith.constant 2 : i32
    %87 = vector.broadcast %c2_i32 : i32 to vector<24x128xi32>
    %88 = arith.andi %26, %87 : vector<24x128xi32>
    %c0_i32_31 = arith.constant 0 : i32
    %89 = vector.broadcast %c0_i32_31 : i32 to vector<24x128xi32>
    %90 = arith.cmpi ne, %88, %89 : vector<24x128xi32>
    %91 = vector.extract_strided_slice %86 {offsets = [22, 0], sizes = [2, 128], strides = [1, 1]} : vector<24x128xf32> to vector<2x128xf32>
    %92 = vector.extract_strided_slice %86 {offsets = [0, 0], sizes = [22, 128], strides = [1, 1]} : vector<24x128xf32> to vector<22x128xf32>
    %93 = tpu.concatenate %91, %92 in 0 : vector<2x128xf32>, vector<22x128xf32> -> vector<24x128xf32>
    %94 = arith.select %90, %93, %86 : vector<24x128xi1>, vector<24x128xf32>
    %c4_i32 = arith.constant 4 : i32
    %95 = vector.broadcast %c4_i32 : i32 to vector<24x128xi32>
    %96 = arith.andi %26, %95 : vector<24x128xi32>
    %c0_i32_32 = arith.constant 0 : i32
    %97 = vector.broadcast %c0_i32_32 : i32 to vector<24x128xi32>
    %98 = arith.cmpi ne, %96, %97 : vector<24x128xi32>
    %99 = vector.extract_strided_slice %94 {offsets = [20, 0], sizes = [4, 128], strides = [1, 1]} : vector<24x128xf32> to vector<4x128xf32>
    %100 = vector.extract_strided_slice %94 {offsets = [0, 0], sizes = [20, 128], strides = [1, 1]} : vector<24x128xf32> to vector<20x128xf32>
    %101 = tpu.concatenate %99, %100 in 0 : vector<4x128xf32>, vector<20x128xf32> -> vector<24x128xf32>
    %102 = arith.select %98, %101, %94 : vector<24x128xi1>, vector<24x128xf32>
    %c8_i32_33 = arith.constant 8 : i32
    %103 = vector.broadcast %c8_i32_33 : i32 to vector<24x128xi32>
    %104 = arith.cmpi slt, %26, %103 : vector<24x128xi32>
    %cst_34 = arith.constant 1.000000e+30 : f32
    %105 = vector.broadcast %cst_34 : f32 to vector<24x128xf32>
    %106 = arith.select %104, %102, %105 : vector<24x128xi1>, vector<24x128xf32>
    %c0_35 = arith.constant 0 : index
    %c0_36 = arith.constant 0 : index
    %107 = vector.load %arg6[%c0_35, %c0_36] : memref<24x128xf32, #tpu.memory_space<vmem>>, vector<24x128xf32>
    tpu.vector_store %arg6[%c0_35, %c0_36], %106 {strides = array<i32>} : memref<24x128xf32, #tpu.memory_space<vmem>>, vector<24x128xf32>,
    %108 = vector.extract_strided_slice %25 {offsets = [0, 0], sizes = [16, 16], strides = [1, 1]} : vector<128x16xf32> to vector<16x16xf32>
    %109 = tpu.iota {dimensions = array<i32: 0>} : vector<16x128xi32>
    %110 = tpu.iota {dimensions = array<i32: 1>} : vector<16x128xi32>
    %111 = arith.mulf %108, %108 : vector<16x16xf32>
    %cst_37 = arith.constant dense<0.000000e+00> : vector<16xf32>
    %112 = vector.multi_reduction <add>, %111, %cst_37 [1] : vector<16x16xf32> to vector<16xf32>
    %113 = vector.shape_cast %112 : vector<16xf32> to vector<16x1xf32>
    %cst_38 = arith.constant 1.000000e+00 : f32
    %114 = vector.broadcast %cst_38 : f32 to vector<1x16xf32>
    %115 = arith.mulf %25, %25 : vector<128x16xf32>
    %cst_39 = arith.constant dense<0.000000e+00> : vector<1x128xf32>
    %116 = tpu.matmul %114, %115, %cst_39 {dimension_numbers = #tpu.dot_dimension_numbers<[1], [1], [0], [0], [0, 0, 1, 0], [], []>} : vector<1x16xf32>, vector<128x16xf32>, vector<1x128xf32> -> vector<1x128xf32>
    %cst_40 = arith.constant dense<0.000000e+00> : vector<16x128xf32>
    %117 = tpu.matmul %108, %25, %cst_40 {dimension_numbers = #tpu.dot_dimension_numbers<[1], [1], [0], [0], [0, 0, 1, 0], [], []>} : vector<16x16xf32>, vector<128x16xf32>, vector<16x128xf32> -> vector<16x128xf32>
    %118 = vector.broadcast %113 : vector<16x1xf32> to vector<16x128xf32>
    %119 = vector.broadcast %116 : vector<1x128xf32> to vector<16x128xf32>
    %120 = arith.addf %118, %119 : vector<16x128xf32>
    %cst_41 = arith.constant 2.000000e+00 : f32
    %121 = vector.broadcast %cst_41 : f32 to vector<16x128xf32>
    %122 = arith.mulf %121, %117 : vector<16x128xf32>
    %123 = arith.subf %120, %122 : vector<16x128xf32>
    %cst_42 = arith.constant 0.000000e+00 : f32
    %124 = vector.broadcast %cst_42 : f32 to vector<16x128xf32>
    %125 = arith.maximumf %123, %124 : vector<16x128xf32>
    %c12_i32 = arith.constant 12 : i32
    %126 = vector.broadcast %c12_i32 : i32 to vector<16x128xi32>
    %127 = arith.cmpi slt, %109, %126 : vector<16x128xi32>
    %c12_i32_43 = arith.constant 12 : i32
    %128 = vector.broadcast %c12_i32_43 : i32 to vector<16x128xi32>
    %129 = arith.cmpi slt, %110, %128 : vector<16x128xi32>
    %130 = arith.andi %127, %129 : vector<16x128xi1>
    %131 = arith.subi %109, %110 : vector<16x128xi32>
    %132 = arith.sitofp %131 : vector<16x128xi32> to vector<16x128xf32>
    %133 = arith.mulf %132, %132 : vector<16x128xf32>
    %134 = math.absf %132 : vector<16x128xf32>
    %cst_44 = arith.constant 2.000000e+00 : f32
    %135 = vector.broadcast %cst_44 : f32 to vector<16x128xf32>
    %136 = arith.cmpf ogt, %134, %135 : vector<16x128xf32>
    %cst_45 = arith.constant 1.000000e+00 : f32
    %137 = vector.broadcast %cst_45 : f32 to vector<16x128xf32>
    %138 = arith.addf %133, %137 : vector<16x128xf32>
    %cst_46 = arith.constant 2.000000e+00 : f32
    %139 = vector.broadcast %cst_46 : f32 to vector<16x128xf32>
    %140 = arith.subf %139, %125 : vector<16x128xf32>
    %cst_47 = arith.constant 0.000000e+00 : f32
    %141 = vector.broadcast %cst_47 : f32 to vector<16x128xf32>
    %142 = arith.maximumf %140, %141 : vector<16x128xf32>
    %143 = arith.mulf %138, %142 : vector<16x128xf32>
    %cst_48 = arith.constant 1.000000e+00 : f32
    %144 = vector.broadcast %cst_48 : f32 to vector<16x128xf32>
    %145 = arith.addf %133, %144 : vector<16x128xf32>
    %146 = arith.divf %125, %145 : vector<16x128xf32>
    %147 = arith.select %136, %143, %146 : vector<16x128xi1>, vector<16x128xf32>
    %cst_49 = arith.constant 0.000000e+00 : f32
    %148 = vector.broadcast %cst_49 : f32 to vector<16x128xf32>
    %149 = arith.select %130, %147, %148 : vector<16x128xi1>, vector<16x128xf32>
    %cst_50 = arith.constant 1.000000e+00 : f32
    %150 = vector.broadcast %cst_50 : f32 to vector<1x16xf32>
    %cst_51 = arith.constant dense<0.000000e+00> : vector<1x128xf32>
    %151 = tpu.matmul %150, %149, %cst_51 {dimension_numbers = #tpu.dot_dimension_numbers<[1], [0], [0], [1], [0, 0, 1, 1], [], []>} : vector<1x16xf32>, vector<16x128xf32>, vector<1x128xf32> -> vector<1x128xf32>
    %cst_52 = arith.constant dense<0.000000e+00> : vector<1xf32>
    %152 = vector.multi_reduction <add>, %151, %cst_52 [1] : vector<1x128xf32> to vector<1xf32>
    %153 = vector.shape_cast %152 : vector<1xf32> to vector<1x1xf32>
    %cst_53 = arith.constant 1.440000e+02 : f32
    %154 = vector.broadcast %cst_53 : f32 to vector<1x1xf32>
    %155 = arith.divf %153, %154 : vector<1x1xf32>
    %cst_54 = arith.constant 1.000000e+30 : f32
    %156 = vector.broadcast %cst_54 : f32 to vector<16x128xf32>
    %157 = arith.select %130, %125, %156 : vector<16x128xi1>, vector<16x128xf32>
    %cst_55 = arith.constant 1.000000e+30 : f32
    %158 = vector.broadcast %cst_55 : f32 to vector<8x128xf32>
    %159 = tpu.concatenate %157, %158 in 0 : vector<16x128xf32>, vector<8x128xf32> -> vector<24x128xf32>
    %c1_i32_56 = arith.constant 1 : i32
    %160 = vector.broadcast %c1_i32_56 : i32 to vector<24x128xi32>
    %161 = arith.andi %26, %160 : vector<24x128xi32>
    %c0_i32_57 = arith.constant 0 : i32
    %162 = vector.broadcast %c0_i32_57 : i32 to vector<24x128xi32>
    %163 = arith.cmpi ne, %161, %162 : vector<24x128xi32>
    %164 = vector.extract_strided_slice %159 {offsets = [23, 0], sizes = [1, 128], strides = [1, 1]} : vector<24x128xf32> to vector<1x128xf32>
    %165 = vector.extract_strided_slice %159 {offsets = [0, 0], sizes = [23, 128], strides = [1, 1]} : vector<24x128xf32> to vector<23x128xf32>
    %166 = tpu.concatenate %164, %165 in 0 : vector<1x128xf32>, vector<23x128xf32> -> vector<24x128xf32>
    %167 = arith.select %163, %166, %159 : vector<24x128xi1>, vector<24x128xf32>
    %c2_i32_58 = arith.constant 2 : i32
    %168 = vector.broadcast %c2_i32_58 : i32 to vector<24x128xi32>
    %169 = arith.andi %26, %168 : vector<24x128xi32>
    %c0_i32_59 = arith.constant 0 : i32
    %170 = vector.broadcast %c0_i32_59 : i32 to vector<24x128xi32>
    %171 = arith.cmpi ne, %169, %170 : vector<24x128xi32>
    %172 = vector.extract_strided_slice %167 {offsets = [22, 0], sizes = [2, 128], strides = [1, 1]} : vector<24x128xf32> to vector<2x128xf32>
    %173 = vector.extract_strided_slice %167 {offsets = [0, 0], sizes = [22, 128], strides = [1, 1]} : vector<24x128xf32> to vector<22x128xf32>
    %174 = tpu.concatenate %172, %173 in 0 : vector<2x128xf32>, vector<22x128xf32> -> vector<24x128xf32>
    %175 = arith.select %171, %174, %167 : vector<24x128xi1>, vector<24x128xf32>
    %c4_i32_60 = arith.constant 4 : i32
    %176 = vector.broadcast %c4_i32_60 : i32 to vector<24x128xi32>
    %177 = arith.andi %26, %176 : vector<24x128xi32>
    %c0_i32_61 = arith.constant 0 : i32
    %178 = vector.broadcast %c0_i32_61 : i32 to vector<24x128xi32>
    %179 = arith.cmpi ne, %177, %178 : vector<24x128xi32>
    %180 = vector.extract_strided_slice %175 {offsets = [20, 0], sizes = [4, 128], strides = [1, 1]} : vector<24x128xf32> to vector<4x128xf32>
    %181 = vector.extract_strided_slice %175 {offsets = [0, 0], sizes = [20, 128], strides = [1, 1]} : vector<24x128xf32> to vector<20x128xf32>
    %182 = tpu.concatenate %180, %181 in 0 : vector<4x128xf32>, vector<20x128xf32> -> vector<24x128xf32>
    %183 = arith.select %179, %182, %175 : vector<24x128xi1>, vector<24x128xf32>
    %c8_i32_62 = arith.constant 8 : i32
    %184 = vector.broadcast %c8_i32_62 : i32 to vector<24x128xi32>
    %185 = arith.andi %26, %184 : vector<24x128xi32>
    %c0_i32_63 = arith.constant 0 : i32
    %186 = vector.broadcast %c0_i32_63 : i32 to vector<24x128xi32>
    %187 = arith.cmpi ne, %185, %186 : vector<24x128xi32>
    %188 = vector.extract_strided_slice %183 {offsets = [16, 0], sizes = [8, 128], strides = [1, 1]} : vector<24x128xf32> to vector<8x128xf32>
    %189 = vector.extract_strided_slice %183 {offsets = [0, 0], sizes = [16, 128], strides = [1, 1]} : vector<24x128xf32> to vector<16x128xf32>
    %190 = tpu.concatenate %188, %189 in 0 : vector<8x128xf32>, vector<16x128xf32> -> vector<24x128xf32>
    %191 = arith.select %187, %190, %183 : vector<24x128xi1>, vector<24x128xf32>
    %c12_i32_64 = arith.constant 12 : i32
    %192 = vector.broadcast %c12_i32_64 : i32 to vector<24x128xi32>
    %193 = arith.cmpi slt, %26, %192 : vector<24x128xi32>
    %cst_65 = arith.constant 1.000000e+30 : f32
    %194 = vector.broadcast %cst_65 : f32 to vector<24x128xf32>
    %195 = arith.select %193, %191, %194 : vector<24x128xi1>, vector<24x128xf32>
    %c0_66 = arith.constant 0 : index
    %c0_67 = arith.constant 0 : index
    %196 = vector.load %arg7[%c0_66, %c0_67] : memref<24x128xf32, #tpu.memory_space<vmem>>, vector<24x128xf32>
    tpu.vector_store %arg7[%c0_66, %c0_67], %195 {strides = array<i32>} : memref<24x128xf32, #tpu.memory_space<vmem>>, vector<24x128xf32>,
    %197 = vector.extract_strided_slice %25 {offsets = [0, 0], sizes = [16, 16], strides = [1, 1]} : vector<128x16xf32> to vector<16x16xf32>
    %198 = tpu.iota {dimensions = array<i32: 0>} : vector<16x128xi32>
    %199 = tpu.iota {dimensions = array<i32: 1>} : vector<16x128xi32>
    %200 = arith.mulf %197, %197 : vector<16x16xf32>
    %cst_68 = arith.constant dense<0.000000e+00> : vector<16xf32>
    %201 = vector.multi_reduction <add>, %200, %cst_68 [1] : vector<16x16xf32> to vector<16xf32>
    %202 = vector.shape_cast %201 : vector<16xf32> to vector<16x1xf32>
    %cst_69 = arith.constant 1.000000e+00 : f32
    %203 = vector.broadcast %cst_69 : f32 to vector<1x16xf32>
    %204 = arith.mulf %13, %13 : vector<128x16xf32>
    %cst_70 = arith.constant dense<0.000000e+00> : vector<1x128xf32>
    %205 = tpu.matmul %203, %204, %cst_70 {dimension_numbers = #tpu.dot_dimension_numbers<[1], [1], [0], [0], [0, 0, 1, 0], [], []>} : vector<1x16xf32>, vector<128x16xf32>, vector<1x128xf32> -> vector<1x128xf32>
    %cst_71 = arith.constant dense<0.000000e+00> : vector<16x128xf32>
    %206 = tpu.matmul %197, %13, %cst_71 {dimension_numbers = #tpu.dot_dimension_numbers<[1], [1], [0], [0], [0, 0, 1, 0], [], []>} : vector<16x16xf32>, vector<128x16xf32>, vector<16x128xf32> -> vector<16x128xf32>
    %207 = vector.broadcast %202 : vector<16x1xf32> to vector<16x128xf32>
    %208 = vector.broadcast %205 : vector<1x128xf32> to vector<16x128xf32>
    %209 = arith.addf %207, %208 : vector<16x128xf32>
    %cst_72 = arith.constant 2.000000e+00 : f32
    %210 = vector.broadcast %cst_72 : f32 to vector<16x128xf32>
    %211 = arith.mulf %210, %206 : vector<16x128xf32>
    %212 = arith.subf %209, %211 : vector<16x128xf32>
    %cst_73 = arith.constant 0.000000e+00 : f32
    %213 = vector.broadcast %cst_73 : f32 to vector<16x128xf32>
    %214 = arith.maximumf %212, %213 : vector<16x128xf32>
    %c12_i32_74 = arith.constant 12 : i32
    %215 = vector.broadcast %c12_i32_74 : i32 to vector<16x128xi32>
    %216 = arith.cmpi slt, %198, %215 : vector<16x128xi32>
    %c8_i32_75 = arith.constant 8 : i32
    %217 = vector.broadcast %c8_i32_75 : i32 to vector<16x128xi32>
    %218 = arith.cmpi slt, %199, %217 : vector<16x128xi32>
    %219 = arith.andi %216, %218 : vector<16x128xi1>
    %cst_76 = arith.constant 1.000000e+30 : f32
    %220 = vector.broadcast %cst_76 : f32 to vector<16x128xf32>
    %221 = arith.select %219, %214, %220 : vector<16x128xi1>, vector<16x128xf32>
    %cst_77 = arith.constant 1.000000e+30 : f32
    %222 = vector.broadcast %cst_77 : f32 to vector<8x128xf32>
    %223 = tpu.concatenate %221, %222 in 0 : vector<16x128xf32>, vector<8x128xf32> -> vector<24x128xf32>
    %c1_i32_78 = arith.constant 1 : i32
    %224 = vector.broadcast %c1_i32_78 : i32 to vector<24x128xi32>
    %225 = arith.andi %26, %224 : vector<24x128xi32>
    %c0_i32_79 = arith.constant 0 : i32
    %226 = vector.broadcast %c0_i32_79 : i32 to vector<24x128xi32>
    %227 = arith.cmpi ne, %225, %226 : vector<24x128xi32>
    %228 = vector.extract_strided_slice %223 {offsets = [23, 0], sizes = [1, 128], strides = [1, 1]} : vector<24x128xf32> to vector<1x128xf32>
    %229 = vector.extract_strided_slice %223 {offsets = [0, 0], sizes = [23, 128], strides = [1, 1]} : vector<24x128xf32> to vector<23x128xf32>
    %230 = tpu.concatenate %228, %229 in 0 : vector<1x128xf32>, vector<23x128xf32> -> vector<24x128xf32>
    %231 = arith.select %227, %230, %223 : vector<24x128xi1>, vector<24x128xf32>
    %c2_i32_80 = arith.constant 2 : i32
    %232 = vector.broadcast %c2_i32_80 : i32 to vector<24x128xi32>
    %233 = arith.andi %26, %232 : vector<24x128xi32>
    %c0_i32_81 = arith.constant 0 : i32
    %234 = vector.broadcast %c0_i32_81 : i32 to vector<24x128xi32>
    %235 = arith.cmpi ne, %233, %234 : vector<24x128xi32>
    %236 = vector.extract_strided_slice %231 {offsets = [22, 0], sizes = [2, 128], strides = [1, 1]} : vector<24x128xf32> to vector<2x128xf32>
    %237 = vector.extract_strided_slice %231 {offsets = [0, 0], sizes = [22, 128], strides = [1, 1]} : vector<24x128xf32> to vector<22x128xf32>
    %238 = tpu.concatenate %236, %237 in 0 : vector<2x128xf32>, vector<22x128xf32> -> vector<24x128xf32>
    %239 = arith.select %235, %238, %231 : vector<24x128xi1>, vector<24x128xf32>
    %c4_i32_82 = arith.constant 4 : i32
    %240 = vector.broadcast %c4_i32_82 : i32 to vector<24x128xi32>
    %241 = arith.andi %26, %240 : vector<24x128xi32>
    %c0_i32_83 = arith.constant 0 : i32
    %242 = vector.broadcast %c0_i32_83 : i32 to vector<24x128xi32>
    %243 = arith.cmpi ne, %241, %242 : vector<24x128xi32>
    %244 = vector.extract_strided_slice %239 {offsets = [20, 0], sizes = [4, 128], strides = [1, 1]} : vector<24x128xf32> to vector<4x128xf32>
    %245 = vector.extract_strided_slice %239 {offsets = [0, 0], sizes = [20, 128], strides = [1, 1]} : vector<24x128xf32> to vector<20x128xf32>
    %246 = tpu.concatenate %244, %245 in 0 : vector<4x128xf32>, vector<20x128xf32> -> vector<24x128xf32>
    %247 = arith.select %243, %246, %239 : vector<24x128xi1>, vector<24x128xf32>
    %c8_i32_84 = arith.constant 8 : i32
    %248 = vector.broadcast %c8_i32_84 : i32 to vector<24x128xi32>
    %249 = arith.cmpi slt, %26, %248 : vector<24x128xi32>
    %cst_85 = arith.constant 1.000000e+30 : f32
    %250 = vector.broadcast %cst_85 : f32 to vector<24x128xf32>
    %251 = arith.select %249, %247, %250 : vector<24x128xi1>, vector<24x128xf32>
    %c0_86 = arith.constant 0 : index
    %c0_87 = arith.constant 0 : index
    %252 = vector.load %arg5[%c0_86, %c0_87] : memref<24x128xf32, #tpu.memory_space<vmem>>, vector<24x128xf32>
    tpu.vector_store %arg5[%c0_86, %c0_87], %251 {strides = array<i32>} : memref<24x128xf32, #tpu.memory_space<vmem>>, vector<24x128xf32>,
    %253 = tpu.iota {dimensions = array<i32: 0>} : vector<3x128xi32>
    %254 = tpu.iota {dimensions = array<i32: 1>} : vector<3x128xi32>
    %c0_i32_88 = arith.constant 0 : i32
    %255 = vector.broadcast %c0_i32_88 : i32 to vector<3x128xi32>
    %256 = arith.cmpi eq, %254, %255 : vector<3x128xi32>
    %c0_i32_89 = arith.constant 0 : i32
    %257 = vector.broadcast %c0_i32_89 : i32 to vector<3x128xi32>
    %258 = arith.cmpi eq, %253, %257 : vector<3x128xi32>
    %c1_i32_90 = arith.constant 1 : i32
    %259 = vector.broadcast %c1_i32_90 : i32 to vector<3x128xi32>
    %260 = arith.cmpi eq, %253, %259 : vector<3x128xi32>
    %c7_i32 = arith.constant 7 : i32
    %c11_i32 = arith.constant 11 : i32
    %261 = vector.broadcast %c7_i32 : i32 to vector<3x128xi32>
    %262 = vector.broadcast %c11_i32 : i32 to vector<3x128xi32>
    %263 = arith.select %260, %261, %262 : vector<3x128xi1>, vector<3x128xi32>
    %c7_i32_91 = arith.constant 7 : i32
    %264 = vector.broadcast %c7_i32_91 : i32 to vector<3x128xi32>
    %265 = arith.select %258, %264, %263 : vector<3x128xi1>, vector<3x128xi32>
    %c14_i32 = arith.constant 14 : i32
    %c22_i32 = arith.constant 22 : i32
    %266 = vector.broadcast %c14_i32 : i32 to vector<3x128xi32>
    %267 = vector.broadcast %c22_i32 : i32 to vector<3x128xi32>
    %268 = arith.select %260, %266, %267 : vector<3x128xi1>, vector<3x128xi32>
    %c18_i32 = arith.constant 18 : i32
    %269 = vector.broadcast %c18_i32 : i32 to vector<3x128xi32>
    %270 = arith.select %258, %269, %268 : vector<3x128xi1>, vector<3x128xi32>
    %271 = arith.cmpi eq, %254, %265 : vector<3x128xi32>
    %cst_92 = arith.constant 1.000000e+30 : f32
    %272 = vector.broadcast %cst_92 : f32 to vector<3x128xf32>
    %cst_93 = arith.constant 0.000000e+00 : f32
    %273 = vector.broadcast %cst_93 : f32 to vector<3x128xf32>
    %c0_i32_94 = arith.constant 0 : i32
    %c3_i32 = arith.constant 3 : i32
    %274 = arith.addi %c0_i32_94, %c3_i32 : i32
    %c1_i32_95 = arith.constant 1 : i32
    %275:3 = scf.for %arg8 = %c0_i32_94 to %274 step %c1_i32_95 iter_args(%arg9 = %272, %arg10 = %272, %arg11 = %273) -> (vector<3x128xf32>, vector<3x128xf32>, vector<3x128xf32>)  : i32 {
      %c8_i32_117 = arith.constant 8 : i32
      %348 = arith.muli %arg8, %c8_i32_117 : i32
      %349 = tpu.assume_multiple %348, 8 : i32
      %350 = arith.index_cast %349 : i32 to index
      %c0_118 = arith.constant 0 : index
      %351 = vector.load %arg5[%350, %c0_118] : memref<24x128xf32, #tpu.memory_space<vmem>>, vector<8x128xf32>
      %352 = arith.index_cast %349 : i32 to index
      %c0_119 = arith.constant 0 : index
      %353 = vector.load %arg6[%352, %c0_119] : memref<24x128xf32, #tpu.memory_space<vmem>>, vector<8x128xf32>
      %354 = arith.index_cast %349 : i32 to index
      %c0_120 = arith.constant 0 : index
      %355 = vector.load %arg7[%354, %c0_120] : memref<24x128xf32, #tpu.memory_space<vmem>>, vector<8x128xf32>
      %c0_i32_121 = arith.constant 0 : i32
      %356 = arith.addi %349, %c0_i32_121 : i32
      %357 = vector.extract_strided_slice %351 {offsets = [0, 0], sizes = [1, 128], strides = [1, 1]} : vector<8x128xf32> to vector<1x128xf32>
      %358 = vector.extract_strided_slice %353 {offsets = [0, 0], sizes = [1, 128], strides = [1, 1]} : vector<8x128xf32> to vector<1x128xf32>
      %359 = vector.extract_strided_slice %355 {offsets = [0, 0], sizes = [1, 128], strides = [1, 1]} : vector<8x128xf32> to vector<1x128xf32>
      %360 = vector.shape_cast %358 : vector<1x128xf32> to vector<1x128xf32>
      %361 = vector.broadcast %360 : vector<1x128xf32> to vector<3x128xf32>
      %362 = vector.shape_cast %359 : vector<1x128xf32> to vector<1x128xf32>
      %363 = vector.broadcast %362 : vector<1x128xf32> to vector<3x128xf32>
      %364 = arith.select %260, %361, %363 : vector<3x128xi1>, vector<3x128xf32>
      %365 = vector.shape_cast %357 : vector<1x128xf32> to vector<1x128xf32>
      %366 = vector.broadcast %365 : vector<1x128xf32> to vector<3x128xf32>
      %367 = arith.select %258, %366, %364 : vector<3x128xi1>, vector<3x128xf32>
      %368 = vector.extract_strided_slice %arg9 {offsets = [0, 127], sizes = [3, 1], strides = [1, 1]} : vector<3x128xf32> to vector<3x1xf32>
      %369 = vector.extract_strided_slice %arg9 {offsets = [0, 0], sizes = [3, 127], strides = [1, 1]} : vector<3x128xf32> to vector<3x127xf32>
      %370 = tpu.concatenate %368, %369 in 1 : vector<3x1xf32>, vector<3x127xf32> -> vector<3x128xf32>
      %cst_122 = arith.constant 1.000000e+30 : f32
      %371 = vector.broadcast %cst_122 : f32 to vector<3x128xf32>
      %372 = arith.select %256, %371, %370 : vector<3x128xi1>, vector<3x128xf32>
      %c0_i32_123 = arith.constant 0 : i32
      %373 = arith.cmpi eq, %356, %c0_i32_123 : i32
      %cst_124 = arith.constant 0.000000e+00 : f32
      %cst_125 = arith.constant 1.000000e+30 : f32
      %374 = arith.select %373, %cst_124, %cst_125 : f32
      %375 = vector.extract_strided_slice %arg10 {offsets = [0, 127], sizes = [3, 1], strides = [1, 1]} : vector<3x128xf32> to vector<3x1xf32>
      %376 = vector.extract_strided_slice %arg10 {offsets = [0, 0], sizes = [3, 127], strides = [1, 1]} : vector<3x128xf32> to vector<3x127xf32>
      %377 = tpu.concatenate %375, %376 in 1 : vector<3x1xf32>, vector<3x127xf32> -> vector<3x128xf32>
      %378 = vector.broadcast %374 : f32 to vector<3x128xf32>
      %379 = arith.select %256, %378, %377 : vector<3x128xi1>, vector<3x128xf32>
      %380 = arith.minimumf %372, %arg9 : vector<3x128xf32>
      %381 = arith.minimumf %380, %379 : vector<3x128xf32>
      %382 = arith.subf %381, %372 : vector<3x128xf32>
      %cst_126 = arith.constant 1.000000e+01 : f32
      %383 = vector.broadcast %cst_126 : f32 to vector<3x128xf32>
      %384 = arith.mulf %382, %383 : vector<3x128xf32>
      %385 = math.exp %384 : vector<3x128xf32>
      %386 = arith.subf %381, %arg9 : vector<3x128xf32>
      %cst_127 = arith.constant 1.000000e+01 : f32
      %387 = vector.broadcast %cst_127 : f32 to vector<3x128xf32>
      %388 = arith.mulf %386, %387 : vector<3x128xf32>
      %389 = math.exp %388 : vector<3x128xf32>
      %390 = arith.addf %385, %389 : vector<3x128xf32>
      %391 = arith.subf %381, %379 : vector<3x128xf32>
      %cst_128 = arith.constant 1.000000e+01 : f32
      %392 = vector.broadcast %cst_128 : f32 to vector<3x128xf32>
      %393 = arith.mulf %391, %392 : vector<3x128xf32>
      %394 = math.exp %393 : vector<3x128xf32>
      %395 = arith.addf %390, %394 : vector<3x128xf32>
      %396 = math.log %395 : vector<3x128xf32>
      %cst_129 = arith.constant 1.000000e-01 : f32
      %397 = vector.broadcast %cst_129 : f32 to vector<3x128xf32>
      %398 = arith.mulf %397, %396 : vector<3x128xf32>
      %399 = arith.subf %381, %398 : vector<3x128xf32>
      %400 = arith.addf %367, %399 : vector<3x128xf32>
      %cst_130 = arith.constant 1.000000e+30 : f32
      %401 = vector.broadcast %cst_130 : f32 to vector<3x128xf32>
      %402 = arith.minimumf %400, %401 : vector<3x128xf32>
      %403 = vector.broadcast %356 : i32 to vector<3x128xi32>
      %404 = arith.cmpi eq, %270, %403 : vector<3x128xi32>
      %405 = arith.andi %271, %404 : vector<3x128xi1>
      %cst_131 = arith.constant 0.000000e+00 : f32
      %406 = vector.broadcast %cst_131 : f32 to vector<3x128xf32>
      %407 = arith.select %405, %402, %406 : vector<3x128xi1>, vector<3x128xf32>
      %408 = arith.addf %arg11, %407 : vector<3x128xf32>
      %c1_i32_132 = arith.constant 1 : i32
      %409 = arith.addi %349, %c1_i32_132 : i32
      %410 = vector.extract_strided_slice %351 {offsets = [1, 0], sizes = [1, 128], strides = [1, 1]} : vector<8x128xf32> to vector<1x128xf32>
      %411 = vector.extract_strided_slice %353 {offsets = [1, 0], sizes = [1, 128], strides = [1, 1]} : vector<8x128xf32> to vector<1x128xf32>
      %412 = vector.extract_strided_slice %355 {offsets = [1, 0], sizes = [1, 128], strides = [1, 1]} : vector<8x128xf32> to vector<1x128xf32>
      %413 = vector.shape_cast %411 : vector<1x128xf32> to vector<1x128xf32>
      %414 = vector.broadcast %413 : vector<1x128xf32> to vector<3x128xf32>
      %415 = vector.shape_cast %412 : vector<1x128xf32> to vector<1x128xf32>
      %416 = vector.broadcast %415 : vector<1x128xf32> to vector<3x128xf32>
      %417 = arith.select %260, %414, %416 : vector<3x128xi1>, vector<3x128xf32>
      %418 = vector.shape_cast %410 : vector<1x128xf32> to vector<1x128xf32>
      %419 = vector.broadcast %418 : vector<1x128xf32> to vector<3x128xf32>
      %420 = arith.select %258, %419, %417 : vector<3x128xi1>, vector<3x128xf32>
      %421 = vector.extract_strided_slice %402 {offsets = [0, 127], sizes = [3, 1], strides = [1, 1]} : vector<3x128xf32> to vector<3x1xf32>
      %422 = vector.extract_strided_slice %402 {offsets = [0, 0], sizes = [3, 127], strides = [1, 1]} : vector<3x128xf32> to vector<3x127xf32>
      %423 = tpu.concatenate %421, %422 in 1 : vector<3x1xf32>, vector<3x127xf32> -> vector<3x128xf32>
      %cst_133 = arith.constant 1.000000e+30 : f32
      %424 = vector.broadcast %cst_133 : f32 to vector<3x128xf32>
      %425 = arith.select %256, %424, %423 : vector<3x128xi1>, vector<3x128xf32>
      %c0_i32_134 = arith.constant 0 : i32
      %426 = arith.cmpi eq, %409, %c0_i32_134 : i32
      %cst_135 = arith.constant 0.000000e+00 : f32
      %cst_136 = arith.constant 1.000000e+30 : f32
      %427 = arith.select %426, %cst_135, %cst_136 : f32
      %428 = vector.extract_strided_slice %arg9 {offsets = [0, 127], sizes = [3, 1], strides = [1, 1]} : vector<3x128xf32> to vector<3x1xf32>
      %429 = vector.extract_strided_slice %arg9 {offsets = [0, 0], sizes = [3, 127], strides = [1, 1]} : vector<3x128xf32> to vector<3x127xf32>
      %430 = tpu.concatenate %428, %429 in 1 : vector<3x1xf32>, vector<3x127xf32> -> vector<3x128xf32>
      %431 = vector.broadcast %427 : f32 to vector<3x128xf32>
      %432 = arith.select %256, %431, %430 : vector<3x128xi1>, vector<3x128xf32>
      %433 = arith.minimumf %425, %402 : vector<3x128xf32>
      %434 = arith.minimumf %433, %432 : vector<3x128xf32>
      %435 = arith.subf %434, %425 : vector<3x128xf32>
      %cst_137 = arith.constant 1.000000e+01 : f32
      %436 = vector.broadcast %cst_137 : f32 to vector<3x128xf32>
      %437 = arith.mulf %435, %436 : vector<3x128xf32>
      %438 = math.exp %437 : vector<3x128xf32>
      %439 = arith.subf %434, %402 : vector<3x128xf32>
      %cst_138 = arith.constant 1.000000e+01 : f32
      %440 = vector.broadcast %cst_138 : f32 to vector<3x128xf32>
      %441 = arith.mulf %439, %440 : vector<3x128xf32>
      %442 = math.exp %441 : vector<3x128xf32>
      %443 = arith.addf %438, %442 : vector<3x128xf32>
      %444 = arith.subf %434, %432 : vector<3x128xf32>
      %cst_139 = arith.constant 1.000000e+01 : f32
      %445 = vector.broadcast %cst_139 : f32 to vector<3x128xf32>
      %446 = arith.mulf %444, %445 : vector<3x128xf32>
      %447 = math.exp %446 : vector<3x128xf32>
      %448 = arith.addf %443, %447 : vector<3x128xf32>
      %449 = math.log %448 : vector<3x128xf32>
      %cst_140 = arith.constant 1.000000e-01 : f32
      %450 = vector.broadcast %cst_140 : f32 to vector<3x128xf32>
      %451 = arith.mulf %450, %449 : vector<3x128xf32>
      %452 = arith.subf %434, %451 : vector<3x128xf32>
      %453 = arith.addf %420, %452 : vector<3x128xf32>
      %cst_141 = arith.constant 1.000000e+30 : f32
      %454 = vector.broadcast %cst_141 : f32 to vector<3x128xf32>
      %455 = arith.minimumf %453, %454 : vector<3x128xf32>
      %456 = vector.broadcast %409 : i32 to vector<3x128xi32>
      %457 = arith.cmpi eq, %270, %456 : vector<3x128xi32>
      %458 = arith.andi %271, %457 : vector<3x128xi1>
      %cst_142 = arith.constant 0.000000e+00 : f32
      %459 = vector.broadcast %cst_142 : f32 to vector<3x128xf32>
      %460 = arith.select %458, %455, %459 : vector<3x128xi1>, vector<3x128xf32>
      %461 = arith.addf %408, %460 : vector<3x128xf32>
      %c2_i32_143 = arith.constant 2 : i32
      %462 = arith.addi %349, %c2_i32_143 : i32
      %463 = vector.extract_strided_slice %351 {offsets = [2, 0], sizes = [1, 128], strides = [1, 1]} : vector<8x128xf32> to vector<1x128xf32>
      %464 = vector.extract_strided_slice %353 {offsets = [2, 0], sizes = [1, 128], strides = [1, 1]} : vector<8x128xf32> to vector<1x128xf32>
      %465 = vector.extract_strided_slice %355 {offsets = [2, 0], sizes = [1, 128], strides = [1, 1]} : vector<8x128xf32> to vector<1x128xf32>
      %466 = vector.shape_cast %464 : vector<1x128xf32> to vector<1x128xf32>
      %467 = vector.broadcast %466 : vector<1x128xf32> to vector<3x128xf32>
      %468 = vector.shape_cast %465 : vector<1x128xf32> to vector<1x128xf32>
      %469 = vector.broadcast %468 : vector<1x128xf32> to vector<3x128xf32>
      %470 = arith.select %260, %467, %469 : vector<3x128xi1>, vector<3x128xf32>
      %471 = vector.shape_cast %463 : vector<1x128xf32> to vector<1x128xf32>
      %472 = vector.broadcast %471 : vector<1x128xf32> to vector<3x128xf32>
      %473 = arith.select %258, %472, %470 : vector<3x128xi1>, vector<3x128xf32>
      %474 = vector.extract_strided_slice %455 {offsets = [0, 127], sizes = [3, 1], strides = [1, 1]} : vector<3x128xf32> to vector<3x1xf32>
      %475 = vector.extract_strided_slice %455 {offsets = [0, 0], sizes = [3, 127], strides = [1, 1]} : vector<3x128xf32> to vector<3x127xf32>
      %476 = tpu.concatenate %474, %475 in 1 : vector<3x1xf32>, vector<3x127xf32> -> vector<3x128xf32>
      %cst_144 = arith.constant 1.000000e+30 : f32
      %477 = vector.broadcast %cst_144 : f32 to vector<3x128xf32>
      %478 = arith.select %256, %477, %476 : vector<3x128xi1>, vector<3x128xf32>
      %c0_i32_145 = arith.constant 0 : i32
      %479 = arith.cmpi eq, %462, %c0_i32_145 : i32
      %cst_146 = arith.constant 0.000000e+00 : f32
      %cst_147 = arith.constant 1.000000e+30 : f32
      %480 = arith.select %479, %cst_146, %cst_147 : f32
      %481 = vector.extract_strided_slice %402 {offsets = [0, 127], sizes = [3, 1], strides = [1, 1]} : vector<3x128xf32> to vector<3x1xf32>
      %482 = vector.extract_strided_slice %402 {offsets = [0, 0], sizes = [3, 127], strides = [1, 1]} : vector<3x128xf32> to vector<3x127xf32>
      %483 = tpu.concatenate %481, %482 in 1 : vector<3x1xf32>, vector<3x127xf32> -> vector<3x128xf32>
      %484 = vector.broadcast %480 : f32 to vector<3x128xf32>
      %485 = arith.select %256, %484, %483 : vector<3x128xi1>, vector<3x128xf32>
      %486 = arith.minimumf %478, %455 : vector<3x128xf32>
      %487 = arith.minimumf %486, %485 : vector<3x128xf32>
      %488 = arith.subf %487, %478 : vector<3x128xf32>
      %cst_148 = arith.constant 1.000000e+01 : f32
      %489 = vector.broadcast %cst_148 : f32 to vector<3x128xf32>
      %490 = arith.mulf %488, %489 : vector<3x128xf32>
      %491 = math.exp %490 : vector<3x128xf32>
      %492 = arith.subf %487, %455 : vector<3x128xf32>
      %cst_149 = arith.constant 1.000000e+01 : f32
      %493 = vector.broadcast %cst_149 : f32 to vector<3x128xf32>
      %494 = arith.mulf %492, %493 : vector<3x128xf32>
      %495 = math.exp %494 : vector<3x128xf32>
      %496 = arith.addf %491, %495 : vector<3x128xf32>
      %497 = arith.subf %487, %485 : vector<3x128xf32>
      %cst_150 = arith.constant 1.000000e+01 : f32
      %498 = vector.broadcast %cst_150 : f32 to vector<3x128xf32>
      %499 = arith.mulf %497, %498 : vector<3x128xf32>
      %500 = math.exp %499 : vector<3x128xf32>
      %501 = arith.addf %496, %500 : vector<3x128xf32>
      %502 = math.log %501 : vector<3x128xf32>
      %cst_151 = arith.constant 1.000000e-01 : f32
      %503 = vector.broadcast %cst_151 : f32 to vector<3x128xf32>
      %504 = arith.mulf %503, %502 : vector<3x128xf32>
      %505 = arith.subf %487, %504 : vector<3x128xf32>
      %506 = arith.addf %473, %505 : vector<3x128xf32>
      %cst_152 = arith.constant 1.000000e+30 : f32
      %507 = vector.broadcast %cst_152 : f32 to vector<3x128xf32>
      %508 = arith.minimumf %506, %507 : vector<3x128xf32>
      %509 = vector.broadcast %462 : i32 to vector<3x128xi32>
      %510 = arith.cmpi eq, %270, %509 : vector<3x128xi32>
      %511 = arith.andi %271, %510 : vector<3x128xi1>
      %cst_153 = arith.constant 0.000000e+00 : f32
      %512 = vector.broadcast %cst_153 : f32 to vector<3x128xf32>
      %513 = arith.select %511, %508, %512 : vector<3x128xi1>, vector<3x128xf32>
      %514 = arith.addf %461, %513 : vector<3x128xf32>
      %c3_i32_154 = arith.constant 3 : i32
      %515 = arith.addi %349, %c3_i32_154 : i32
      %516 = vector.extract_strided_slice %351 {offsets = [3, 0], sizes = [1, 128], strides = [1, 1]} : vector<8x128xf32> to vector<1x128xf32>
      %517 = vector.extract_strided_slice %353 {offsets = [3, 0], sizes = [1, 128], strides = [1, 1]} : vector<8x128xf32> to vector<1x128xf32>
      %518 = vector.extract_strided_slice %355 {offsets = [3, 0], sizes = [1, 128], strides = [1, 1]} : vector<8x128xf32> to vector<1x128xf32>
      %519 = vector.shape_cast %517 : vector<1x128xf32> to vector<1x128xf32>
      %520 = vector.broadcast %519 : vector<1x128xf32> to vector<3x128xf32>
      %521 = vector.shape_cast %518 : vector<1x128xf32> to vector<1x128xf32>
      %522 = vector.broadcast %521 : vector<1x128xf32> to vector<3x128xf32>
      %523 = arith.select %260, %520, %522 : vector<3x128xi1>, vector<3x128xf32>
      %524 = vector.shape_cast %516 : vector<1x128xf32> to vector<1x128xf32>
      %525 = vector.broadcast %524 : vector<1x128xf32> to vector<3x128xf32>
      %526 = arith.select %258, %525, %523 : vector<3x128xi1>, vector<3x128xf32>
      %527 = vector.extract_strided_slice %508 {offsets = [0, 127], sizes = [3, 1], strides = [1, 1]} : vector<3x128xf32> to vector<3x1xf32>
      %528 = vector.extract_strided_slice %508 {offsets = [0, 0], sizes = [3, 127], strides = [1, 1]} : vector<3x128xf32> to vector<3x127xf32>
      %529 = tpu.concatenate %527, %528 in 1 : vector<3x1xf32>, vector<3x127xf32> -> vector<3x128xf32>
      %cst_155 = arith.constant 1.000000e+30 : f32
      %530 = vector.broadcast %cst_155 : f32 to vector<3x128xf32>
      %531 = arith.select %256, %530, %529 : vector<3x128xi1>, vector<3x128xf32>
      %c0_i32_156 = arith.constant 0 : i32
      %532 = arith.cmpi eq, %515, %c0_i32_156 : i32
      %cst_157 = arith.constant 0.000000e+00 : f32
      %cst_158 = arith.constant 1.000000e+30 : f32
      %533 = arith.select %532, %cst_157, %cst_158 : f32
      %534 = vector.extract_strided_slice %455 {offsets = [0, 127], sizes = [3, 1], strides = [1, 1]} : vector<3x128xf32> to vector<3x1xf32>
      %535 = vector.extract_strided_slice %455 {offsets = [0, 0], sizes = [3, 127], strides = [1, 1]} : vector<3x128xf32> to vector<3x127xf32>
      %536 = tpu.concatenate %534, %535 in 1 : vector<3x1xf32>, vector<3x127xf32> -> vector<3x128xf32>
      %537 = vector.broadcast %533 : f32 to vector<3x128xf32>
      %538 = arith.select %256, %537, %536 : vector<3x128xi1>, vector<3x128xf32>
      %539 = arith.minimumf %531, %508 : vector<3x128xf32>
      %540 = arith.minimumf %539, %538 : vector<3x128xf32>
      %541 = arith.subf %540, %531 : vector<3x128xf32>
      %cst_159 = arith.constant 1.000000e+01 : f32
      %542 = vector.broadcast %cst_159 : f32 to vector<3x128xf32>
      %543 = arith.mulf %541, %542 : vector<3x128xf32>
      %544 = math.exp %543 : vector<3x128xf32>
      %545 = arith.subf %540, %508 : vector<3x128xf32>
      %cst_160 = arith.constant 1.000000e+01 : f32
      %546 = vector.broadcast %cst_160 : f32 to vector<3x128xf32>
      %547 = arith.mulf %545, %546 : vector<3x128xf32>
      %548 = math.exp %547 : vector<3x128xf32>
      %549 = arith.addf %544, %548 : vector<3x128xf32>
      %550 = arith.subf %540, %538 : vector<3x128xf32>
      %cst_161 = arith.constant 1.000000e+01 : f32
      %551 = vector.broadcast %cst_161 : f32 to vector<3x128xf32>
      %552 = arith.mulf %550, %551 : vector<3x128xf32>
      %553 = math.exp %552 : vector<3x128xf32>
      %554 = arith.addf %549, %553 : vector<3x128xf32>
      %555 = math.log %554 : vector<3x128xf32>
      %cst_162 = arith.constant 1.000000e-01 : f32
      %556 = vector.broadcast %cst_162 : f32 to vector<3x128xf32>
      %557 = arith.mulf %556, %555 : vector<3x128xf32>
      %558 = arith.subf %540, %557 : vector<3x128xf32>
      %559 = arith.addf %526, %558 : vector<3x128xf32>
      %cst_163 = arith.constant 1.000000e+30 : f32
      %560 = vector.broadcast %cst_163 : f32 to vector<3x128xf32>
      %561 = arith.minimumf %559, %560 : vector<3x128xf32>
      %562 = vector.broadcast %515 : i32 to vector<3x128xi32>
      %563 = arith.cmpi eq, %270, %562 : vector<3x128xi32>
      %564 = arith.andi %271, %563 : vector<3x128xi1>
      %cst_164 = arith.constant 0.000000e+00 : f32
      %565 = vector.broadcast %cst_164 : f32 to vector<3x128xf32>
      %566 = arith.select %564, %561, %565 : vector<3x128xi1>, vector<3x128xf32>
      %567 = arith.addf %514, %566 : vector<3x128xf32>
      %c4_i32_165 = arith.constant 4 : i32
      %568 = arith.addi %349, %c4_i32_165 : i32
      %569 = vector.extract_strided_slice %351 {offsets = [4, 0], sizes = [1, 128], strides = [1, 1]} : vector<8x128xf32> to vector<1x128xf32>
      %570 = vector.extract_strided_slice %353 {offsets = [4, 0], sizes = [1, 128], strides = [1, 1]} : vector<8x128xf32> to vector<1x128xf32>
      %571 = vector.extract_strided_slice %355 {offsets = [4, 0], sizes = [1, 128], strides = [1, 1]} : vector<8x128xf32> to vector<1x128xf32>
      %572 = vector.shape_cast %570 : vector<1x128xf32> to vector<1x128xf32>
      %573 = vector.broadcast %572 : vector<1x128xf32> to vector<3x128xf32>
      %574 = vector.shape_cast %571 : vector<1x128xf32> to vector<1x128xf32>
      %575 = vector.broadcast %574 : vector<1x128xf32> to vector<3x128xf32>
      %576 = arith.select %260, %573, %575 : vector<3x128xi1>, vector<3x128xf32>
      %577 = vector.shape_cast %569 : vector<1x128xf32> to vector<1x128xf32>
      %578 = vector.broadcast %577 : vector<1x128xf32> to vector<3x128xf32>
      %579 = arith.select %258, %578, %576 : vector<3x128xi1>, vector<3x128xf32>
      %580 = vector.extract_strided_slice %561 {offsets = [0, 127], sizes = [3, 1], strides = [1, 1]} : vector<3x128xf32> to vector<3x1xf32>
      %581 = vector.extract_strided_slice %561 {offsets = [0, 0], sizes = [3, 127], strides = [1, 1]} : vector<3x128xf32> to vector<3x127xf32>
      %582 = tpu.concatenate %580, %581 in 1 : vector<3x1xf32>, vector<3x127xf32> -> vector<3x128xf32>
      %cst_166 = arith.constant 1.000000e+30 : f32
      %583 = vector.broadcast %cst_166 : f32 to vector<3x128xf32>
      %584 = arith.select %256, %583, %582 : vector<3x128xi1>, vector<3x128xf32>
      %c0_i32_167 = arith.constant 0 : i32
      %585 = arith.cmpi eq, %568, %c0_i32_167 : i32
      %cst_168 = arith.constant 0.000000e+00 : f32
      %cst_169 = arith.constant 1.000000e+30 : f32
      %586 = arith.select %585, %cst_168, %cst_169 : f32
      %587 = vector.extract_strided_slice %508 {offsets = [0, 127], sizes = [3, 1], strides = [1, 1]} : vector<3x128xf32> to vector<3x1xf32>
      %588 = vector.extract_strided_slice %508 {offsets = [0, 0], sizes = [3, 127], strides = [1, 1]} : vector<3x128xf32> to vector<3x127xf32>
      %589 = tpu.concatenate %587, %588 in 1 : vector<3x1xf32>, vector<3x127xf32> -> vector<3x128xf32>
      %590 = vector.broadcast %586 : f32 to vector<3x128xf32>
      %591 = arith.select %256, %590, %589 : vector<3x128xi1>, vector<3x128xf32>
      %592 = arith.minimumf %584, %561 : vector<3x128xf32>
      %593 = arith.minimumf %592, %591 : vector<3x128xf32>
      %594 = arith.subf %593, %584 : vector<3x128xf32>
      %cst_170 = arith.constant 1.000000e+01 : f32
      %595 = vector.broadcast %cst_170 : f32 to vector<3x128xf32>
      %596 = arith.mulf %594, %595 : vector<3x128xf32>
      %597 = math.exp %596 : vector<3x128xf32>
      %598 = arith.subf %593, %561 : vector<3x128xf32>
      %cst_171 = arith.constant 1.000000e+01 : f32
      %599 = vector.broadcast %cst_171 : f32 to vector<3x128xf32>
      %600 = arith.mulf %598, %599 : vector<3x128xf32>
      %601 = math.exp %600 : vector<3x128xf32>
      %602 = arith.addf %597, %601 : vector<3x128xf32>
      %603 = arith.subf %593, %591 : vector<3x128xf32>
      %cst_172 = arith.constant 1.000000e+01 : f32
      %604 = vector.broadcast %cst_172 : f32 to vector<3x128xf32>
      %605 = arith.mulf %603, %604 : vector<3x128xf32>
      %606 = math.exp %605 : vector<3x128xf32>
      %607 = arith.addf %602, %606 : vector<3x128xf32>
      %608 = math.log %607 : vector<3x128xf32>
      %cst_173 = arith.constant 1.000000e-01 : f32
      %609 = vector.broadcast %cst_173 : f32 to vector<3x128xf32>
      %610 = arith.mulf %609, %608 : vector<3x128xf32>
      %611 = arith.subf %593, %610 : vector<3x128xf32>
      %612 = arith.addf %579, %611 : vector<3x128xf32>
      %cst_174 = arith.constant 1.000000e+30 : f32
      %613 = vector.broadcast %cst_174 : f32 to vector<3x128xf32>
      %614 = arith.minimumf %612, %613 : vector<3x128xf32>
      %615 = vector.broadcast %568 : i32 to vector<3x128xi32>
      %616 = arith.cmpi eq, %270, %615 : vector<3x128xi32>
      %617 = arith.andi %271, %616 : vector<3x128xi1>
      %cst_175 = arith.constant 0.000000e+00 : f32
      %618 = vector.broadcast %cst_175 : f32 to vector<3x128xf32>
      %619 = arith.select %617, %614, %618 : vector<3x128xi1>, vector<3x128xf32>
      %620 = arith.addf %567, %619 : vector<3x128xf32>
      %c5_i32_176 = arith.constant 5 : i32
      %621 = arith.addi %349, %c5_i32_176 : i32
      %622 = vector.extract_strided_slice %351 {offsets = [5, 0], sizes = [1, 128], strides = [1, 1]} : vector<8x128xf32> to vector<1x128xf32>
      %623 = vector.extract_strided_slice %353 {offsets = [5, 0], sizes = [1, 128], strides = [1, 1]} : vector<8x128xf32> to vector<1x128xf32>
      %624 = vector.extract_strided_slice %355 {offsets = [5, 0], sizes = [1, 128], strides = [1, 1]} : vector<8x128xf32> to vector<1x128xf32>
      %625 = vector.shape_cast %623 : vector<1x128xf32> to vector<1x128xf32>
      %626 = vector.broadcast %625 : vector<1x128xf32> to vector<3x128xf32>
      %627 = vector.shape_cast %624 : vector<1x128xf32> to vector<1x128xf32>
      %628 = vector.broadcast %627 : vector<1x128xf32> to vector<3x128xf32>
      %629 = arith.select %260, %626, %628 : vector<3x128xi1>, vector<3x128xf32>
      %630 = vector.shape_cast %622 : vector<1x128xf32> to vector<1x128xf32>
      %631 = vector.broadcast %630 : vector<1x128xf32> to vector<3x128xf32>
      %632 = arith.select %258, %631, %629 : vector<3x128xi1>, vector<3x128xf32>
      %633 = vector.extract_strided_slice %614 {offsets = [0, 127], sizes = [3, 1], strides = [1, 1]} : vector<3x128xf32> to vector<3x1xf32>
      %634 = vector.extract_strided_slice %614 {offsets = [0, 0], sizes = [3, 127], strides = [1, 1]} : vector<3x128xf32> to vector<3x127xf32>
      %635 = tpu.concatenate %633, %634 in 1 : vector<3x1xf32>, vector<3x127xf32> -> vector<3x128xf32>
      %cst_177 = arith.constant 1.000000e+30 : f32
      %636 = vector.broadcast %cst_177 : f32 to vector<3x128xf32>
      %637 = arith.select %256, %636, %635 : vector<3x128xi1>, vector<3x128xf32>
      %c0_i32_178 = arith.constant 0 : i32
      %638 = arith.cmpi eq, %621, %c0_i32_178 : i32
      %cst_179 = arith.constant 0.000000e+00 : f32
      %cst_180 = arith.constant 1.000000e+30 : f32
      %639 = arith.select %638, %cst_179, %cst_180 : f32
      %640 = vector.extract_strided_slice %561 {offsets = [0, 127], sizes = [3, 1], strides = [1, 1]} : vector<3x128xf32> to vector<3x1xf32>
      %641 = vector.extract_strided_slice %561 {offsets = [0, 0], sizes = [3, 127], strides = [1, 1]} : vector<3x128xf32> to vector<3x127xf32>
      %642 = tpu.concatenate %640, %641 in 1 : vector<3x1xf32>, vector<3x127xf32> -> vector<3x128xf32>
      %643 = vector.broadcast %639 : f32 to vector<3x128xf32>
      %644 = arith.select %256, %643, %642 : vector<3x128xi1>, vector<3x128xf32>
      %645 = arith.minimumf %637, %614 : vector<3x128xf32>
      %646 = arith.minimumf %645, %644 : vector<3x128xf32>
      %647 = arith.subf %646, %637 : vector<3x128xf32>
      %cst_181 = arith.constant 1.000000e+01 : f32
      %648 = vector.broadcast %cst_181 : f32 to vector<3x128xf32>
      %649 = arith.mulf %647, %648 : vector<3x128xf32>
      %650 = math.exp %649 : vector<3x128xf32>
      %651 = arith.subf %646, %614 : vector<3x128xf32>
      %cst_182 = arith.constant 1.000000e+01 : f32
      %652 = vector.broadcast %cst_182 : f32 to vector<3x128xf32>
      %653 = arith.mulf %651, %652 : vector<3x128xf32>
      %654 = math.exp %653 : vector<3x128xf32>
      %655 = arith.addf %650, %654 : vector<3x128xf32>
      %656 = arith.subf %646, %644 : vector<3x128xf32>
      %cst_183 = arith.constant 1.000000e+01 : f32
      %657 = vector.broadcast %cst_183 : f32 to vector<3x128xf32>
      %658 = arith.mulf %656, %657 : vector<3x128xf32>
      %659 = math.exp %658 : vector<3x128xf32>
      %660 = arith.addf %655, %659 : vector<3x128xf32>
      %661 = math.log %660 : vector<3x128xf32>
      %cst_184 = arith.constant 1.000000e-01 : f32
      %662 = vector.broadcast %cst_184 : f32 to vector<3x128xf32>
      %663 = arith.mulf %662, %661 : vector<3x128xf32>
      %664 = arith.subf %646, %663 : vector<3x128xf32>
      %665 = arith.addf %632, %664 : vector<3x128xf32>
      %cst_185 = arith.constant 1.000000e+30 : f32
      %666 = vector.broadcast %cst_185 : f32 to vector<3x128xf32>
      %667 = arith.minimumf %665, %666 : vector<3x128xf32>
      %668 = vector.broadcast %621 : i32 to vector<3x128xi32>
      %669 = arith.cmpi eq, %270, %668 : vector<3x128xi32>
      %670 = arith.andi %271, %669 : vector<3x128xi1>
      %cst_186 = arith.constant 0.000000e+00 : f32
      %671 = vector.broadcast %cst_186 : f32 to vector<3x128xf32>
      %672 = arith.select %670, %667, %671 : vector<3x128xi1>, vector<3x128xf32>
      %673 = arith.addf %620, %672 : vector<3x128xf32>
      %c6_i32_187 = arith.constant 6 : i32
      %674 = arith.addi %349, %c6_i32_187 : i32
      %675 = vector.extract_strided_slice %351 {offsets = [6, 0], sizes = [1, 128], strides = [1, 1]} : vector<8x128xf32> to vector<1x128xf32>
      %676 = vector.extract_strided_slice %353 {offsets = [6, 0], sizes = [1, 128], strides = [1, 1]} : vector<8x128xf32> to vector<1x128xf32>
      %677 = vector.extract_strided_slice %355 {offsets = [6, 0], sizes = [1, 128], strides = [1, 1]} : vector<8x128xf32> to vector<1x128xf32>
      %678 = vector.shape_cast %676 : vector<1x128xf32> to vector<1x128xf32>
      %679 = vector.broadcast %678 : vector<1x128xf32> to vector<3x128xf32>
      %680 = vector.shape_cast %677 : vector<1x128xf32> to vector<1x128xf32>
      %681 = vector.broadcast %680 : vector<1x128xf32> to vector<3x128xf32>
      %682 = arith.select %260, %679, %681 : vector<3x128xi1>, vector<3x128xf32>
      %683 = vector.shape_cast %675 : vector<1x128xf32> to vector<1x128xf32>
      %684 = vector.broadcast %683 : vector<1x128xf32> to vector<3x128xf32>
      %685 = arith.select %258, %684, %682 : vector<3x128xi1>, vector<3x128xf32>
      %686 = vector.extract_strided_slice %667 {offsets = [0, 127], sizes = [3, 1], strides = [1, 1]} : vector<3x128xf32> to vector<3x1xf32>
      %687 = vector.extract_strided_slice %667 {offsets = [0, 0], sizes = [3, 127], strides = [1, 1]} : vector<3x128xf32> to vector<3x127xf32>
      %688 = tpu.concatenate %686, %687 in 1 : vector<3x1xf32>, vector<3x127xf32> -> vector<3x128xf32>
      %cst_188 = arith.constant 1.000000e+30 : f32
      %689 = vector.broadcast %cst_188 : f32 to vector<3x128xf32>
      %690 = arith.select %256, %689, %688 : vector<3x128xi1>, vector<3x128xf32>
      %c0_i32_189 = arith.constant 0 : i32
      %691 = arith.cmpi eq, %674, %c0_i32_189 : i32
      %cst_190 = arith.constant 0.000000e+00 : f32
      %cst_191 = arith.constant 1.000000e+30 : f32
      %692 = arith.select %691, %cst_190, %cst_191 : f32
      %693 = vector.extract_strided_slice %614 {offsets = [0, 127], sizes = [3, 1], strides = [1, 1]} : vector<3x128xf32> to vector<3x1xf32>
      %694 = vector.extract_strided_slice %614 {offsets = [0, 0], sizes = [3, 127], strides = [1, 1]} : vector<3x128xf32> to vector<3x127xf32>
      %695 = tpu.concatenate %693, %694 in 1 : vector<3x1xf32>, vector<3x127xf32> -> vector<3x128xf32>
      %696 = vector.broadcast %692 : f32 to vector<3x128xf32>
      %697 = arith.select %256, %696, %695 : vector<3x128xi1>, vector<3x128xf32>
      %698 = arith.minimumf %690, %667 : vector<3x128xf32>
      %699 = arith.minimumf %698, %697 : vector<3x128xf32>
      %700 = arith.subf %699, %690 : vector<3x128xf32>
      %cst_192 = arith.constant 1.000000e+01 : f32
      %701 = vector.broadcast %cst_192 : f32 to vector<3x128xf32>
      %702 = arith.mulf %700, %701 : vector<3x128xf32>
      %703 = math.exp %702 : vector<3x128xf32>
      %704 = arith.subf %699, %667 : vector<3x128xf32>
      %cst_193 = arith.constant 1.000000e+01 : f32
      %705 = vector.broadcast %cst_193 : f32 to vector<3x128xf32>
      %706 = arith.mulf %704, %705 : vector<3x128xf32>
      %707 = math.exp %706 : vector<3x128xf32>
      %708 = arith.addf %703, %707 : vector<3x128xf32>
      %709 = arith.subf %699, %697 : vector<3x128xf32>
      %cst_194 = arith.constant 1.000000e+01 : f32
      %710 = vector.broadcast %cst_194 : f32 to vector<3x128xf32>
      %711 = arith.mulf %709, %710 : vector<3x128xf32>
      %712 = math.exp %711 : vector<3x128xf32>
      %713 = arith.addf %708, %712 : vector<3x128xf32>
      %714 = math.log %713 : vector<3x128xf32>
      %cst_195 = arith.constant 1.000000e-01 : f32
      %715 = vector.broadcast %cst_195 : f32 to vector<3x128xf32>
      %716 = arith.mulf %715, %714 : vector<3x128xf32>
      %717 = arith.subf %699, %716 : vector<3x128xf32>
      %718 = arith.addf %685, %717 : vector<3x128xf32>
      %cst_196 = arith.constant 1.000000e+30 : f32
      %719 = vector.broadcast %cst_196 : f32 to vector<3x128xf32>
      %720 = arith.minimumf %718, %719 : vector<3x128xf32>
      %721 = vector.broadcast %674 : i32 to vector<3x128xi32>
      %722 = arith.cmpi eq, %270, %721 : vector<3x128xi32>
      %723 = arith.andi %271, %722 : vector<3x128xi1>
      %cst_197 = arith.constant 0.000000e+00 : f32
      %724 = vector.broadcast %cst_197 : f32 to vector<3x128xf32>
      %725 = arith.select %723, %720, %724 : vector<3x128xi1>, vector<3x128xf32>
      %726 = arith.addf %673, %725 : vector<3x128xf32>
      %c7_i32_198 = arith.constant 7 : i32
      %727 = arith.addi %349, %c7_i32_198 : i32
      %728 = vector.extract_strided_slice %351 {offsets = [7, 0], sizes = [1, 128], strides = [1, 1]} : vector<8x128xf32> to vector<1x128xf32>
      %729 = vector.extract_strided_slice %353 {offsets = [7, 0], sizes = [1, 128], strides = [1, 1]} : vector<8x128xf32> to vector<1x128xf32>
      %730 = vector.extract_strided_slice %355 {offsets = [7, 0], sizes = [1, 128], strides = [1, 1]} : vector<8x128xf32> to vector<1x128xf32>
      %731 = vector.shape_cast %729 : vector<1x128xf32> to vector<1x128xf32>
      %732 = vector.broadcast %731 : vector<1x128xf32> to vector<3x128xf32>
      %733 = vector.shape_cast %730 : vector<1x128xf32> to vector<1x128xf32>
      %734 = vector.broadcast %733 : vector<1x128xf32> to vector<3x128xf32>
      %735 = arith.select %260, %732, %734 : vector<3x128xi1>, vector<3x128xf32>
      %736 = vector.shape_cast %728 : vector<1x128xf32> to vector<1x128xf32>
      %737 = vector.broadcast %736 : vector<1x128xf32> to vector<3x128xf32>
      %738 = arith.select %258, %737, %735 : vector<3x128xi1>, vector<3x128xf32>
      %739 = vector.extract_strided_slice %720 {offsets = [0, 127], sizes = [3, 1], strides = [1, 1]} : vector<3x128xf32> to vector<3x1xf32>
      %740 = vector.extract_strided_slice %720 {offsets = [0, 0], sizes = [3, 127], strides = [1, 1]} : vector<3x128xf32> to vector<3x127xf32>
      %741 = tpu.concatenate %739, %740 in 1 : vector<3x1xf32>, vector<3x127xf32> -> vector<3x128xf32>
      %cst_199 = arith.constant 1.000000e+30 : f32
      %742 = vector.broadcast %cst_199 : f32 to vector<3x128xf32>
      %743 = arith.select %256, %742, %741 : vector<3x128xi1>, vector<3x128xf32>
      %c0_i32_200 = arith.constant 0 : i32
      %744 = arith.cmpi eq, %727, %c0_i32_200 : i32
      %cst_201 = arith.constant 0.000000e+00 : f32
      %cst_202 = arith.constant 1.000000e+30 : f32
      %745 = arith.select %744, %cst_201, %cst_202 : f32
      %746 = vector.extract_strided_slice %667 {offsets = [0, 127], sizes = [3, 1], strides = [1, 1]} : vector<3x128xf32> to vector<3x1xf32>
      %747 = vector.extract_strided_slice %667 {offsets = [0, 0], sizes = [3, 127], strides = [1, 1]} : vector<3x128xf32> to vector<3x127xf32>
      %748 = tpu.concatenate %746, %747 in 1 : vector<3x1xf32>, vector<3x127xf32> -> vector<3x128xf32>
      %749 = vector.broadcast %745 : f32 to vector<3x128xf32>
      %750 = arith.select %256, %749, %748 : vector<3x128xi1>, vector<3x128xf32>
      %751 = arith.minimumf %743, %720 : vector<3x128xf32>
      %752 = arith.minimumf %751, %750 : vector<3x128xf32>
      %753 = arith.subf %752, %743 : vector<3x128xf32>
      %cst_203 = arith.constant 1.000000e+01 : f32
      %754 = vector.broadcast %cst_203 : f32 to vector<3x128xf32>
      %755 = arith.mulf %753, %754 : vector<3x128xf32>
      %756 = math.exp %755 : vector<3x128xf32>
      %757 = arith.subf %752, %720 : vector<3x128xf32>
      %cst_204 = arith.constant 1.000000e+01 : f32
      %758 = vector.broadcast %cst_204 : f32 to vector<3x128xf32>
      %759 = arith.mulf %757, %758 : vector<3x128xf32>
      %760 = math.exp %759 : vector<3x128xf32>
      %761 = arith.addf %756, %760 : vector<3x128xf32>
      %762 = arith.subf %752, %750 : vector<3x128xf32>
      %cst_205 = arith.constant 1.000000e+01 : f32
      %763 = vector.broadcast %cst_205 : f32 to vector<3x128xf32>
      %764 = arith.mulf %762, %763 : vector<3x128xf32>
      %765 = math.exp %764 : vector<3x128xf32>
      %766 = arith.addf %761, %765 : vector<3x128xf32>
      %767 = math.log %766 : vector<3x128xf32>
      %cst_206 = arith.constant 1.000000e-01 : f32
      %768 = vector.broadcast %cst_206 : f32 to vector<3x128xf32>
      %769 = arith.mulf %768, %767 : vector<3x128xf32>
      %770 = arith.subf %752, %769 : vector<3x128xf32>
      %771 = arith.addf %738, %770 : vector<3x128xf32>
      %cst_207 = arith.constant 1.000000e+30 : f32
      %772 = vector.broadcast %cst_207 : f32 to vector<3x128xf32>
      %773 = arith.minimumf %771, %772 : vector<3x128xf32>
      %774 = vector.broadcast %727 : i32 to vector<3x128xi32>
      %775 = arith.cmpi eq, %270, %774 : vector<3x128xi32>
      %776 = arith.andi %271, %775 : vector<3x128xi1>
      %cst_208 = arith.constant 0.000000e+00 : f32
      %777 = vector.broadcast %cst_208 : f32 to vector<3x128xf32>
      %778 = arith.select %776, %773, %777 : vector<3x128xi1>, vector<3x128xf32>
      %779 = arith.addf %726, %778 : vector<3x128xf32>
      scf.yield %773, %720, %779 : vector<3x128xf32>, vector<3x128xf32>, vector<3x128xf32>
    }
    %c3_i32_96 = arith.constant 3 : i32
    %cst_97 = arith.constant dense<0.000000e+00> : vector<3xf32>
    %276 = vector.multi_reduction <add>, %275#2, %cst_97 [1] : vector<3x128xf32> to vector<3xf32>
    %277 = vector.shape_cast %276 : vector<3xf32> to vector<3x1xf32>
    %278 = vector.extract_strided_slice %277 {offsets = [0, 0], sizes = [1, 1], strides = [1, 1]} : vector<3x1xf32> to vector<1x1xf32>
    %279 = vector.extract_strided_slice %277 {offsets = [1, 0], sizes = [1, 1], strides = [1, 1]} : vector<3x1xf32> to vector<1x1xf32>
    %280 = vector.extract_strided_slice %277 {offsets = [2, 0], sizes = [1, 1], strides = [1, 1]} : vector<3x1xf32> to vector<1x1xf32>
    %281 = arith.addf %279, %280 : vector<1x1xf32>
    %cst_98 = arith.constant 5.000000e-01 : f32
    %282 = vector.broadcast %cst_98 : f32 to vector<1x1xf32>
    %283 = arith.mulf %282, %281 : vector<1x1xf32>
    %284 = arith.subf %278, %283 : vector<1x1xf32>
    %285 = arith.addf %74, %155 : vector<1x1xf32>
    %cst_99 = arith.constant 1.000000e+00 : f32
    %286 = vector.broadcast %cst_99 : f32 to vector<1x1xf32>
    %287 = arith.mulf %286, %285 : vector<1x1xf32>
    %288 = arith.addf %284, %287 : vector<1x1xf32>
    %289 = tpu.iota {dimensions = array<i32: 1>} : vector<1x8xi32>
    %cst_100 = arith.constant 0.000000e+00 : f32
    %290 = vector.broadcast %cst_100 : f32 to vector<1x8xf32>
    %c0_i32_101 = arith.constant 0 : i32
    %291 = vector.broadcast %c0_i32_101 : i32 to vector<1x8xi32>
    %292 = arith.cmpi eq, %289, %291 : vector<1x8xi32>
    %cst_102 = arith.constant 0.000000e+00 : f32
    %293 = vector.shape_cast %288 : vector<1x1xf32> to vector<1x1xf32>
    %294 = vector.broadcast %293 : vector<1x1xf32> to vector<1x8xf32>
    %295 = vector.broadcast %cst_102 : f32 to vector<1x8xf32>
    %296 = arith.select %292, %294, %295 : vector<1x8xi1>, vector<1x8xf32>
    %297 = arith.addf %290, %296 : vector<1x8xf32>
    %c1_i32_103 = arith.constant 1 : i32
    %298 = vector.broadcast %c1_i32_103 : i32 to vector<1x8xi32>
    %299 = arith.cmpi eq, %289, %298 : vector<1x8xi32>
    %cst_104 = arith.constant 0.000000e+00 : f32
    %300 = vector.shape_cast %284 : vector<1x1xf32> to vector<1x1xf32>
    %301 = vector.broadcast %300 : vector<1x1xf32> to vector<1x8xf32>
    %302 = vector.broadcast %cst_104 : f32 to vector<1x8xf32>
    %303 = arith.select %299, %301, %302 : vector<1x8xi1>, vector<1x8xf32>
    %304 = arith.addf %297, %303 : vector<1x8xf32>
    %c2_i32_105 = arith.constant 2 : i32
    %305 = vector.broadcast %c2_i32_105 : i32 to vector<1x8xi32>
    %306 = arith.cmpi eq, %289, %305 : vector<1x8xi32>
    %cst_106 = arith.constant 0.000000e+00 : f32
    %307 = vector.shape_cast %285 : vector<1x1xf32> to vector<1x1xf32>
    %308 = vector.broadcast %307 : vector<1x1xf32> to vector<1x8xf32>
    %309 = vector.broadcast %cst_106 : f32 to vector<1x8xf32>
    %310 = arith.select %306, %308, %309 : vector<1x8xi1>, vector<1x8xf32>
    %311 = arith.addf %304, %310 : vector<1x8xf32>
    %c3_i32_107 = arith.constant 3 : i32
    %312 = vector.broadcast %c3_i32_107 : i32 to vector<1x8xi32>
    %313 = arith.cmpi eq, %289, %312 : vector<1x8xi32>
    %cst_108 = arith.constant 0.000000e+00 : f32
    %314 = vector.shape_cast %278 : vector<1x1xf32> to vector<1x1xf32>
    %315 = vector.broadcast %314 : vector<1x1xf32> to vector<1x8xf32>
    %316 = vector.broadcast %cst_108 : f32 to vector<1x8xf32>
    %317 = arith.select %313, %315, %316 : vector<1x8xi1>, vector<1x8xf32>
    %318 = arith.addf %311, %317 : vector<1x8xf32>
    %c4_i32_109 = arith.constant 4 : i32
    %319 = vector.broadcast %c4_i32_109 : i32 to vector<1x8xi32>
    %320 = arith.cmpi eq, %289, %319 : vector<1x8xi32>
    %cst_110 = arith.constant 0.000000e+00 : f32
    %321 = vector.shape_cast %279 : vector<1x1xf32> to vector<1x1xf32>
    %322 = vector.broadcast %321 : vector<1x1xf32> to vector<1x8xf32>
    %323 = vector.broadcast %cst_110 : f32 to vector<1x8xf32>
    %324 = arith.select %320, %322, %323 : vector<1x8xi1>, vector<1x8xf32>
    %325 = arith.addf %318, %324 : vector<1x8xf32>
    %c5_i32 = arith.constant 5 : i32
    %326 = vector.broadcast %c5_i32 : i32 to vector<1x8xi32>
    %327 = arith.cmpi eq, %289, %326 : vector<1x8xi32>
    %cst_111 = arith.constant 0.000000e+00 : f32
    %328 = vector.shape_cast %280 : vector<1x1xf32> to vector<1x1xf32>
    %329 = vector.broadcast %328 : vector<1x1xf32> to vector<1x8xf32>
    %330 = vector.broadcast %cst_111 : f32 to vector<1x8xf32>
    %331 = arith.select %327, %329, %330 : vector<1x8xi1>, vector<1x8xf32>
    %332 = arith.addf %325, %331 : vector<1x8xf32>
    %c6_i32 = arith.constant 6 : i32
    %333 = vector.broadcast %c6_i32 : i32 to vector<1x8xi32>
    %334 = arith.cmpi eq, %289, %333 : vector<1x8xi32>
    %cst_112 = arith.constant 0.000000e+00 : f32
    %335 = vector.shape_cast %74 : vector<1x1xf32> to vector<1x1xf32>
    %336 = vector.broadcast %335 : vector<1x1xf32> to vector<1x8xf32>
    %337 = vector.broadcast %cst_112 : f32 to vector<1x8xf32>
    %338 = arith.select %334, %336, %337 : vector<1x8xi1>, vector<1x8xf32>
    %339 = arith.addf %332, %338 : vector<1x8xf32>
    %c7_i32_113 = arith.constant 7 : i32
    %340 = vector.broadcast %c7_i32_113 : i32 to vector<1x8xi32>
    %341 = arith.cmpi eq, %289, %340 : vector<1x8xi32>
    %cst_114 = arith.constant 0.000000e+00 : f32
    %342 = vector.shape_cast %155 : vector<1x1xf32> to vector<1x1xf32>
    %343 = vector.broadcast %342 : vector<1x1xf32> to vector<1x8xf32>
    %344 = vector.broadcast %cst_114 : f32 to vector<1x8xf32>
    %345 = arith.select %341, %343, %344 : vector<1x8xi1>, vector<1x8xf32>
    %346 = arith.addf %339, %345 : vector<1x8xf32>
    %c0_115 = arith.constant 0 : index
    %c0_116 = arith.constant 0 : index
    %347 = vector.load %arg4[%c0_115, %c0_116] : memref<1x8xf32, #tpu.memory_space<vmem>>, vector<1x8xf32>
    tpu.vector_store %arg4[%c0_115, %c0_116], %346 {strides = array<i32>} : memref<1x8xf32, #tpu.memory_space<vmem>>, vector<1x8xf32>,
    return
  }
}

</mosaic_0001>

<bundles_post_ra>
// kernel: tpu_custom_call.1
= control target key start
LH: loop header
LB: loop body
LE: loop exit
PB: predicated region body
PF: predicated region fallthrough
CT: control target
= control target key end

     0   :  { %6 = vsyncpa [#allocation3], 0  ;;  %s143_s0 = inlined_call_operand.hbm [shape: f32[3,256], index: 0, kind: input, shape index: {}]   ;;  %s144_s1 = inlined_call_operand.hbm [shape: f32[3,256], index: 1, kind: output, shape index: {}]  }
   0x1   :  { %7 = vsyncpa [#allocation4], 0  ;;  %s106_s6 = smov [#allocation2]   ;;  %s58_s10 = scalar_lea.hbm %s143_s0, 128 }
   0x2   :  { %s14_s7 = sshll.u32 %s106_s6, 4  ;;  %p59_p0 = scmp.ne.s32.totalorder %s143_s0, %s58_s10  ;;  %s15_s7 = int_to_ptr.vmem [resolvable:$true] %s14_s7 }
   0x3   :  { %p62_p1 = scmp.lt.u32.totalorder %s58_s10, %s143_s0 }
   0x5   :  { %p64_p2 = pnand %p62_p1, %p59_p0 }
   0x7   :  { %67 = shalt.err (!%p64_p2)
}
   0x8   :  { %s68_s15 = scalar_lea.vmem %s15_s7, 128  ;;  %p73_p4 = scmp.lt.s32.totalorder %s15_s7, %s15_s7 }
   0x9   :  { %p69_p3 = scmp.ne.s32.totalorder %s15_s7, %s68_s15  ;;  %p74_p5 = scmp.lt.s32.totalorder %s68_s15, %s68_s15 }
   0xb   :  { %p75_p6 = por %p74_p5, %p73_p4 }
   0xd   :  { %p76_p7 = pnand %p75_p6, %p69_p3 }
   0xf   :  { %79 = shalt.err (!%p76_p7)
}
  0x10   :  { %17 = dma.hbm_to_vmem [thread:$0]  %s143_s0, 128, %s15_s7, [#allocation3]  }
  0x11   :  { %102 = dma.done.wait [#allocation3], 128  }
  0x12   :  { %103 = vsyncadd [#allocation3], 4294967168  ;;  %v21_v0 = vld [vmem:[#allocation2] sm:$0x77]  ;;  %s107_s18 = smov 1   ;;  %v29_v2 = vlaneseq  ;;  %s108_s19 = smov [#allocation5]  }
  0x13   :  { %25 = vrot.lane.b32.xlu0 %v21_v0, %s107_s18  ;;  %v23_v1 = vcombine.high %v21_v0, %v21_v0  ;;  %s45_s20 = sshll.u32 %s108_s19, 4  ;;  %s46_s20 = int_to_ptr.vmem [resolvable:$true] %s45_s20 }
  0x14   :  { %v30_v3 = vand.u32 127, %v29_v2  ;;  %s80_s0 = scalar_lea.vmem %s46_s20, 128  ;;  %p85_p9 = scmp.lt.s32.totalorder %s46_s20, %s46_s20 }
  0x15   :  { %p81_p8 = scmp.ne.s32.totalorder %s46_s20, %s80_s0  ;;  %p86_p10 = scmp.lt.s32.totalorder %s80_s0, %s80_s0 }
  0x16   :  { %vm31_vm0 = vcmp.lt.s32.totalorder %v30_v3, 1 }
  0x17   :  { %27 = vrot.lane.b32.xlu0 %v23_v1, %s107_s18  ;;  %p87_p11 = por %p86_p10, %p85_p9 }
  0x19   :  { %p88_p12 = pnand %p87_p11, %p81_p8 }
  0x85   :  { %v26_v4 = vpop.permute.xlu0 %25 }
  0x89   :  { %v28_v5 = vpop.permute.xlu0 %27 }
  0x8a   :  { %v32_v6 = vsel %vm31_vm0, %v26_v4, %v28_v5  ;;  %v33_v7 = vsel %vm31_vm0, %v28_v5, %v26_v4 }
  0x8b   :  { %v36_v8 = vcombine.low %v33_v7, %v32_v6 }
  0x8d   :  { %38 = vst [vmem:[#allocation5] sm:$0x77] %v36_v8 }
  0x8e   :  { %91 = shalt.err (!%p88_p12)
}
  0x8f   :  { %s92_s23 = scalar_lea.hbm %s144_s1, 128 }
  0x90   :  { %p93_p13 = scmp.ne.s32.totalorder %s144_s1, %s92_s23  ;;  %p96_p0 = scmp.lt.u32.totalorder %s92_s23, %s144_s1 }
  0x92   :  { %p98_p1 = pnand %p96_p0, %p93_p13 }
  0x94   :  { %101 = shalt.err (!%p98_p1)
}
  0x95   :  { %48 = dma.vmem_to_hbm [thread:$0]  %s46_s20, 128, %s144_s1, [#allocation4]  }
  0x96   :  { %104 = dma.done.wait [#allocation4], 128  }
  0x97   :  { %105 = vsyncadd [#allocation4], 4294967168 }
  0x98   :  { %52 = vsyncpa [#allocation3], 1 }
  0x99   :  { %53 = vsyncpa [#allocation4], 1 }

// kernel: tpu_custom_call.1
= control target key start
LH: loop header
LB: loop body
LE: loop exit
PB: predicated region body
PF: predicated region fallthrough
CT: control target
= control target key end

     0   :  { %9 = vsyncpa [#allocation6], 0  ;;  %vm45_vm0 = vcmask 261120   ;;  %vm255_vm1 = vcmask 130048   ;;  %vm3149_vm2 = vmmov 0   ;;  %vm1032_vm10 = vcmask 1040384   ;;  %s4347_s0 = inlined_call_operand.vmem [shape: f32[128,32], index: 0, kind: input, shape index: {}]   ;;  %s4348_s1 = inlined_call_operand.vmem [shape: f32[128,32], index: 1, kind: input, shape index: {}]   ;;  %s4349_s2 = inlined_call_operand.vmem [shape: f32[32,16], index: 2, kind: input, shape index: {}]   ;;  %s4350_s3 = inlined_call_operand.vmem [shape: f32[1,16], index: 3, kind: input, shape index: {}]   ;;  %s4351_s4 = inlined_call_operand.hbm [shape: f32[1,8], index: 4, kind: output, shape index: {}]  }
   0x1   :  { %v18_v0 = vld [vmem:[%s4349_s2] sm:$0xff]  ;;  %v19_v1 = vld [vmem:[%s4349_s2 + $0x8] sm:$0xff]  ;;  %v20_v3 = vld [vmem:[%s4349_s2 + $0x10] sm:$0xff]  ;;  %vm1062_vm11 = vcmask 1041408   ;;  %vm959_vm14 = vcmask 64512   ;;  %vm1081_vm15 = vcmask 1043456  }
   0x2   :  { %v2704_v2 = vpack.c.bf16 %v19_v1, %v18_v0  ;;  %v21_v4 = vld [vmem:[%s4349_s2 + $0x18] sm:$0xff]  ;;  %v23_v5 = vld [vmem:[%s4347_s0] sm:$0xff]  ;;  %v24_v7 = vld [vmem:[%s4347_s0 + $0x8] sm:$0xff] }
   0x3   :  { %v2708_v6 = vpack.c.bf16 %v21_v4, %v20_v3  ;;  %2461 = vmatprep.mubr.msk.f32.mxu1 %vm45_vm0, %v23_v5  ;;  %v25_v8 = vld [vmem:[%s4347_s0 + $0x10] sm:$0xff]  ;;  %v26_v9 = vld [vmem:[%s4347_s0 + $0x18] sm:$0xff]  ;;  %v27_v10 = vld [vmem:[%s4347_s0 + $0x20] sm:$0xff] }
   0x4   :  { %2705 = vmatprep.subr.bf16.mxu1 %v2704_v2  ;;  %v28_v11 = vld [vmem:[%s4347_s0 + $0x28] sm:$0xff]  ;;  %v29_v12 = vld [vmem:[%s4347_s0 + $0x30] sm:$0xff]  ;;  %v30_v13 = vld [vmem:[%s4347_s0 + $0x38] sm:$0xff] }
   0x5   :  { %2707 = vmatpush3.bf16.msra.mxu1 %v2704_v2  ;;  %v31_v14 = vld [vmem:[%s4347_s0 + $0x40] sm:$0xff]  ;;  %v32_v15 = vld [vmem:[%s4347_s0 + $0x48] sm:$0xff]  ;;  %v33_v16 = vld [vmem:[%s4347_s0 + $0x50] sm:$0xff] }
   0x6   :  { %2709 = vmatprep.subr.bf16.mxu1 %v2708_v6  ;;  %v34_v17 = vld [vmem:[%s4347_s0 + $0x58] sm:$0xff]  ;;  %v35_v18 = vld [vmem:[%s4347_s0 + $0x60] sm:$0xff]  ;;  %v36_v19 = vld [vmem:[%s4347_s0 + $0x68] sm:$0xff] }
   0x7   :  { %v37_v20 = vld [vmem:[%s4347_s0 + $0x70] sm:$0xff]  ;;  %v38_v21 = vld [vmem:[%s4347_s0 + $0x78] sm:$0xff]  ;;  %v352_v22 = vld [vmem:[%s4348_s1] sm:$0xff] }
   0x8   :  { %v353_v23 = vld [vmem:[%s4348_s1 + $0x8] sm:$0xff]  ;;  %v354_v24 = vld [vmem:[%s4348_s1 + $0x10] sm:$0xff]  ;;  %v355_v25 = vld [vmem:[%s4348_s1 + $0x18] sm:$0xff] }
   0x9   :  { %2711 = vmatpush3.bf16.msra.mxu1 %v2708_v6  ;;  %v356_v26 = vld [vmem:[%s4348_s1 + $0x20] sm:$0xff]  ;;  %v357_v27 = vld [vmem:[%s4348_s1 + $0x28] sm:$0xff]  ;;  %v358_v28 = vld [vmem:[%s4348_s1 + $0x30] sm:$0xff] }
   0xa   :  { %2713 = vmatprep.subr.bf16.mxu1 %v2704_v2  ;;  %v359_v29 = vld [vmem:[%s4348_s1 + $0x38] sm:$0xff]  ;;  %v360_v30 = vld [vmem:[%s4348_s1 + $0x40] sm:$0xff]  ;;  %v361_v31 = vld [vmem:[%s4348_s1 + $0x48] sm:$0xff] }
   0xb   :  { %v362_v32 = vld [vmem:[%s4348_s1 + $0x50] sm:$0xff]  ;;  %v363_v33 = vld [vmem:[%s4348_s1 + $0x58] sm:$0xff]  ;;  %v364_v34 = vld [vmem:[%s4348_s1 + $0x60] sm:$0xff] }
   0xc   :  { %2462 = vmatmul.mubr.msk.f32.vlgmr.msra.gmra.mrb[0].mxu1 %vm45_vm0, %v24_v7  ;;  %v365_v35 = vld [vmem:[%s4348_s1 + $0x68] sm:$0xff]  ;;  %v366_v36 = vld [vmem:[%s4348_s1 + $0x70] sm:$0xff]  ;;  %v367_v37 = vld [vmem:[%s4348_s1 + $0x78] sm:$0xff]  ;;  %s4116_s1 = smov 0  }
   0xd   :  { %2464 = vmatprep.mubr.msk.f32.mxu1 %vm45_vm0, %v25_v8  ;;  %2715 = vmatpush3.bf16.msra.mxu1 %v2704_v2  ;;  %v3326_v38 = vld [vmem:[%s4350_s3] ss:$0 sm:$0xff]  ;;  %vm3517_vm3 = vmpackc.low %vm255_vm1, %vm255_vm1 }
   0xe   :  { %2717 = vmatprep.subr.bf16.mxu1 %v2708_v6 }
  0x10   :  { %2465 = vmatmul.mubr.msk.f32.gmra.mrb[2].mxu1 %vm45_vm0, %v26_v9 }
  0x11   :  { %2467 = vmatprep.mubr.msk.f32.mxu1 %vm45_vm0, %v27_v10  ;;  %2719 = vmatpush3.bf16.msra.mxu1 %v2708_v6 }
  0x14   :  { %2468 = vmatmul.mubr.msk.f32.gmra.mrb[4].mxu1 %vm45_vm0, %v28_v11 }
  0x15   :  { %2470 = vmatprep.mubr.msk.f32.mxu1 %vm45_vm0, %v29_v12 }
  0x18   :  { %2471 = vmatmul.mubr.msk.f32.gmra.mrb[6].mxu1 %vm45_vm0, %v30_v13 }
  0x19   :  { %2473 = vmatprep.mubr.msk.f32.mxu1 %vm45_vm0, %v31_v14 }
  0x1c   :  { %2474 = vmatmul.mubr.msk.f32.gmra.mrb[8].mxu1 %vm45_vm0, %v32_v15 }
  0x1d   :  { %2476 = vmatprep.mubr.msk.f32.mxu1 %vm45_vm0, %v33_v16 }
  0x20   :  { %2477 = vmatmul.mubr.msk.f32.gmra.mrb[10].mxu1 %vm45_vm0, %v34_v17 }
  0x21   :  { %2479 = vmatprep.mubr.msk.f32.mxu1 %vm45_vm0, %v35_v18 }
  0x24   :  { %2480 = vmatmul.mubr.msk.f32.gmra.mrb[12].mxu1 %vm45_vm0, %v36_v19 }
  0x25   :  { %2482 = vmatprep.mubr.msk.f32.mxu1 %vm45_vm0, %v37_v20 }
  0x28   :  { %2483 = vmatmul.mubr.msk.f32.gmra.mrb[14].mxu1 %vm45_vm0, %v38_v21 }
  0x29   :  { %2493 = vmatprep.mubr.msk.f32.mxu1 %vm45_vm0, %v352_v22 }
  0x2c   :  { %2494 = vmatmul.mubr.msk.f32.vlgmr.msra.gmra.mrb[16].mxu1 %vm45_vm0, %v353_v23 }
  0x2d   :  { %2496 = vmatprep.mubr.msk.f32.mxu1 %vm45_vm0, %v354_v24 }
  0x30   :  { %2497 = vmatmul.mubr.msk.f32.gmra.mrb[18].mxu1 %vm45_vm0, %v355_v25 }
  0x31   :  { %2499 = vmatprep.mubr.msk.f32.mxu1 %vm45_vm0, %v356_v26 }
  0x34   :  { %2500 = vmatmul.mubr.msk.f32.gmra.mrb[20].mxu1 %vm45_vm0, %v357_v27 }
  0x35   :  { %2502 = vmatprep.mubr.msk.f32.mxu1 %vm45_vm0, %v358_v28 }
  0x38   :  { %2503 = vmatmul.mubr.msk.f32.gmra.mrb[22].mxu1 %vm45_vm0, %v359_v29 }
  0x39   :  { %2505 = vmatprep.mubr.msk.f32.mxu1 %vm45_vm0, %v360_v30 }
  0x3c   :  { %2506 = vmatmul.mubr.msk.f32.gmra.mrb[24].mxu1 %vm45_vm0, %v361_v31 }
  0x3d   :  { %2508 = vmatprep.mubr.msk.f32.mxu1 %vm45_vm0, %v362_v32 }
  0x40   :  { %2509 = vmatmul.mubr.msk.f32.gmra.mrb[26].mxu1 %vm45_vm0, %v363_v33 }
  0x41   :  { %2511 = vmatprep.mubr.msk.f32.mxu1 %vm45_vm0, %v364_v34 }
  0x44   :  { %2512 = vmatmul.mubr.msk.f32.gmra.mrb[28].mxu1 %vm45_vm0, %v365_v35 }
  0x45   :  { %2514 = vmatprep.mubr.msk.f32.mxu1 %vm45_vm0, %v366_v36 }
  0x48   :  { %2515 = vmatmul.mubr.msk.f32.gmra.mrb[30].mxu1 %vm45_vm0, %v367_v37 }
  0xdf   :  { %v2463_v39 = vpop.f32.mrb[0].mxu1 }
  0xe0   :  { %v160_v40 = vpop.f32.mrb[1].mxu1  ;;  %v3329_v41 = vadd.f32 %v2463_v39, %v3326_v38 }
  0xe1   :  { %v3332_v42 = vadd.f32 %v3326_v38, %v160_v40 }
  0xe2   :  { %v240_v49 = vmul.f32 %v3329_v41, %v3329_v41 }
  0xe3   :  { %v2466_v43 = vpop.f32.mrb[2].mxu1  ;;  %v239_v44 = vmul.f32 %v3332_v42, %v3332_v42 }
  0xe4   :  { %v3337_v45 = vadd.f32 %v2466_v43, %v3326_v38  ;;  %v170_v46 = vpop.f32.mrb[3].mxu1  ;;  %v259_v57 = vsel %vm255_vm1, %v240_v49, 0.0 }
  0xe5   :  { %v3340_v47 = vadd.f32 %v3326_v38, %v170_v46  ;;  %v256_v48 = vsel %vm255_vm1, %v239_v44, 0.0 }
  0xe6   :  { %257 = vadd.xlane.f32.xlu0 %v256_v48  ;;  %v242_v52 = vmul.f32 %v3337_v45, %v3337_v45 }
  0xe7   :  { %v2469_v50 = vpop.f32.mrb[4].mxu1  ;;  %v241_v51 = vmul.f32 %v3340_v47, %v3340_v47 }
  0xe8   :  { %v3350_v53 = vadd.f32 %v2469_v50, %v3326_v38  ;;  %v180_v54 = vpop.f32.mrb[5].mxu1  ;;  %v265_v59 = vsel %vm255_vm1, %v242_v52, 0.0 }
  0xe9   :  { %v3353_v55 = vadd.f32 %v3326_v38, %v180_v54  ;;  %v262_v56 = vsel %vm255_vm1, %v241_v51, 0.0 }
  0xea   :  { %263 = vadd.xlane.f32.xlu1 %v262_v56  ;;  %260 = vadd.xlane.f32.xlu0 %v259_v57  ;;  %v244_v61 = vmul.f32 %v3350_v53, %v3350_v53 }
  0xeb   :  { %v2472_v58 = vpop.f32.mrb[6].mxu1  ;;  %v243_v60 = vmul.f32 %v3353_v55, %v3353_v55 }
  0xec   :  { %v3363_v62 = vadd.f32 %v2472_v58, %v3326_v38  ;;  %v190_v63 = vpop.f32.mrb[7].mxu1  ;;  %v271_v3 = vsel %vm255_vm1, %v244_v61, 0.0  ;;  %v3148_v58 = vmov 0.0|0.0  }
  0xed   :  { %v3366_v0 = vadd.f32 %v3326_v38, %v190_v63  ;;  %v268_v1 = vsel %vm255_vm1, %v243_v60, 0.0  ;;  %2752 = vmatprep.subr.bf16.mxu1 %v3148_v58  ;;  %2720 = vmatprep.subr.bf16.mxu0 %v3148_v58 }
  0xee   :  { %266 = vadd.xlane.f32.xlu1 %v265_v59  ;;  %269 = vadd.xlane.f32.xlu0 %v268_v1  ;;  %v246_v5 = vmul.f32 %v3363_v62, %v3363_v62 }
  0xef   :  { %v2475_v2 = vpop.f32.mrb[8].mxu1  ;;  %v245_v4 = vmul.f32 %v3366_v0, %v3366_v0 }
  0xf0   :  { %v3375_v6 = vadd.f32 %v2475_v2, %v3326_v38  ;;  %v200_v7 = vpop.f32.mrb[9].mxu1  ;;  %v277_v11 = vsel %vm255_vm1, %v246_v5, 0.0 }
  0xf1   :  { %v3378_v8 = vadd.f32 %v3326_v38, %v200_v7  ;;  %v274_v9 = vsel %vm255_vm1, %v245_v4, 0.0 }
  0xf2   :  { %272 = vadd.xlane.f32.xlu1 %v271_v3  ;;  %275 = vadd.xlane.f32.xlu0 %v274_v9  ;;  %v248_v13 = vmul.f32 %v3375_v6, %v3375_v6 }
  0xf3   :  { %v2478_v10 = vpop.f32.mrb[10].mxu1  ;;  %v247_v12 = vmul.f32 %v3378_v8, %v3378_v8 }
  0xf4   :  { %v3387_v14 = vadd.f32 %v2478_v10, %v3326_v38  ;;  %v210_v15 = vpop.f32.mrb[11].mxu1  ;;  %v283_v19 = vsel %vm255_vm1, %v248_v13, 0.0 }
  0xf5   :  { %v3390_v16 = vadd.f32 %v3326_v38, %v210_v15  ;;  %v280_v17 = vsel %vm255_vm1, %v247_v12, 0.0 }
  0xf6   :  { %278 = vadd.xlane.f32.xlu1 %v277_v11  ;;  %281 = vadd.xlane.f32.xlu0 %v280_v17  ;;  %v250_v21 = vmul.f32 %v3387_v14, %v3387_v14 }
  0xf7   :  { %v2481_v18 = vpop.f32.mrb[12].mxu1  ;;  %v249_v20 = vmul.f32 %v3390_v16, %v3390_v16 }
  0xf8   :  { %v3399_v22 = vadd.f32 %v2481_v18, %v3326_v38  ;;  %v220_v23 = vpop.f32.mrb[13].mxu1  ;;  %v289_v27 = vsel %vm255_vm1, %v250_v21, 0.0 }
  0xf9   :  { %v3402_v24 = vadd.f32 %v3326_v38, %v220_v23  ;;  %v286_v25 = vsel %vm255_vm1, %v249_v20, 0.0 }
  0xfa   :  { %284 = vadd.xlane.f32.xlu1 %v283_v19  ;;  %287 = vadd.xlane.f32.xlu0 %v286_v25  ;;  %v252_v29 = vmul.f32 %v3399_v22, %v3399_v22 }
  0xfb   :  { %v2484_v26 = vpop.f32.mrb[14].mxu1  ;;  %v251_v28 = vmul.f32 %v3402_v24, %v3402_v24 }
  0xfc   :  { %v3411_v30 = vadd.f32 %v2484_v26, %v3326_v38  ;;  %v230_v31 = vpop.f32.mrb[15].mxu1  ;;  %v295_v34 = vsel %vm255_vm1, %v252_v29, 0.0 }
  0xfd   :  { %v3414_v32 = vadd.f32 %v3326_v38, %v230_v31  ;;  %v292_v33 = vsel %vm255_vm1, %v251_v28, 0.0 }
  0xfe   :  { %290 = vadd.xlane.f32.xlu1 %v289_v27  ;;  %293 = vadd.xlane.f32.xlu0 %v292_v33  ;;  %v254_v36 = vmul.f32 %v3411_v30, %v3411_v30  ;;  %v3150_v33 = vmov 0.0  }
  0xff   :  { %v253_v35 = vmul.f32 %v3414_v32, %v3414_v32  ;;  %v3422_v37 = vpop.f32.mrb[16].mxu1  ;;  %2584 = vmatprep.mubr.msk.f32.mxu1 %vm3149_vm2, %v3150_v33  ;;  %2549 = vmatprep.mubr.msk.f32.mxu0 %vm3149_vm2, %v3150_v33 }
 0x100   :  { %v482_v39 = vpop.f32.mrb[17].mxu1  ;;  %v301_v44 = vsel %vm255_vm1, %v254_v36, 0.0 }
 0x101   :  { %v298_v40 = vsel %vm255_vm1, %v253_v35, 0.0  ;;  %v3426_v43 = vadd.f32 %v3326_v38, %v482_v39 }
 0x102   :  { %296 = vadd.xlane.f32.xlu1 %v295_v34  ;;  %299 = vadd.xlane.f32.xlu0 %v298_v40 }
 0x103   :  { %v561_v46 = vmul.f32 %v3426_v43, %v3426_v43  ;;  %v3431_v48 = vpop.f32.mrb[18].mxu1 }
 0x104   :  { %v492_v49 = vpop.f32.mrb[19].mxu1 }
 0x105   :  { %v3434_v50 = vadd.f32 %v3326_v38, %v492_v49  ;;  %v577_v51 = vsel %vm255_vm1, %v561_v46, 0.0 }
 0x106   :  { %302 = vadd.xlane.f32.xlu1 %v301_v44 }
 0x107   :  { %v563_v52 = vmul.f32 %v3434_v50, %v3434_v50  ;;  %v3439_v54 = vpop.f32.mrb[20].mxu1 }
 0x108   :  { %v502_v56 = vpop.f32.mrb[21].mxu1 }
 0x109   :  { %v3442_v57 = vadd.f32 %v3326_v38, %v502_v56  ;;  %v583_v59 = vsel %vm255_vm1, %v563_v52, 0.0 }
 0x10a   :  { %578 = vadd.xlane.f32.xlu1 %v577_v51  ;;  %v3496_v51 = vadd.f32 %v3422_v37, %v3326_v38 }
 0x10b   :  { %v565_v60 = vmul.f32 %v3442_v57, %v3442_v57  ;;  %v3449_v61 = vpop.f32.mrb[22].mxu1 }
 0x10c   :  { %v512_v63 = vpop.f32.mrb[23].mxu1  ;;  %v562_v37 = vmul.f32 %v3496_v51, %v3496_v51 }
 0x10d   :  { %v3452_v1 = vadd.f32 %v3326_v38, %v512_v63  ;;  %v589_v2 = vsel %vm255_vm1, %v565_v60, 0.0 }
 0x10e   :  { %584 = vadd.xlane.f32.xlu1 %v583_v59 }
 0x10f   :  { %v567_v3 = vmul.f32 %v3452_v1, %v3452_v1  ;;  %v3457_v4 = vpop.f32.mrb[24].mxu1 }
 0x110   :  { %v522_v5 = vpop.f32.mrb[25].mxu1 }
 0x111   :  { %v3460_v7 = vadd.f32 %v3326_v38, %v522_v5  ;;  %v595_v9 = vsel %vm255_vm1, %v567_v3, 0.0 }
 0x112   :  { %590 = vadd.xlane.f32.xlu1 %v589_v2  ;;  %v3503_v2 = vadd.f32 %v3431_v48, %v3326_v38 }
 0x113   :  { %v569_v10 = vmul.f32 %v3460_v7, %v3460_v7  ;;  %v3465_v11 = vpop.f32.mrb[26].mxu1 }
 0x114   :  { %v532_v13 = vpop.f32.mrb[27].mxu1 }
 0x115   :  { %v601_v12 = vsel %vm255_vm1, %v569_v10, 0.0  ;;  %v3469_v15 = vadd.f32 %v3326_v38, %v532_v13 }
 0x116   :  { %596 = vadd.xlane.f32.xlu1 %v595_v9 }
 0x117   :  { %v571_v17 = vmul.f32 %v3469_v15, %v3469_v15  ;;  %v3474_v19 = vpop.f32.mrb[28].mxu1 }
 0x118   :  { %v542_v20 = vpop.f32.mrb[29].mxu1 }
 0x119   :  { %v607_v18 = vsel %vm255_vm1, %v571_v17, 0.0  ;;  %v3477_v21 = vadd.f32 %v3326_v38, %v542_v20  ;;  %v564_v20 = vmul.f32 %v3503_v2, %v3503_v2 }
 0x11a   :  { %602 = vadd.xlane.f32.xlu1 %v601_v12 }
 0x11b   :  { %v573_v23 = vmul.f32 %v3477_v21, %v3477_v21  ;;  %v3482_v26 = vpop.f32.mrb[30].mxu1 }
 0x11c   :  { %v552_v27 = vpop.f32.mrb[31].mxu1 }
 0x11d   :  { %v613_v25 = vsel %vm255_vm1, %v573_v23, 0.0  ;;  %v3485_v28 = vadd.f32 %v3326_v38, %v552_v27 }
 0x11e   :  { %608 = vadd.xlane.f32.xlu1 %v607_v18  ;;  %v580_v18 = vsel %vm255_vm1, %v562_v37, 0.0 }
 0x11f   :  { %v575_v29 = vmul.f32 %v3485_v28, %v3485_v28 }
 0x121   :  { %v619_v31 = vsel %vm255_vm1, %v575_v29, 0.0 }
 0x122   :  { %614 = vadd.xlane.f32.xlu1 %v613_v25 }
 0x126   :  { %620 = vadd.xlane.f32.xlu1 %v619_v31 }
 0x173   :  { %v258_v34 = vpop.xlane.xlu0 %257 }
 0x174   :  { %v304_v35 = vmax.f32 %v258_v34, 1e-24 }
 0x176   :  { %2958 = vrsqrt.f32 %v304_v35 }
 0x177   :  { %v264_v36 = vpop.xlane.xlu1 %263  ;;  %v261_v39 = vpop.xlane.xlu0 %260 }
 0x178   :  { %v305_v40 = vmax.f32 %v261_v39, 1e-24  ;;  %v306_v44 = vmax.f32 %v264_v36, 1e-24  ;;  %v3533_v36 = vadd.f32 %v3449_v61, %v3326_v38 }
 0x17a   :  { %2960 = vrsqrt.f32 %v305_v40  ;;  %v586_v40 = vsel %vm255_vm1, %v564_v20, 0.0 }
 0x17b   :  { %v267_v46 = vpop.xlane.xlu1 %266  ;;  %v270_v59 = vpop.xlane.xlu0 %269 }
 0x17c   :  { %v307_v49 = vmax.f32 %v267_v46, 1e-24  ;;  %v308_v3 = vmax.f32 %v270_v59, 1e-24 }
 0x17e   :  { %2962 = vrsqrt.f32 %v307_v49  ;;  %v3545_v49 = vadd.f32 %v3457_v4, %v3326_v38 }
 0x17f   :  { %2964 = vrsqrt.f32 %v306_v44  ;;  %v273_v52 = vpop.xlane.xlu1 %272 }
 0x180   :  { %v2959_v56 = vpop.eup %2958  ;;  %v309_v60 = vmax.f32 %v273_v52, 1e-24 }
 0x181   :  { %v3499_v63 = vmul.f32 %v2959_v56, %v3332_v42  ;;  %v3513_v42 = vadd.f32 %v3439_v54, %v3326_v38 }
 0x182   :  { %2966 = vrsqrt.f32 %v309_v60 }
 0x183   :  { %v279_v5 = vpop.xlane.xlu1 %278  ;;  %v677_v9 = vmul.f32 %v3499_v63, %v3499_v63  ;;  %2968 = vrsqrt.f32 %v308_v3  ;;  %v566_v44 = vmul.f32 %v3513_v42, %v3513_v42 }
 0x184   :  { %v2961_v10 = vpop.eup %2960  ;;  %v311_v29 = vmax.f32 %v279_v5, 1e-24 }
 0x185   :  { %v678_v12 = vsel %vm255_vm1, %v677_v9, 0.0  ;;  %v337_v13 = vmul.f32 %v2961_v10, %v3329_v41  ;;  %v276_v41 = vpop.xlane.xlu0 %275  ;;  %v592_v56 = vsel %vm255_vm1, %v566_v44, 0.0 }
 0x186   :  { %679 = vadd.xlane.f32.xlu0 %v678_v12  ;;  %v310_v35 = vmax.f32 %v276_v41, 1e-24  ;;  %2970 = vrsqrt.f32 %v311_v29  ;;  %v3575_v41 = vadd.f32 %v3474_v19, %v3326_v38 }
 0x187   :  { %v285_v48 = vpop.xlane.xlu1 %284  ;;  %v3525_v25 = vpack.c.bf16 %v337_v13, %v3499_v63  ;;  %v681_v27 = vmul.f32 %v337_v13, %v337_v13  ;;  %v3562_v13 = vadd.f32 %v3465_v11, %v3326_v38 }
 0x188   :  { %v2963_v23 = vpop.eup %2962  ;;  %2972 = vrsqrt.f32 %v310_v35 }
 0x189   :  { %v2965_v54 = vpop.eup %2964  ;;  %v339_v31 = vmul.f32 %v2963_v23, %v3337_v45  ;;  %2755 = vmatpush3.bf16.xpose.msk.msra.mxu1 %vm3517_vm3, %v3525_v25  ;;  %v2721_v34 = vpack.c.bf16 %v681_v27, %v677_v9  ;;  %v282_v59 = vpop.xlane.xlu0 %281  ;;  %v313_v9 = vmax.f32 %v285_v48, 1e-24  ;;  %v572_v27 = vmul.f32 %v3562_v13, %v3562_v13 }
 0x18a   :  { %581 = vadd.xlane.f32.xlu0 %v580_v18  ;;  %2756 = vmatprep.subr.bf16.mxu1 %v3148_v58  ;;  %v338_v45 = vmul.f32 %v2965_v54, %v3340_v47  ;;  %v568_v47 = vmul.f32 %v3533_v36, %v3533_v36  ;;  %v312_v10 = vmax.f32 %v282_v59, 1e-24 }
 0x18b   :  { %v291_v39 = vpop.xlane.xlu1 %290  ;;  %2723 = vmatpush3.bf16.xpose.msk.msra.mxu0 %vm3517_vm3, %v2721_v34  ;;  %v683_v46 = vmul.f32 %v339_v31, %v339_v31  ;;  %2974 = vrsqrt.f32 %v313_v9 }
 0x18c   :  { %2724 = vmatprep.subr.bf16.mxu0 %v3148_v58  ;;  %v2967_v61 = vpop.eup %2966  ;;  %v3552_v60 = vpack.c.bf16 %v339_v31, %v338_v45  ;;  %v682_v3 = vmul.f32 %v338_v45, %v338_v45  ;;  %v598_v18 = vsel %vm255_vm1, %v568_v47, 0.0  ;;  %2976 = vrsqrt.f32 %v312_v10 }
 0x18d   :  { %v2969_v5 = vpop.eup %2968  ;;  %v341_v37 = vmul.f32 %v2967_v61, %v3350_v53  ;;  %v570_v53 = vmul.f32 %v3545_v49, %v3545_v49  ;;  %v288_v54 = vpop.xlane.xlu0 %287  ;;  %v574_v61 = vmul.f32 %v3575_v41, %v3575_v41 }
 0x18e   :  { %587 = vadd.xlane.f32.xlu0 %v586_v40  ;;  %v2725_v4 = vpack.c.bf16 %v683_v46, %v682_v3  ;;  %v340_v48 = vmul.f32 %v2969_v5, %v3353_v55  ;;  %v315_v40 = vmax.f32 %v291_v39, 1e-24  ;;  %v314_v45 = vmax.f32 %v288_v54, 1e-24 }
 0x18f   :  { %v3547_v52 = vpop.xlane.xlu1 %296  ;;  %v685_v20 = vmul.f32 %v341_v37, %v341_v37  ;;  %v604_v11 = vsel %vm255_vm1, %v570_v53, 0.0  ;;  %v610_v46 = vsel %vm255_vm1, %v572_v27, 0.0  ;;  %v3591_v39 = vadd.f32 %v3482_v26, %v3326_v38 }
 0x190   :  { %v2971_v23 = vpop.eup %2970  ;;  %v3579_v29 = vpack.c.bf16 %v341_v37, %v340_v48  ;;  %v684_v31 = vmul.f32 %v340_v48, %v340_v48  ;;  %v616_v59 = vsel %vm255_vm1, %v574_v61, 0.0  ;;  %v317_v9 = vmax.f32 %v3547_v52, 1e-24 }
 0x191   :  { %2759 = vmatpush3.bf16.xpose.msk.msra.mxu1 %vm3517_vm3, %v3552_v60  ;;  %v343_v44 = vmul.f32 %v2971_v23, %v3363_v62  ;;  %v576_v3 = vmul.f32 %v3591_v39, %v3591_v39  ;;  %v294_v5 = vpop.xlane.xlu0 %293 }
 0x192   :  { %593 = vadd.xlane.f32.xlu0 %v592_v56  ;;  %2760 = vmatprep.subr.bf16.mxu1 %v3148_v58  ;;  %v2973_v35 = vpop.eup %2972  ;;  %v2729_v19 = vpack.c.bf16 %v685_v20, %v684_v31  ;;  %v316_v10 = vmax.f32 %v294_v5, 1e-24 }
 0x193   :  { %v3558_v12 = vpop.xlane.xlu1 %302  ;;  %2727 = vmatpush3.bf16.xpose.msk.msra.mxu0 %vm3517_vm3, %v2725_v4  ;;  %v342_v62 = vmul.f32 %v2973_v35, %v3366_v0  ;;  %v687_v56 = vmul.f32 %v343_v44, %v343_v44 }
 0x194   :  { %2728 = vmatprep.subr.bf16.mxu0 %v3148_v58  ;;  %v319_v54 = vmax.f32 %v3558_v12, 1e-24 }
 0x195   :  { %v2975_v47 = vpop.eup %2974  ;;  %v3600_v38 = vpack.c.bf16 %v343_v44, %v342_v62  ;;  %v686_v26 = vmul.f32 %v342_v62, %v342_v62 }
 0x196   :  { %599 = vadd.xlane.f32.xlu0 %v598_v18  ;;  %v2977_v0 = vpop.eup %2976  ;;  %v345_v37 = vmul.f32 %v2975_v47, %v3375_v6  ;;  %v622_v18 = vsel %vm255_vm1, %v576_v3, 0.0 }
 0x197   :  { %v579_v55 = vpop.xlane.xlu1 %578  ;;  %v2733_v4 = vpack.c.bf16 %v687_v56, %v686_v26  ;;  %v344_v48 = vmul.f32 %v2977_v0, %v3378_v8 }
 0x198   :  { %v625_v34 = vmax.f32 %v579_v55, 1e-24  ;;  %v689_v52 = vmul.f32 %v345_v37, %v345_v37 }
 0x199   :  { %2763 = vmatpush3.bf16.xpose.msk.msra.mxu1 %vm3517_vm3, %v3579_v29  ;;  %v3620_v27 = vpack.c.bf16 %v345_v37, %v344_v48  ;;  %v688_v8 = vmul.f32 %v344_v48, %v344_v48 }
 0x19a   :  { %605 = vadd.xlane.f32.xlu0 %v604_v11  ;;  %2978 = vrsqrt.f32 %v625_v34  ;;  %2764 = vmatprep.subr.bf16.mxu1 %v3148_v58  ;;  %v300_v11 = vpop.xlane.xlu0 %299 }
 0x19b   :  { %2731 = vmatpush3.bf16.xpose.msk.msra.mxu0 %vm3517_vm3, %v2729_v19  ;;  %2980 = vrsqrt.f32 %v315_v40  ;;  %v2737_v34 = vpack.c.bf16 %v689_v52, %v688_v8  ;;  %v318_v35 = vmax.f32 %v300_v11, 1e-24 }
 0x19c   :  { %2732 = vmatprep.subr.bf16.mxu0 %v3148_v58  ;;  %2982 = vrsqrt.f32 %v314_v45 }
 0x19d   :  { %2984 = vrsqrt.f32 %v317_v9 }
 0x19e   :  { %611 = vadd.xlane.f32.xlu0 %v610_v46  ;;  %2986 = vrsqrt.f32 %v316_v10 }
 0x19f   :  { %2988 = vrsqrt.f32 %v319_v54 }
 0x1a0   :  { %2990 = vrsqrt.f32 %v318_v35 }
 0x1a1   :  { %2767 = vmatpush3.bf16.xpose.msk.msra.mxu1 %vm3517_vm3, %v3600_v38 }
 0x1a2   :  { %617 = vadd.xlane.f32.xlu0 %v616_v59  ;;  %2768 = vmatprep.subr.bf16.mxu1 %v3148_v58 }
 0x1a3   :  { %2735 = vmatpush3.bf16.xpose.msk.msra.mxu0 %vm3517_vm3, %v2733_v4  ;;  %v585_v4 = vpop.xlane.xlu1 %584 }
 0x1a4   :  { %v2979_v53 = vpop.eup %2978  ;;  %2736 = vmatprep.subr.bf16.mxu0 %v3148_v58 }
 0x1a5   :  { %v3614_v6 = vmul.f32 %v2979_v53, %v3426_v43  ;;  %v2981_v20 = vpop.eup %2980 }
 0x1a6   :  { %623 = vadd.xlane.f32.xlu0 %v622_v18  ;;  %v2983_v55 = vpop.eup %2982  ;;  %v347_v43 = vmul.f32 %v2981_v20, %v3387_v14  ;;  %v627_v18 = vmax.f32 %v585_v4, 1e-24 }
 0x1a7   :  { %v3618_v23 = vmul.f32 %v3614_v6, %v3614_v6  ;;  %v346_v40 = vmul.f32 %v2983_v55, %v3390_v16  ;;  %v2985_v44 = vpop.eup %2984  ;;  %v591_v48 = vpop.xlane.xlu1 %590 }
 0x1a8   :  { %v691_v12 = vmul.f32 %v347_v43, %v347_v43  ;;  %v2987_v45 = vpop.eup %2986  ;;  %v349_v46 = vmul.f32 %v2985_v44, %v3399_v22  ;;  %v629_v20 = vmax.f32 %v591_v48, 1e-24 }
 0x1a9   :  { %v1102_v31 = vsel %vm255_vm1, %v3618_v23, 0.0  ;;  %2771 = vmatpush3.bf16.xpose.msk.msra.mxu1 %vm3517_vm3, %v3620_v27  ;;  %v3634_v14 = vpack.c.bf16 %v347_v43, %v346_v40  ;;  %v690_v19 = vmul.f32 %v346_v40, %v346_v40  ;;  %v348_v61 = vmul.f32 %v2987_v45, %v3402_v24  ;;  %v2989_v56 = vpop.eup %2988 }
 0x1aa   :  { %1103 = vadd.xlane.f32.xlu1 %v1102_v31  ;;  %2772 = vmatprep.subr.bf16.mxu1 %v3148_v58  ;;  %v693_v62 = vmul.f32 %v349_v46, %v349_v46  ;;  %v2991_v22 = vpop.eup %2990  ;;  %v351_v3 = vmul.f32 %v2989_v56, %v3411_v30 }
 0x1ab   :  { %2739 = vmatpush3.bf16.xpose.msk.msra.mxu0 %vm3517_vm3, %v2737_v34  ;;  %v2741_v16 = vpack.c.bf16 %v691_v12, %v690_v19  ;;  %v3645_v47 = vpack.c.bf16 %v349_v46, %v348_v61  ;;  %v692_v59 = vmul.f32 %v348_v61, %v348_v61  ;;  %v350_v24 = vmul.f32 %v2991_v22, %v3414_v32  ;;  %v597_v55 = vpop.xlane.xlu1 %596 }
 0x1ac   :  { %2740 = vmatprep.subr.bf16.mxu0 %v3148_v58  ;;  %v695_v26 = vmul.f32 %v351_v3, %v351_v3  ;;  %v3151_v32 = vmov 1.0   ;;  %v631_v40 = vmax.f32 %v597_v55, 1e-24 }
 0x1ad   :  { %v2745_v5 = vpack.c.bf16 %v693_v62, %v692_v59  ;;  %v3656_v0 = vpack.c.bf16 %v351_v3, %v350_v24  ;;  %v694_v9 = vmul.f32 %v350_v24, %v350_v24 }
 0x1af   :  { %v2749_v30 = vpack.c.bf16 %v695_v26, %v694_v9  ;;  %v603_v62 = vpop.xlane.xlu1 %602 }
 0x1b1   :  { %2775 = vmatpush3.bf16.xpose.msk.msra.mxu1 %vm3517_vm3, %v3634_v14 }
 0x1b2   :  { %2776 = vmatprep.subr.bf16.mxu1 %v3148_v58 }
 0x1b3   :  { %2743 = vmatpush3.bf16.xpose.msk.msra.mxu0 %vm3517_vm3, %v2741_v16 }
 0x1b4   :  { %2744 = vmatprep.subr.bf16.mxu0 %v3148_v58 }
 0x1b9   :  { %2779 = vmatpush3.bf16.xpose.msk.msra.mxu1 %vm3517_vm3, %v3645_v47 }
 0x1ba   :  { %2780 = vmatprep.subr.bf16.mxu1 %v3148_v58 }
 0x1bb   :  { %2747 = vmatpush3.bf16.xpose.msk.msra.mxu0 %vm3517_vm3, %v2745_v5  ;;  %v673_v5 = vlaneseq }
 0x1bc   :  { %2748 = vmatprep.subr.bf16.mxu0 %v3148_v58 }
 0x1bd   :  { %v3713_v4 = vshrl.u32 %v673_v5, 7 }
 0x1bf   :  { %vm1671_vm5 = vcmp.eq.s32.totalorder %v3713_v4, 0  ;;  %vm1672_vm6 = vcmp.eq.s32.totalorder %v3713_v4, 1 }
 0x1c1   :  { %2783 = vmatpush3.bf16.xpose.msk.msra.mxu1 %vm3517_vm3, %v3656_v0 }
 0x1c2   :  { %2587 = vmatprep.subr.mxu1 %v3150_v33 }
 0x1c3   :  { %2751 = vmatpush3.bf16.xpose.msk.msra.mxu0 %vm3517_vm3, %v2749_v30  ;;  %v609_v30 = vpop.xlane.xlu1 %608 }
 0x1c8   :  { %2585 = vmatmul.mubr.msk.f32.vlgmr.msra.gmra.mrb[32].mxu1 %vm255_vm1, %v3499_v63 }
 0x1c9   :  { %2589 = vmatprep.mubr.msk.f32.mxu1 %vm3149_vm2, %v3150_v33 }
 0x1ca   :  { %2550 = vmatmul.mubr.msk.f32.vlgmr.msra.gmra.mrb[0].mxu0 %vm255_vm1, %v3151_v32 }
 0x1cb   :  { %2659 = vmatprep.mubr.msk.f32.mxu0 %vm255_vm1, %v3614_v6 }
 0x213   :  { %v3672_v37 = vpop.xlane.xlu0 %679 }
 0x217   :  { %v582_v10 = vpop.xlane.xlu0 %581 }
 0x218   :  { %v626_v53 = vmax.f32 %v582_v10, 1e-24 }
 0x21a   :  { %2992 = vrsqrt.f32 %v626_v53  ;;  %v635_v53 = vmax.f32 %v609_v30, 1e-24 }
 0x21b   :  { %v588_v52 = vpop.xlane.xlu0 %587  ;;  %2994 = vrsqrt.f32 %v627_v18 }
 0x21c   :  { %v628_v63 = vmax.f32 %v588_v52, 1e-24  ;;  %v3152_v52 = vmov 11  }
 0x21e   :  { %2996 = vrsqrt.f32 %v628_v63  ;;  %v1673_v63 = vsel %vm1672_vm6, 7, %v3152_v52 }
 0x21f   :  { %v594_v11 = vpop.xlane.xlu0 %593  ;;  %2998 = vrsqrt.f32 %v629_v20  ;;  %v3153_v20 = vmov 22  }
 0x220   :  { %v630_v8 = vmax.f32 %v594_v11, 1e-24  ;;  %v1675_v11 = vsel %vm1672_vm6, 14, %v3153_v20 }
 0x221   :  { %v3732_v55 = vsel %vm1671_vm5, 18, %v1675_v11  ;;  %v3154_v11 = vmov 1e+30  }
 0x222   :  { %3000 = vrsqrt.f32 %v630_v8  ;;  %v1674_v8 = vsel %vm1671_vm5, 7, %v1673_v63 }
 0x223   :  { %v600_v54 = vpop.xlane.xlu0 %599 }
 0x224   :  { %v2993_v31 = vpop.eup %2992  ;;  %v632_v43 = vmax.f32 %v600_v54, 1e-24 }
 0x225   :  { %v3675_v34 = vmul.f32 %v2993_v31, %v3496_v51  ;;  %v2995_v35 = vpop.eup %2994 }
 0x226   :  { %3002 = vrsqrt.f32 %v632_v43  ;;  %v3688_v51 = vmul.f32 %v2995_v35, %v3434_v50 }
 0x227   :  { %v2816_v12 = vpack.c.bf16 %v3675_v34, %v3614_v6  ;;  %v3681_v44 = vmul.f32 %v3675_v34, %v3675_v34  ;;  %v606_v45 = vpop.xlane.xlu0 %605  ;;  %3004 = vrsqrt.f32 %v631_v40 }
 0x228   :  { %v2997_v19 = vpop.eup %2996  ;;  %v634_v22 = vmax.f32 %v606_v45, 1e-24 }
 0x229   :  { %2818 = vmatprep.subr.msk.bf16.mxu0 %vm3517_vm3, %v2816_v12  ;;  %v1105_v46 = vsel %vm255_vm1, %v3681_v44, 0.0  ;;  %v3691_v16 = vmul.f32 %v2997_v19, %v3503_v2  ;;  %v2999_v61 = vpop.eup %2998  ;;  %v633_v2 = vmax.f32 %v603_v62, 1e-24 }
 0x22a   :  { %2821 = vmatpush3.bf16.xpose.msk.msra.mxu0 %vm3517_vm3, %v2816_v12  ;;  %1106 = vadd.xlane.f32.xlu0 %v1105_v46  ;;  %v3703_v3 = vmul.f32 %v2999_v61, %v3442_v57  ;;  %3006 = vrsqrt.f32 %v634_v22 }
 0x22b   :  { %v2822_v56 = vpack.c.bf16 %v3691_v16, %v3688_v51  ;;  %v612_v24 = vpop.xlane.xlu0 %611  ;;  %3008 = vrsqrt.f32 %v633_v2 }
 0x22c   :  { %v3001_v59 = vpop.eup %3000  ;;  %v636_v10 = vmax.f32 %v612_v24, 1e-24 }
 0x22d   :  { %2824 = vmatprep.subr.msk.bf16.mxu0 %vm3517_vm3, %v2822_v56  ;;  %v3700_v50 = vmul.f32 %v3001_v59, %v3513_v42  ;;  %v3711_v42 = vand.u32 127, %v673_v5 }
 0x22e   :  { %3010 = vrsqrt.f32 %v636_v10 }
 0x22f   :  { %v2828_v26 = vpack.c.bf16 %v3700_v50, %v3703_v3  ;;  %vm1670_vm4 = vcmp.eq.s32.totalorder %v3711_v42, 0  ;;  %v618_v54 = vpop.xlane.xlu0 %617  ;;  %vm3737_vm7 = vcmp.eq.s32.totalorder %v3711_v42, %v1674_v8  ;;  %3012 = vrsqrt.f32 %v635_v53 }
 0x230   :  { %v3003_v9 = vpop.eup %3002  ;;  %v638_v12 = vmax.f32 %v618_v54, 1e-24  ;;  %vm944_vm8 = vcmp.lt.s32.totalorder %v3711_v42, 8 }
 0x231   :  { %v3005_v57 = vpop.eup %3004  ;;  %v3716_v18 = vmul.f32 %v3003_v9, %v3533_v36  ;;  %v615_v36 = vpop.xlane.xlu1 %614 }
 0x232   :  { %2827 = vmatpush3.bf16.xpose.msk.msra.mxu0 %vm3517_vm3, %v2822_v56  ;;  %v3722_v48 = vmul.f32 %v3005_v57, %v3452_v1  ;;  %v637_v35 = vmax.f32 %v615_v36, 1e-24  ;;  %v3861_v36 = vrot.slane %v3154_v11, 7 }
 0x233   :  { %2830 = vmatprep.subr.msk.bf16.mxu0 %vm3517_vm3, %v2828_v26  ;;  %v624_v61 = vpop.xlane.xlu0 %623 }
 0x234   :  { %v2834_v1 = vpack.c.bf16 %v3716_v18, %v3722_v48  ;;  %v3007_v43 = vpop.eup %3006  ;;  %3014 = vrsqrt.f32 %v637_v35  ;;  %v640_v22 = vmax.f32 %v624_v61, 1e-24 }
 0x235   :  { %v3009_v40 = vpop.eup %3008  ;;  %v3746_v19 = vmul.f32 %v3007_v43, %v3545_v49  ;;  %3016 = vrsqrt.f32 %v638_v12  ;;  %v621_v46 = vpop.xlane.xlu1 %620  ;;  %v1055_v43 = vand.u32 2, %v3711_v42 }
 0x236   :  { %v3749_v45 = vmul.f32 %v3009_v40, %v3460_v7  ;;  %v639_v59 = vmax.f32 %v621_v46, 1e-24 }
 0x237   :  { %vm3886_vm13 = vcmp.ne.s32.totalorder %v1055_v43, 0 }
 0x238   :  { %v2840_v62 = vpack.c.bf16 %v3746_v19, %v3749_v45  ;;  %v3011_v56 = vpop.eup %3010  ;;  %3018 = vrsqrt.f32 %v639_v59 }
 0x239   :  { %v3013_v49 = vpop.eup %3012  ;;  %v3758_v2 = vmul.f32 %v3011_v56, %v3562_v13  ;;  %3020 = vrsqrt.f32 %v640_v22 }
 0x23a   :  { %2833 = vmatpush3.bf16.xpose.msk.msra.mxu0 %vm3517_vm3, %v2828_v26  ;;  %v3761_v7 = vmul.f32 %v3013_v49, %v3469_v15 }
 0x23b   :  { %2836 = vmatprep.subr.msk.bf16.mxu0 %vm3517_vm3, %v2834_v1 }
 0x23c   :  { %v2846_v24 = vpack.c.bf16 %v3758_v2, %v3761_v7 }
 0x23e   :  { %v3015_v5 = vpop.eup %3014 }
 0x23f   :  { %v3017_v26 = vpop.eup %3016  ;;  %v3770_v9 = vmul.f32 %v3015_v5, %v3477_v21 }
 0x240   :  { %v3773_v13 = vmul.f32 %v3017_v26, %v3575_v41 }
 0x242   :  { %2839 = vmatpush3.bf16.xpose.msk.msra.mxu0 %vm3517_vm3, %v2834_v1  ;;  %v3019_v15 = vpop.eup %3018  ;;  %v2852_v30 = vpack.c.bf16 %v3773_v13, %v3770_v9 }
 0x243   :  { %2842 = vmatprep.subr.msk.bf16.mxu0 %vm3517_vm3, %v2840_v62  ;;  %v3021_v57 = vpop.eup %3020  ;;  %v3782_v10 = vmul.f32 %v3019_v15, %v3485_v28  ;;  %v946_v28 = vsub.s32 %v3713_v4, %v3711_v42 }
 0x244   :  { %v3785_v21 = vmul.f32 %v3021_v57, %v3591_v39  ;;  %v3849_v39 = vsub.s32 0, %v3713_v4 }
 0x246   :  { %v2858_v41 = vpack.c.bf16 %v3785_v21, %v3782_v10 }
 0x24a   :  { %2845 = vmatpush3.bf16.xpose.msk.msra.mxu0 %vm3517_vm3, %v2840_v62 }
 0x24b   :  { %2848 = vmatprep.subr.msk.bf16.mxu0 %vm3517_vm3, %v2846_v24 }
 0x252   :  { %2851 = vmatpush3.bf16.xpose.msk.msra.mxu0 %vm3517_vm3, %v2846_v24 }
 0x253   :  { %2854 = vmatprep.subr.msk.bf16.mxu0 %vm3517_vm3, %v2852_v30 }
 0x25a   :  { %2857 = vmatpush3.bf16.xpose.msk.msra.mxu0 %vm3517_vm3, %v2852_v30  ;;  %v1074_v30 = vand.u32 4, %v3711_v42 }
 0x25b   :  { %2860 = vmatprep.subr.msk.bf16.mxu0 %vm3517_vm3, %v2858_v41 }
 0x25c   :  { %vm3912_vm0 = vcmp.ne.s32.totalorder %v1074_v30, 0 }
 0x262   :  { %2863 = vmatpush3.bf16.xpose.msk.msra.mxu0 %vm3517_vm3, %v2858_v41 }
 0x263   :  { %2870 = vmatprep.subr.msk.bf16.mxu0 %vm3517_vm3, %v3525_v25 }
 0x269   :  { %2660 = vmatmul.mubr.msk.f32.vlgmr.msra.gmra.mrb[2].mxu0 %vm255_vm1, %v3675_v34 }
 0x26a   :  { %2873 = vmatpush3.bf16.xpose.msk.msra.mxu0 %vm3517_vm3, %v3525_v25  ;;  %2701 = vmatprep.mubr.msk.f32.mxu0 %vm255_vm1, %v3614_v6  ;;  %v947_v25 = vcvt.s32.f32 %v946_v28 }
 0x26b   :  { %2876 = vmatprep.subr.msk.bf16.mxu0 %vm3517_vm3, %v3552_v60 }
 0x26c   :  { %v949_v1 = vand.u32 2147483647, %v947_v25 }
 0x26e   :  { %vm3878_vm12 = vcmp.gt.f32.partialorder %v949_v1, 2.0 }
 0x272   :  { %2879 = vmatpush3.bf16.xpose.msk.msra.mxu0 %vm3517_vm3, %v3552_v60  ;;  %v948_v60 = vmul.f32 %v947_v25, %v947_v25 }
 0x273   :  { %2882 = vmatprep.subr.msk.bf16.mxu0 %vm3517_vm3, %v3579_v29 }
 0x27a   :  { %2885 = vmatpush3.bf16.xpose.msk.msra.mxu0 %vm3517_vm3, %v3579_v29  ;;  %v3843_v29 = vadd.f32 1.0, %v948_v60 }
 0x27b   :  { %2888 = vmatprep.subr.msk.bf16.mxu0 %vm3517_vm3, %v3600_v38 }
 0x27c   :  { %3022 = vrcp.f32 %v3843_v29 }
 0x282   :  { %2891 = vmatpush3.bf16.xpose.msk.msra.mxu0 %vm3517_vm3, %v3600_v38 }
 0x283   :  { %2894 = vmatprep.subr.msk.bf16.mxu0 %vm3517_vm3, %v3620_v27 }
 0x286   :  { %v3874_v40 = vpop.eup %3022 }
 0x28a   :  { %2897 = vmatpush3.bf16.xpose.msk.msra.mxu0 %vm3517_vm3, %v3620_v27 }
 0x28b   :  { %2900 = vmatprep.subr.msk.bf16.mxu0 %vm3517_vm3, %v3634_v14 }
 0x292   :  { %2903 = vmatpush3.bf16.xpose.msk.msra.mxu0 %vm3517_vm3, %v3634_v14 }
 0x293   :  { %2906 = vmatprep.subr.msk.bf16.mxu0 %vm3517_vm3, %v3645_v47 }
 0x29a   :  { %2909 = vmatpush3.bf16.xpose.msk.msra.mxu0 %vm3517_vm3, %v3645_v47  ;;  %v1039_v47 = vand.u32 1, %v3711_v42 }
 0x29b   :  { %2912 = vmatprep.subr.msk.bf16.mxu0 %vm3517_vm3, %v3656_v0  ;;  %v931_v38 = vpop.f32.mrb[32].mxu1 }
 0x29c   :  { %v2586_v6 = vpop.f32.mrb[33].mxu1  ;;  %v940_v52 = vmul.f32 2.0, %v931_v38  ;;  %vm3864_vm9 = vcmp.ne.s32.totalorder %v1039_v47, 0 }
 0x29d   :  { %v813_v27 = vpop.f32.mrb[0].mxu0 }
 0x29e   :  { %v3853_v14 = vrot.slane %v813_v27, %v3849_v39  ;;  %v2551_v53 = vpop.f32.mrb[1].mxu0 }
 0x2a0   :  { %v939_v63 = vadd.f32 %v3853_v14, %v3672_v37 }
 0x2a2   :  { %2915 = vmatpush3.bf16.xpose.msk.msra.mxu0 %vm3517_vm3, %v3656_v0  ;;  %v941_v20 = vsub.f32 %v939_v63, %v940_v52  ;;  %v1054_v0 = vsel %vm3864_vm9, %v3861_v36, 1e+30 }
 0x2a3   :  { %v1058_v49 = vrot.slane %v1054_v0, 6 }
 0x2a4   :  { %v942_v54 = vmax.f32 %v941_v20, 0.0 }
 0x2a6   :  { %v952_v35 = vsub.f32 2.0, %v942_v54  ;;  %v1038_v37 = vsel %vm944_vm8, %v942_v54, 1e+30  ;;  %v956_v24 = vmul.f32 %v3874_v40, %v942_v54  ;;  %v2785_v54 = vpack.c.bf16 %v3681_v44, %v3618_v23 }
 0x2a7   :  { %v1045_v12 = vrot.slane %v1038_v37, 7  ;;  %v1109_v23 = vmul.f32 %v3691_v16, %v3691_v16  ;;  %v1108_v44 = vmul.f32 %v3688_v51, %v3688_v51  ;;  %v1113_v51 = vmul.f32 %v3716_v18, %v3716_v18 }
 0x2a8   :  { %v953_v61 = vmax.f32 %v952_v35, 0.0  ;;  %v1112_v16 = vmul.f32 %v3722_v48, %v3722_v48  ;;  %v1117_v18 = vmul.f32 %v3758_v2, %v3758_v2  ;;  %v1116_v48 = vmul.f32 %v3761_v7, %v3761_v7 }
 0x2a9   :  { %2702 = vmatmul.mubr.msk.f32.vlgmr.msra.gmra.mrb[4].mxu0 %vm255_vm1, %v3675_v34  ;;  %v1046_v62 = vsel %vm1032_vm10, %v1045_v12, %v3861_v36  ;;  %v1051_v56 = vsel %vm1032_vm10, %v3861_v36, %v1045_v12  ;;  %v1120_v2 = vmul.f32 %v3782_v10, %v3782_v10  ;;  %v1121_v7 = vmul.f32 %v3785_v21, %v3785_v21  ;;  %v1104_v21 = vpop.xlane.xlu1 %1103 }
 0x2aa   :  { %v1052_v22 = vsel %vm3864_vm9, %v1051_v56, %v1038_v37  ;;  %v1053_v34 = vsel %vm3864_vm9, %v1046_v62, 1e+30  ;;  %v954_v5 = vmul.f32 %v953_v61, %v3843_v29  ;;  %v2789_v61 = vpack.c.bf16 %v1109_v23, %v1108_v44 }
 0x2ab   :  { %v1063_v26 = vrot.slane %v1052_v22, 6  ;;  %v1064_v15 = vrot.slane %v1053_v34, 6  ;;  %v1111_v62 = vmul.f32 %v3700_v50, %v3700_v50  ;;  %v1110_v56 = vmul.f32 %v3703_v3, %v3703_v3 }
 0x2ac   :  { %v957_v57 = vsel %vm3878_vm12, %v954_v5, %v956_v24  ;;  %v1115_v50 = vmul.f32 %v3746_v19, %v3746_v19  ;;  %v1114_v3 = vmul.f32 %v3749_v45, %v3749_v45  ;;  %v2805_v5 = vpack.c.bf16 %v1117_v18, %v1116_v48 }
 0x2ad   :  { %v1065_v41 = vsel %vm1062_vm11, %v1063_v26, %v1064_v15  ;;  %v1066_v28 = vsel %vm1062_vm11, %v1064_v15, %v1058_v49  ;;  %v1070_v25 = vsel %vm1062_vm11, %v1058_v49, %v1063_v26  ;;  %2588 = vmatpush3.msk.msra.mxu1 %vm944_vm8, %v957_v57  ;;  %v2793_v49 = vpack.c.bf16 %v1111_v62, %v1110_v56 }
 0x2ae   :  { %v1071_v60 = vsel %vm3886_vm13, %v1070_v25, %v1052_v22  ;;  %v1072_v38 = vsel %vm3886_vm13, %v1065_v41, %v1053_v34  ;;  %v1073_v6 = vsel %vm3886_vm13, %v1066_v28, %v1054_v0  ;;  %2590 = vmatmul.mubr.msk.f32.vlgmr.msra.gmra.mrb[34].mxu1 %vm959_vm14, %v3151_v32  ;;  %2784 = vmatprep.subr.bf16.mxu1 %v3148_v58  ;;  %v3992_v15 = vadd.s32 8, %v3713_v4 }
 0x2af   :  { %v1077_v53 = vrot.slane %v1073_v6, 4  ;;  %v1082_v47 = vrot.slane %v1071_v60, 4  ;;  %v1083_v52 = vrot.slane %v1072_v38, 4  ;;  %2624 = vmatprep.mubr.msk.f32.mxu1 %vm3149_vm2, %v3150_v33  ;;  %v2797_v22 = vpack.c.bf16 %v1113_v51, %v1112_v16 }
 0x2b0   :  { %v2801_v34 = vpack.c.bf16 %v1115_v50, %v1114_v3  ;;  %v1118_v19 = vmul.f32 %v3770_v9, %v3770_v9  ;;  %v1119_v45 = vmul.f32 %v3773_v13, %v3773_v13  ;;  %v2813_v26 = vpack.c.bf16 %v1121_v7, %v1120_v2 }
 0x2b1   :  { %v1084_v63 = vsel %vm1081_vm15, %v1082_v47, %v1083_v52  ;;  %v1085_v20 = vsel %vm1081_vm15, %v1083_v52, %v1077_v53  ;;  %v1089_v11 = vsel %vm1081_vm15, %v1077_v53, %v1082_v47  ;;  %v1607_v41 = vadd.f32 %v1104_v21, %v3853_v14 }
 0x2b2   :  { %v1090_v1 = vsel %vm3912_vm0, %v1089_v11, %v1071_v60  ;;  %v1091_v43 = vsel %vm3912_vm0, %v1084_v63, %v1072_v38  ;;  %v1092_v35 = vsel %vm3912_vm0, %v1085_v20, %v1073_v6  ;;  %v2809_v24 = vpack.c.bf16 %v1119_v45, %v1118_v19 }
 0x2b3   :  { %v1093_v37 = vsel %vm944_vm8, %v1090_v1, 1e+30  ;;  %v1094_v0 = vsel %vm944_vm8, %v1091_v43, 1e+30  ;;  %v1095_v12 = vsel %vm944_vm8, %v1092_v35, 1e+30  ;;  %v1380_v7 = vsub.s32 %v3992_v15, %v3711_v42 }
 0x2b4   :  { %1096 = vst [vmem:[#allocation3] sm:$0xff] %v1093_v37  ;;  %1097 = vst [vmem:[#allocation3 + $0x8] sm:$0xff] %v1094_v0  ;;  %2787 = vmatpush3.bf16.xpose.msk.msra.mxu1 %vm3517_vm3, %v2785_v54 }
 0x2b5   :  { %1098 = vst [vmem:[#allocation3 + $0x10] sm:$0xff] %v1095_v12  ;;  %2788 = vmatprep.subr.bf16.mxu1 %v3148_v58 }
 0x2b7   :  { %v3994_v10 = vpop.xlane.xlu0 %1106 }
 0x2b8   :  { %v1608_v17 = vadd.f32 %v3994_v10, %v3853_v14 }
 0x2bc   :  { %2791 = vmatpush3.bf16.xpose.msk.msra.mxu1 %vm3517_vm3, %v2789_v61 }
 0x2bd   :  { %2792 = vmatprep.subr.bf16.mxu1 %v3148_v58 }
 0x2c4   :  { %2795 = vmatpush3.bf16.xpose.msk.msra.mxu1 %vm3517_vm3, %v2793_v49 }
 0x2c5   :  { %2796 = vmatprep.subr.bf16.mxu1 %v3148_v58 }
 0x2cc   :  { %2799 = vmatpush3.bf16.xpose.msk.msra.mxu1 %vm3517_vm3, %v2797_v22 }
 0x2cd   :  { %2800 = vmatprep.subr.bf16.mxu1 %v3148_v58 }
 0x2d4   :  { %2803 = vmatpush3.bf16.xpose.msk.msra.mxu1 %vm3517_vm3, %v2801_v34 }
 0x2d5   :  { %2804 = vmatprep.subr.bf16.mxu1 %v3148_v58 }
 0x2dc   :  { %2807 = vmatpush3.bf16.xpose.msk.msra.mxu1 %vm3517_vm3, %v2805_v5 }
 0x2dd   :  { %2808 = vmatprep.subr.bf16.mxu1 %v3148_v58 }
 0x2e4   :  { %2811 = vmatpush3.bf16.xpose.msk.msra.mxu1 %vm3517_vm3, %v2809_v24 }
 0x2e5   :  { %2812 = vmatprep.subr.bf16.mxu1 %v3148_v58 }
 0x2ec   :  { %2815 = vmatpush3.bf16.xpose.msk.msra.mxu1 %vm3517_vm3, %v2813_v26  ;;  %vm1376_vm3 = vcmp.lt.s32.totalorder %v3992_v15, 12  ;;  %v1381_v26 = vcvt.s32.f32 %v1380_v7 }
 0x2ed   :  { %2864 = vmatprep.subr.bf16.mxu1 %v3148_v58 }
 0x2f3   :  { %2625 = vmatmul.mubr.msk.f32.vlgmr.msra.gmra.mrb[36].mxu1 %vm255_vm1, %v3151_v32 }
 0x2f4   :  { %2666 = vmatprep.mubr.msk.f32.mxu1 %vm3149_vm2, %v3150_v33  ;;  %vm1616_vm2 = vmand %vm1376_vm3, %vm944_vm8 }
 0x33c   :  { %v2661_v9 = vpop.f32.mrb[2].mxu0 }
 0x33d   :  { %v1354_v13 = vpop.f32.mrb[3].mxu0 }
 0x37c   :  { %v2703_v30 = vpop.f32.mrb[4].mxu0 }
 0x37d   :  { %v1610_v58 = vmul.f32 2.0, %v2703_v30  ;;  %v1598_v57 = vpop.f32.mrb[5].mxu0  ;;  %v1382_v30 = vmul.f32 %v1381_v26, %v1381_v26 }
 0x37e   :  { %v1609_v28 = vmul.f32 2.0, %v1598_v57 }
 0x37f   :  { %v1612_v33 = vsub.f32 %v1608_v17, %v1610_v58  ;;  %v1385_v17 = vadd.f32 1.0, %v1382_v30 }
 0x380   :  { %v1611_v25 = vsub.f32 %v1607_v41, %v1609_v28  ;;  %v1370_v28 = vmul.f32 2.0, %v2661_v9  ;;  %v1383_v9 = vand.u32 2147483647, %v1381_v26 }
 0x381   :  { %v1614_v60 = vmax.f32 %v1612_v33, 0.0  ;;  %v1028_v6 = vpop.f32.mrb[34].mxu1  ;;  %3024 = vrcp.f32 %v1385_v17  ;;  %v1369_v33 = vmul.f32 2.0, %v1354_v13 }
 0x382   :  { %v1613_v38 = vmax.f32 %v1611_v25, 0.0  ;;  %v2591_v47 = vpop.f32.mrb[35].mxu1  ;;  %v1033_v52 = vsel %vm1032_vm10, %v1028_v6, 0.0 }
 0x383   :  { %v1618_v53 = vsel %vm1616_vm2, %v1614_v60, 1e+30  ;;  %1034 = vadd.xlane.f32.xlu1 %v1033_v52  ;;  %vm1384_vm2 = vcmp.gt.f32.partialorder %v1383_v9, 2.0 }
 0x384   :  { %v1622_v63 = vrot.slane %v1618_v53, 7  ;;  %v1617_v20 = vsel %vm944_vm8, %v1613_v38, 1e+30 }
 0x385   :  { %v1621_v14 = vrot.slane %v1617_v20, 7 }
 0x386   :  { %v1624_v11 = vsel %vm1032_vm10, %v1622_v63, %v3861_v36 }
 0x387   :  { %v1631_v54 = vsel %vm3864_vm9, %v1624_v11, 1e+30  ;;  %v1623_v1 = vsel %vm1032_vm10, %v1621_v14, %v1622_v63  ;;  %v1628_v43 = vsel %vm1032_vm10, %v3861_v36, %v1621_v14 }
 0x388   :  { %v1633_v35 = vrot.slane %v1631_v54, 6  ;;  %v1629_v37 = vsel %vm3864_vm9, %v1628_v43, %v1617_v20  ;;  %v1630_v0 = vsel %vm3864_vm9, %v1623_v1, %v1618_v53 }
 0x389   :  { %v1637_v12 = vrot.slane %v1629_v37, 6  ;;  %v1638_v23 = vrot.slane %v1630_v0, 6 }
 0x38b   :  { %v1639_v44 = vsel %vm1062_vm11, %v1637_v12, %v1638_v23  ;;  %v1640_v61 = vsel %vm1062_vm11, %v1638_v23, %v1633_v35  ;;  %v1644_v62 = vsel %vm1062_vm11, %v1633_v35, %v1637_v12  ;;  %v3025_v53 = vpop.eup %3024 }
 0x38c   :  { %v1645_v56 = vsel %vm3886_vm13, %v1644_v62, %v1629_v37  ;;  %v1646_v49 = vsel %vm3886_vm13, %v1639_v44, %v1630_v0  ;;  %v1647_v51 = vsel %vm3886_vm13, %v1640_v61, %v1631_v54 }
 0x38d   :  { %v1649_v16 = vrot.slane %v1647_v51, 4  ;;  %v1653_v22 = vrot.slane %v1645_v56, 4  ;;  %v1654_v50 = vrot.slane %v1646_v49, 4 }
 0x38f   :  { %v1655_v3 = vsel %vm1081_vm15, %v1653_v22, %v1654_v50  ;;  %v1656_v34 = vsel %vm1081_vm15, %v1654_v50, %v1649_v16  ;;  %v1660_v18 = vsel %vm1081_vm15, %v1649_v16, %v1653_v22 }
 0x390   :  { %v1661_v48 = vsel %vm3912_vm0, %v1660_v18, %v1645_v56  ;;  %v1662_v5 = vsel %vm3912_vm0, %v1655_v3, %v1646_v49  ;;  %v1663_v19 = vsel %vm3912_vm0, %v1656_v34, %v1647_v51 }
 0x391   :  { %v1664_v45 = vsel %vm944_vm8, %v1661_v48, 1e+30  ;;  %v1665_v24 = vsel %vm944_vm8, %v1662_v5, 1e+30  ;;  %v1666_v2 = vsel %vm944_vm8, %v1663_v19, 1e+30 }
 0x392   :  { %1667 = vst [vmem:[#allocation2] sm:$0xff] %v1664_v45  ;;  %1668 = vst [vmem:[#allocation2 + $0x8] sm:$0xff] %v1665_v24  ;;  %vm1377_vm8 = vcmp.lt.s32.totalorder %v3711_v42, 12 }
 0x393   :  { %1669 = vst [vmem:[#allocation2 + $0x10] sm:$0xff] %v1666_v2  ;;  %vm4051_vm14 = vmand %vm1376_vm3, %vm1377_vm8 }
 0x394   :  { %vm2866_vm3 = vmpackc.low %vm4051_vm14, %vm1377_vm8 }
 0x3c6   :  { %v1236_v58 = vpop.f32.mrb[36].mxu1 }
 0x3c7   :  { %v1366_v57 = vrot.slane %v1236_v58, %v3849_v39  ;;  %v2626_v41 = vpop.f32.mrb[37].mxu1 }
 0x3c9   :  { %v1367_v25 = vadd.f32 %v1366_v57, %v1104_v21  ;;  %v1368_v60 = vadd.f32 %v1366_v57, %v3994_v10 }
 0x3cb   :  { %v1371_v38 = vsub.f32 %v1367_v25, %v1369_v33  ;;  %v1372_v6 = vsub.f32 %v1368_v60, %v1370_v28 }
 0x3cd   :  { %v1373_v47 = vmax.f32 %v1371_v38, 0.0  ;;  %v1374_v52 = vmax.f32 %v1372_v6, 0.0  ;;  %v4110_v6 = vmov 0.0  }
 0x3cf   :  { %v1386_v13 = vsub.f32 2.0, %v1373_v47  ;;  %v1387_v21 = vsub.f32 2.0, %v1374_v52  ;;  %v1394_v20 = vmul.f32 %v3025_v53, %v1374_v52  ;;  %v1474_v10 = vsel %vm1377_vm8, %v1373_v47, 1e+30 }
 0x3d0   :  { %v1475_v14 = vsel %vm4051_vm14, %v1374_v52, 1e+30  ;;  %v1478_v1 = vrot.slane %v1474_v10, 7  ;;  %v1392_v15 = vmul.f32 %v3874_v40, %v1373_v47  ;;  %v4112_v53 = vmov 1e+30  }
 0x3d1   :  { %v1388_v11 = vmax.f32 %v1386_v13, 0.0  ;;  %v1389_v54 = vmax.f32 %v1387_v21, 0.0  ;;  %v1479_v43 = vrot.slane %v1475_v14, 7  ;;  %v4114_v47 = vmov 1e+30  }
 0x3d2   :  { %v1485_v0 = vsel %vm1032_vm10, %v3861_v36, %v1478_v1 }
 0x3d3   :  { %v1390_v35 = vmul.f32 %v1388_v11, %v3843_v29  ;;  %v1391_v37 = vmul.f32 %v1389_v54, %v1385_v17  ;;  %v1480_v12 = vsel %vm1032_vm10, %v1478_v1, %v1479_v43  ;;  %v1486_v23 = vsel %vm3864_vm9, %v1485_v0, %v1474_v10 }
 0x3d4   :  { %v1481_v44 = vsel %vm1032_vm10, %v1479_v43, %v3861_v36  ;;  %v1487_v61 = vsel %vm3864_vm9, %v1480_v12, %v1475_v14  ;;  %v1494_v62 = vrot.slane %v1486_v23, 6  ;;  %v1521_v36 = vand.u32 8, %v3711_v42 }
 0x3d5   :  { %v1395_v40 = vsel %vm3878_vm12, %v1390_v35, %v1392_v15  ;;  %v1396_v29 = vsel %vm1384_vm2, %v1391_v37, %v1394_v20  ;;  %v1488_v56 = vsel %vm3864_vm9, %v1481_v44, 1e+30  ;;  %v1495_v16 = vrot.slane %v1487_v61, 6 }
 0x3d6   :  { %v2865_v49 = vpack.c.bf16 %v1396_v29, %v1395_v40  ;;  %v1490_v51 = vrot.slane %v1488_v56, 6  ;;  %vm1522_vm9 = vcmp.ne.s32.totalorder %v1521_v36, 0 }
 0x3d7   :  { %v1496_v22 = vsel %vm1062_vm11, %v1494_v62, %v1495_v16 }
 0x3d8   :  { %2867 = vmatpush3.bf16.msk.msra.mxu1 %vm2866_vm3, %v2865_v49  ;;  %v1497_v46 = vsel %vm1062_vm11, %v1495_v16, %v1490_v51  ;;  %v1501_v50 = vsel %vm1062_vm11, %v1490_v51, %v1494_v62  ;;  %v1503_v34 = vsel %vm3886_vm13, %v1496_v22, %v1487_v61 }
 0x3d9   :  { %v1502_v3 = vsel %vm3886_vm13, %v1501_v50, %v1486_v23  ;;  %v1504_v8 = vsel %vm3886_vm13, %v1497_v46, %v1488_v56  ;;  %v1511_v5 = vrot.slane %v1503_v34, 4 }
 0x3da   :  { %v1506_v18 = vrot.slane %v1504_v8, 4  ;;  %v1510_v48 = vrot.slane %v1502_v3, 4 }
 0x3db   :  { %2667 = vmatmul.mubr.msk.f32.vlgmr.msra.gmra.mrb[38].mxu1 %vm255_vm1, %v3151_v32 }
 0x3dc   :  { %v1512_v19 = vsel %vm1081_vm15, %v1510_v48, %v1511_v5  ;;  %v1513_v45 = vsel %vm1081_vm15, %v1511_v5, %v1506_v18  ;;  %v1517_v24 = vsel %vm1081_vm15, %v1506_v18, %v1510_v48 }
 0x3dd   :  { %v1518_v2 = vsel %vm3912_vm0, %v1517_v24, %v1502_v3  ;;  %v1519_v59 = vsel %vm3912_vm0, %v1512_v19, %v1503_v34  ;;  %v1520_v7 = vsel %vm3912_vm0, %v1513_v45, %v1504_v8 }
 0x3de   :  { %v1523_v26 = vsel %vm1522_vm9, %v1520_v7, %v1518_v2  ;;  %v1524_v30 = vsel %vm1522_vm9, %v1518_v2, %v1519_v59  ;;  %v1525_v17 = vsel %vm1522_vm9, %v1519_v59, %v1520_v7 }
 0x3df   :  { %v1526_v32 = vsel %vm1377_vm8, %v1523_v26, 1e+30  ;;  %v1527_v58 = vsel %vm1377_vm8, %v1524_v30, 1e+30  ;;  %v1528_v57 = vsel %vm1377_vm8, %v1525_v17, 1e+30 }
 0x3e0   :  { %1529 = vst [vmem:[#allocation4] sm:$0xff] %v1526_v32  ;;  %1530 = vst [vmem:[#allocation4 + $0x8] sm:$0xff] %v1527_v58 }
 0x3e1   :  { %1531 = vst [vmem:[#allocation4 + $0x10] sm:$0xff] %v1528_v57 }
 0x410   :  { %v1035_v41 = vpop.xlane.xlu1 %1034 }
 0x411   :  { %v4105_v28 = vmul.f32 0.015625, %v1035_v41 }
 0x4ae   :  { %v1465_v27 = vpop.f32.mrb[38].mxu1 }
 0x4af   :  { %v2668_v33 = vpop.f32.mrb[39].mxu1  ;;  %v1469_v25 = vsel %vm1032_vm10, %v1465_v27, 0.0 }
 0x4b0   :  { %1470 = vadd.xlane.f32.xlu0 %v1469_v25 }
 0x53d   :  { %v1471_v60 = vpop.xlane.xlu0 %1470 }
 0x53e   :  { %v4108_v38 = vmul.f32 0.0069444445, %v1471_v60 }
 0x53f LB: > { %s3155_s3 = smov 1   ;;  %s4129_s0 = sshll.u32 %s3146_s1, 3  ;;  %s3146_s1 = sphi %s4116_s1, %s1683_s1   ;;  %v3142_v47 = vphi %v4114_v47, %v2099_v47   ;;  %v3138_v53 = vphi %v4112_v53, %v4367_v53   ;;  %v3134_v6 = vphi %v4110_v6, %v4366_v6  }
 0x540   : > { %1709 = vrot.lane.b32.xlu0 %v3142_v47, %s3155_s3  ;;  %p1713_p0 = scmp.eq.s32.totalorder %s4129_s0, 0  ;;  %s1690_s8 = scalar_lea.vmem [#allocation3], %s4129_s0 }
 0x541   : > { %v4137_v40 = vld [vmem:[%s1690_s8] sm:$0xff]  ;;  %s1692_s9 = scalar_lea.vmem [#allocation4], %s4129_s0  ;;  %s1688_s10 = scalar_lea.vmem [#allocation2], %s4129_s0 }
 0x542   : > { %s1714_s7 = scalar_select %p1713_p0, 0.0, 1e+30  ;;  %v4140_v29 = vld [vmem:[%s1692_s9] sm:$0xff]  ;;  %v1697_v49 = vrot.slane %v4137_v40, %v3849_v39 }
 0x543   : > { %v4143_v56 = vld [vmem:[%s1688_s10] sm:$0xff]  ;;  %v1701_v51 = vrot.slane %v4140_v29, %v3849_v39  ;;  %s1748_s11 = sadd.s32 1, %s4129_s0  ;;  %s1799_s13 = sadd.s32 2, %s4129_s0 }
 0x544   : > { %1716 = vrot.lane.b32.xlu0 %v3138_v53, %s3155_s3  ;;  %v1719_v9 = vstv %s1714_s7  ;;  %v1706_v36 = vrot.slane %v4143_v56, %v3849_v39  ;;  %p1768_p1 = scmp.eq.s32.totalorder %s1748_s11, 0  ;;  %p1819_p2 = scmp.eq.s32.totalorder %s1799_s13, 0 }
 0x545   : > { %v1702_v46 = vsel %vm1672_vm6, %v1697_v49, %v1701_v51  ;;  %s1850_s15 = sadd.s32 3, %s4129_s0  ;;  %s1901_s17 = sadd.s32 4, %s4129_s0 }
 0x546   : > { %v1707_v3 = vsel %vm1671_vm5, %v1706_v36, %v1702_v46  ;;  %s1769_s12 = scalar_select %p1768_p1, 0.0, 1e+30 }
 0x547   : > { %s1820_s14 = scalar_select %p1819_p2, 0.0, 1e+30 }
 0x548   : > { %v1770_v48 = vstv %s1769_s12  ;;  %p1870_p3 = scmp.eq.s32.totalorder %s1850_s15, 0  ;;  %p1921_p4 = scmp.eq.s32.totalorder %s1901_s17, 0 }
 0x549   : > { %s1952_s19 = sadd.s32 5, %s4129_s0  ;;  %s2003_s21 = sadd.s32 6, %s4129_s0 }
 0x54a   : > { %s1871_s16 = scalar_select %p1870_p3, 0.0, 1e+30 }
 0x54b   : > { %s1922_s18 = scalar_select %p1921_p4, 0.0, 1e+30 }
 0x54c   : > { %p1972_p5 = scmp.eq.s32.totalorder %s1952_s19, 0  ;;  %p2023_p6 = scmp.eq.s32.totalorder %s2003_s21, 0 }
 0x54d   : > { %s2054_s23 = sadd.s32 7, %s4129_s0  ;;  %s1683_s1 = sadd.s32 1, %s3146_s1  }
 0x54e   : > { %s1973_s20 = scalar_select %p1972_p5, 0.0, 1e+30 }
 0x54f   : > { %s2024_s22 = scalar_select %p2023_p6, 0.0, 1e+30 }
 0x550   : > { %p2074_p7 = scmp.eq.s32.totalorder %s2054_s23, 0  ;;  %p1680_p8 = scmp.ge.s32.totalorder %s1683_s1, 3  }
 0x551   :  { %s3157_s25 = smov (%p1680_p8), [#allocation5]  }
 0x552   : > { %s2075_s24 = scalar_select %p2074_p7, 0.0, 1e+30 }
 0x553   :  { %s2167_s26 = sshll.u32 (%p1680_p8), %s3157_s25, 4  ;;  %s2168_s26 = int_to_ptr.vmem [resolvable:$true] %s2167_s26 }
 0x554   :  { %s3092_s27 = scalar_lea.vmem (%p1680_p8), %s2168_s26, 16  ;;  %s3096_s28 = scalar_lea.vmem (%p1680_p8), %s2168_s26, 32 }
 0x555   :  { %p3093_p9 = scmp.ne.s32.totalorder (%p1680_p8), %s2168_s26, %s3092_s27  ;;  %p3097_p10 = scmp.lt.s32.totalorder (%p1680_p8), %s2168_s26, %s2168_s26 }
 0x556   :  { %p3098_p11 = scmp.lt.s32.totalorder (%p1680_p8), %s3096_s28, %s3092_s27 }
 0x558   :  { %p3099_p12 = por (%p1680_p8), %p3098_p11, %p3097_p10 }
 0x55a   :  { %p3100_p13 = pnand (%p1680_p8), %p3099_p12, %p3093_p9 }
 0x5b2   : > { %v1710_v52 = vpop.permute.xlu0 %1709 }
 0x5b3   : > { %v1712_v63 = vsel %vm1670_vm4, 1e+30, %v1710_v52  ;;  %v1771_v24 = vsel %vm1670_vm4, %v1770_v48, %v1710_v52  ;;  %v1802_v48 = vsub.s32 2, %v3713_v4 }
 0x5b4   : > { %v1721_v13 = vmin.f32 %v1712_v63, %v3142_v47 }
 0x5b6   : > { %v1717_v21 = vpop.permute.xlu0 %1716 }
 0x5b7   : > { %v1720_v20 = vsel %vm1670_vm4, %v1719_v9, %v1717_v21 }
 0x5b8   : > { %v1722_v10 = vmin.f32 %v1721_v13, %v1720_v20 }
 0x5ba   : > { %v1723_v14 = vsub.f32 %v1722_v10, %v1712_v63  ;;  %v1727_v11 = vsub.f32 %v1722_v10, %v3142_v47  ;;  %v1732_v54 = vsub.f32 %v1722_v10, %v1720_v20  ;;  %v1751_v47 = vsub.s32 1, %v3713_v4 }
 0x5bc   : > { %v1724_v1 = vmul.f32 10.0, %v1723_v14  ;;  %v1728_v43 = vmul.f32 10.0, %v1727_v11  ;;  %v1733_v15 = vmul.f32 10.0, %v1732_v54  ;;  %v1752_v52 = vrot.slane %v4137_v40, %v1751_v47 }
 0x5bd   : > { %v1756_v63 = vrot.slane %v4140_v29, %v1751_v47  ;;  %v1761_v13 = vrot.slane %v4143_v56, %v1751_v47 }
 0x5be   : > { %v1725_v35 = vmul.f32 1.442695, %v1724_v1  ;;  %v1729_v37 = vmul.f32 1.442695, %v1728_v43  ;;  %v1734_v0 = vmul.f32 1.442695, %v1733_v15  ;;  %v1821_v43 = vstv %s1820_s14 }
 0x5bf   : > { %v1757_v21 = vsel %vm1672_vm6, %v1752_v52, %v1756_v63 }
 0x5c0   : > { %3026 = vpow2.f32 %v1725_v35  ;;  %v1762_v14 = vsel %vm1671_vm5, %v1761_v13, %v1757_v21 }
 0x5c1   : > { %3028 = vpow2.f32 %v1729_v37 }
 0x5c2   : > { %3030 = vpow2.f32 %v1734_v0 }
 0x5ca   : > { %v3027_v12 = vpop.eup %3026 }
 0x5cb   : > { %v3029_v23 = vpop.eup %3028 }
 0x5cc   : > { %v1731_v44 = vadd.f32 %v3029_v23, %v3027_v12  ;;  %v3031_v61 = vpop.eup %3030 }
 0x5ce   : > { %v1736_v62 = vadd.f32 %v3031_v61, %v1731_v44 }
 0x5d0   : > { %3032 = vlog2.f32 %v1736_v62 }
 0x5da   : > { %v3033_v16 = vpop.eup %3032 }
 0x5db   : > { %v1738_v22 = vmul.f32 0.6931472, %v3033_v16 }
 0x5dd   : > { %v1739_v50 = vmul.f32 0.1, %v1738_v22 }
 0x5df   : > { %v1740_v34 = vsub.f32 %v1722_v10, %v1739_v50 }
 0x5e1   : > { %v1741_v8 = vadd.f32 %v1740_v34, %v1707_v3 }
 0x5e3   : > { %v4155_v18 = vmin.f32 %v1741_v8, 1e+30 }
 0x5e5   : > { %1764 = vrot.lane.b32.xlu1 %v4155_v18, %s3155_s3 }
 0x657   : > { %v1765_v5 = vpop.permute.xlu1 %1764 }
 0x658   : > { %v1767_v19 = vsel %vm1670_vm4, 1e+30, %v1765_v5  ;;  %v1822_v0 = vsel %vm1670_vm4, %v1821_v43, %v1765_v5  ;;  %v1743_v5 = vstv %s4129_s0 }
 0x659   : > { %v1772_v45 = vmin.f32 %v1767_v19, %v4155_v18  ;;  %vm1744_vm1 = vcmp.eq.s32.totalorder %v3732_v55, %v1743_v5 }
 0x65a   : > { %vm1745_vm11 = vmand %vm3737_vm7, %vm1744_vm1 }
 0x65b   : > { %v1773_v2 = vmin.f32 %v1772_v45, %v1771_v24  ;;  %v1807_v45 = vrot.slane %v4140_v29, %v1802_v48 }
 0x65d   : > { %v1774_v59 = vsub.f32 %v1773_v2, %v1767_v19  ;;  %v1778_v7 = vsub.f32 %v1773_v2, %v4155_v18  ;;  %v1783_v26 = vsub.f32 %v1773_v2, %v1771_v24  ;;  %v1803_v19 = vrot.slane %v4137_v40, %v1802_v48 }
 0x65e   : > { %v1794_v24 = vstv %s1748_s11 }
 0x65f   : > { %v1775_v30 = vmul.f32 10.0, %v1774_v59  ;;  %v1779_v17 = vmul.f32 10.0, %v1778_v7  ;;  %v1784_v32 = vmul.f32 10.0, %v1783_v26  ;;  %v1812_v59 = vrot.slane %v4143_v56, %v1802_v48 }
 0x660   : > { %vm1795_vm10 = vcmp.eq.s32.totalorder %v3732_v55, %v1794_v24  ;;  %v1808_v7 = vsel %vm1672_vm6, %v1803_v19, %v1807_v45  ;;  %v1923_v19 = vstv %s1922_s18 }
 0x661   : > { %v1776_v58 = vmul.f32 1.442695, %v1775_v30  ;;  %v1780_v57 = vmul.f32 1.442695, %v1779_v17  ;;  %v1785_v41 = vmul.f32 1.442695, %v1784_v32  ;;  %v1845_v30 = vstv %s1799_s13  ;;  %vm1796_vm12 = vmand %vm3737_vm7, %vm1795_vm10 }
 0x662   : > { %v1813_v32 = vsel %vm1671_vm5, %v1812_v59, %v1808_v7  ;;  %vm1846_vm13 = vcmp.eq.s32.totalorder %v3732_v55, %v1845_v30 }
 0x663   : > { %3034 = vpow2.f32 %v1776_v58  ;;  %v1746_v58 = vsel %vm1745_vm11, %v4155_v18, 0.0  ;;  %vm1847_vm15 = vmand %vm3737_vm7, %vm1846_vm13  ;;  %v1872_v18 = vstv %s1871_s16  ;;  %vm2105_vm13 = vcmask (%p1680_p8), 1042432  }
 0x664   : > { %3036 = vpow2.f32 %v1780_v57 }
 0x665   : > { %3038 = vpow2.f32 %v1785_v41 }
 0x66d   : > { %v3035_v27 = vpop.eup %3034 }
 0x66e   : > { %v3037_v33 = vpop.eup %3036 }
 0x66f   : > { %v1782_v25 = vadd.f32 %v3037_v33, %v3035_v27  ;;  %v3039_v60 = vpop.eup %3038  ;;  %v1747_v33 = vadd.f32 %v3134_v6, %v1746_v58 }
 0x671   : > { %v1787_v53 = vadd.f32 %v3039_v60, %v1782_v25 }
 0x673   : > { %3040 = vlog2.f32 %v1787_v53 }
 0x67d   : > { %v3041_v9 = vpop.eup %3040 }
 0x67e   : > { %v1789_v20 = vmul.f32 0.6931472, %v3041_v9 }
 0x680   : > { %v1790_v10 = vmul.f32 0.1, %v1789_v20 }
 0x682   : > { %v1791_v11 = vsub.f32 %v1773_v2, %v1790_v10 }
 0x684   : > { %v1792_v54 = vadd.f32 %v1791_v11, %v1762_v14 }
 0x686   : > { %v1793_v1 = vmin.f32 %v1792_v54, 1e+30 }
 0x688   : > { %1815 = vrot.lane.b32.xlu1 %v1793_v1, %s3155_s3  ;;  %v1797_v41 = vsel %vm1796_vm12, %v1793_v1, 0.0 }
 0x689   : > { %v1798_v60 = vadd.f32 %v1797_v41, %v1747_v33 }
 0x6fa   : > { %v1816_v15 = vpop.permute.xlu1 %1815 }
 0x6fb   : > { %v1818_v35 = vsel %vm1670_vm4, 1e+30, %v1816_v15  ;;  %v1873_v6 = vsel %vm1670_vm4, %v1872_v18, %v1816_v15  ;;  %v1853_v15 = vsub.s32 3, %v3713_v4 }
 0x6fc   : > { %v1823_v37 = vmin.f32 %v1818_v35, %v1793_v1 }
 0x6fe   : > { %v1824_v12 = vmin.f32 %v1823_v37, %v1822_v0 }
 0x700   : > { %v1825_v23 = vsub.f32 %v1824_v12, %v1818_v35  ;;  %v1829_v44 = vsub.f32 %v1824_v12, %v1793_v1  ;;  %v1834_v61 = vsub.f32 %v1824_v12, %v1822_v0 }
 0x702   : > { %v1826_v62 = vmul.f32 10.0, %v1825_v23  ;;  %v1830_v49 = vmul.f32 10.0, %v1829_v44  ;;  %v1835_v51 = vmul.f32 10.0, %v1834_v61  ;;  %v1854_v61 = vrot.slane %v4137_v40, %v1853_v15 }
 0x704   : > { %v1827_v16 = vmul.f32 1.442695, %v1826_v62  ;;  %v1831_v36 = vmul.f32 1.442695, %v1830_v49  ;;  %v1836_v22 = vmul.f32 1.442695, %v1835_v51  ;;  %v1858_v62 = vrot.slane %v4140_v29, %v1853_v15 }
 0x705   : > { %v1863_v51 = vrot.slane %v4143_v56, %v1853_v15 }
 0x706   : > { %3042 = vpow2.f32 %v1827_v16  ;;  %v1859_v16 = vsel %vm1672_vm6, %v1854_v61, %v1858_v62 }
 0x707   : > { %3044 = vpow2.f32 %v1831_v36 }
 0x708   : > { %3046 = vpow2.f32 %v1836_v22  ;;  %v1896_v22 = vstv %s1850_s15 }
 0x709   : > { %vm1897_vm0 = vcmp.eq.s32.totalorder %v3732_v55, %v1896_v22 }
 0x70a   : > { %vm1898_vm8 = vmand %vm3737_vm7, %vm1897_vm0  ;;  %vm2147_vm0 = vcmp.eq.s32.totalorder (%p1680_p8), %v3711_v42, 5 }
 0x710   : > { %v3043_v46 = vpop.eup %3042 }
 0x711   : > { %v3045_v50 = vpop.eup %3044 }
 0x712   : > { %v1833_v3 = vadd.f32 %v3045_v50, %v3043_v46  ;;  %v3047_v34 = vpop.eup %3046  ;;  %v1864_v50 = vsel %vm1671_vm5, %v1863_v51, %v1859_v16 }
 0x714   : > { %v1838_v8 = vadd.f32 %v3047_v34, %v1833_v3 }
 0x716   : > { %3048 = vlog2.f32 %v1838_v8 }
 0x720   : > { %v3049_v2 = vpop.eup %3048 }
 0x721   : > { %v1840_v26 = vmul.f32 0.6931472, %v3049_v2 }
 0x723   : > { %v1841_v17 = vmul.f32 0.1, %v1840_v26 }
 0x725   : > { %v1842_v57 = vsub.f32 %v1824_v12, %v1841_v17 }
 0x727   : > { %v1843_v27 = vadd.f32 %v1842_v57, %v1813_v32 }
 0x729   : > { %v1844_v25 = vmin.f32 %v1843_v27, 1e+30 }
 0x72b   : > { %1866 = vrot.lane.b32.xlu0 %v1844_v25, %s3155_s3  ;;  %v1848_v53 = vsel %vm1847_vm15, %v1844_v25, 0.0  ;;  %vm2127_vm15 = vcmp.eq.s32.totalorder (%p1680_p8), %v3711_v42, 1 }
 0x72c   : > { %v1849_v47 = vadd.f32 %v1848_v53, %v1798_v60 }
 0x79d   : > { %v1867_v52 = vpop.permute.xlu0 %1866 }
 0x79e   : > { %v1869_v63 = vsel %vm1670_vm4, 1e+30, %v1867_v52  ;;  %v1924_v59 = vsel %vm1670_vm4, %v1923_v19, %v1867_v52  ;;  %v1904_v52 = vsub.s32 4, %v3713_v4 }
 0x79f   : > { %v1874_v9 = vmin.f32 %v1869_v63, %v1844_v25 }
 0x7a1   : > { %v1875_v13 = vmin.f32 %v1874_v9, %v1873_v6  ;;  %v1909_v9 = vrot.slane %v4140_v29, %v1904_v52 }
 0x7a3   : > { %v1876_v21 = vsub.f32 %v1875_v13, %v1869_v63  ;;  %v1880_v20 = vsub.f32 %v1875_v13, %v1844_v25  ;;  %v1885_v10 = vsub.f32 %v1875_v13, %v1873_v6  ;;  %v1905_v63 = vrot.slane %v4137_v40, %v1904_v52 }
 0x7a5   : > { %v1877_v14 = vmul.f32 10.0, %v1876_v21  ;;  %v1881_v11 = vmul.f32 10.0, %v1880_v20  ;;  %v1886_v54 = vmul.f32 10.0, %v1885_v10  ;;  %v1910_v21 = vsel %vm1672_vm6, %v1905_v63, %v1909_v9 }
 0x7a6   : > { %v1947_v10 = vstv %s1901_s17 }
 0x7a7   : > { %v1878_v1 = vmul.f32 1.442695, %v1877_v14  ;;  %v1882_v43 = vmul.f32 1.442695, %v1881_v11  ;;  %v1887_v35 = vmul.f32 1.442695, %v1886_v54  ;;  %vm1948_vm14 = vcmp.eq.s32.totalorder %v3732_v55, %v1947_v10 }
 0x7a8   : > { %vm1949_vm2 = vmand %vm3737_vm7, %vm1948_vm14  ;;  %vm2156_vm14 = vcmp.eq.s32.totalorder (%p1680_p8), %v3711_v42, 7 }
 0x7a9   : > { %3050 = vpow2.f32 %v1878_v1 }
 0x7aa   : > { %3052 = vpow2.f32 %v1882_v43 }
 0x7ab   : > { %3054 = vpow2.f32 %v1887_v35 }
 0x7b3   : > { %v3051_v37 = vpop.eup %3050 }
 0x7b4   : > { %v3053_v0 = vpop.eup %3052 }
 0x7b5   : > { %v1884_v12 = vadd.f32 %v3053_v0, %v3051_v37  ;;  %v3055_v23 = vpop.eup %3054  ;;  %v1974_v0 = vstv %s1973_s20 }
 0x7b7   : > { %v1889_v44 = vadd.f32 %v3055_v23, %v1884_v12 }
 0x7b9   : > { %3056 = vlog2.f32 %v1889_v44 }
 0x7c3   : > { %v3057_v49 = vpop.eup %3056 }
 0x7c4   : > { %v1891_v36 = vmul.f32 0.6931472, %v3057_v49 }
 0x7c6   : > { %v1892_v46 = vmul.f32 0.1, %v1891_v36 }
 0x7c8   : > { %v1893_v3 = vsub.f32 %v1875_v13, %v1892_v46  ;;  %v1914_v13 = vrot.slane %v4143_v56, %v1904_v52 }
 0x7ca   : > { %v1894_v34 = vadd.f32 %v1893_v3, %v1864_v50  ;;  %v1915_v11 = vsel %vm1671_vm5, %v1914_v13, %v1910_v21 }
 0x7cc   : > { %v1895_v8 = vmin.f32 %v1894_v34, 1e+30 }
 0x7ce   : > { %1917 = vrot.lane.b32.xlu1 %v1895_v8, %s3155_s3  ;;  %v1899_v48 = vsel %vm1898_vm8, %v1895_v8, 0.0  ;;  %vm2153_vm8 = vcmp.eq.s32.totalorder (%p1680_p8), %v3711_v42, 6 }
 0x7cf   : > { %v1900_v5 = vadd.f32 %v1899_v48, %v1849_v47 }
 0x840   : > { %v1918_v45 = vpop.permute.xlu1 %1917 }
 0x841   : > { %v1920_v24 = vsel %vm1670_vm4, 1e+30, %v1918_v45  ;;  %v1975_v15 = vsel %vm1670_vm4, %v1974_v0, %v1918_v45  ;;  %v1955_v45 = vsub.s32 5, %v3713_v4 }
 0x842   : > { %v1925_v2 = vmin.f32 %v1920_v24, %v1895_v8 }
 0x844   : > { %v1926_v7 = vmin.f32 %v1925_v2, %v1924_v59  ;;  %v1960_v2 = vrot.slane %v4140_v29, %v1955_v45 }
 0x846   : > { %v1927_v26 = vsub.f32 %v1926_v7, %v1920_v24  ;;  %v1931_v30 = vsub.f32 %v1926_v7, %v1895_v8  ;;  %v1936_v17 = vsub.f32 %v1926_v7, %v1924_v59  ;;  %v1956_v24 = vrot.slane %v4137_v40, %v1955_v45 }
 0x848   : > { %v1928_v32 = vmul.f32 10.0, %v1927_v26  ;;  %v1932_v58 = vmul.f32 10.0, %v1931_v30  ;;  %v1937_v57 = vmul.f32 10.0, %v1936_v17  ;;  %v1961_v26 = vsel %vm1672_vm6, %v1956_v24, %v1960_v2 }
 0x849   : > { %v1998_v17 = vstv %s1952_s19 }
 0x84a   : > { %v1929_v41 = vmul.f32 1.442695, %v1928_v32  ;;  %v1933_v27 = vmul.f32 1.442695, %v1932_v58  ;;  %v1938_v33 = vmul.f32 1.442695, %v1937_v57  ;;  %vm1999_vm3 = vcmp.eq.s32.totalorder %v3732_v55, %v1998_v17 }
 0x84b   : > { %vm2000_vm9 = vmand %vm3737_vm7, %vm1999_vm3 }
 0x84c   : > { %3058 = vpow2.f32 %v1929_v41 }
 0x84d   : > { %3060 = vpow2.f32 %v1933_v27 }
 0x84e   : > { %3062 = vpow2.f32 %v1938_v33 }
 0x856   : > { %v3059_v25 = vpop.eup %3058 }
 0x857   : > { %v3061_v60 = vpop.eup %3060 }
 0x858   : > { %v1935_v53 = vadd.f32 %v3061_v60, %v3059_v25  ;;  %v3063_v47 = vpop.eup %3062  ;;  %v2025_v60 = vstv %s2024_s22 }
 0x85a   : > { %v1940_v18 = vadd.f32 %v3063_v47, %v1935_v53 }
 0x85c   : > { %3064 = vlog2.f32 %v1940_v18 }
 0x866   : > { %v3065_v6 = vpop.eup %3064 }
 0x867   : > { %v1942_v20 = vmul.f32 0.6931472, %v3065_v6 }
 0x869   : > { %v1943_v14 = vmul.f32 0.1, %v1942_v20 }
 0x86b   : > { %v1944_v54 = vsub.f32 %v1926_v7, %v1943_v14  ;;  %v1965_v7 = vrot.slane %v4143_v56, %v1955_v45 }
 0x86d   : > { %v1945_v1 = vadd.f32 %v1944_v54, %v1915_v11  ;;  %v1966_v58 = vsel %vm1671_vm5, %v1965_v7, %v1961_v26 }
 0x86f   : > { %v1946_v43 = vmin.f32 %v1945_v1, 1e+30 }
 0x871   : > { %1968 = vrot.lane.b32.xlu0 %v1946_v43, %s3155_s3  ;;  %v1950_v35 = vsel %vm1949_vm2, %v1946_v43, 0.0 }
 0x872   : > { %v1951_v37 = vadd.f32 %v1950_v35, %v1900_v5 }
 0x8e3   : > { %v1969_v12 = vpop.permute.xlu0 %1968 }
 0x8e4   : > { %v1971_v23 = vsel %vm1670_vm4, 1e+30, %v1969_v12  ;;  %v2026_v52 = vsel %vm1670_vm4, %v2025_v60, %v1969_v12  ;;  %v2006_v12 = vsub.s32 6, %v3713_v4 }
 0x8e5   : > { %v1976_v44 = vmin.f32 %v1971_v23, %v1946_v43 }
 0x8e7   : > { %v1977_v61 = vmin.f32 %v1976_v44, %v1975_v15  ;;  %v2011_v44 = vrot.slane %v4140_v29, %v2006_v12 }
 0x8e9   : > { %v1978_v62 = vsub.f32 %v1977_v61, %v1971_v23  ;;  %v1982_v49 = vsub.f32 %v1977_v61, %v1946_v43  ;;  %v1987_v51 = vsub.f32 %v1977_v61, %v1975_v15  ;;  %v2007_v23 = vrot.slane %v4137_v40, %v2006_v12 }
 0x8eb   : > { %v1979_v16 = vmul.f32 10.0, %v1978_v62  ;;  %v1983_v36 = vmul.f32 10.0, %v1982_v49  ;;  %v1988_v22 = vmul.f32 10.0, %v1987_v51  ;;  %v2012_v62 = vsel %vm1672_vm6, %v2007_v23, %v2011_v44 }
 0x8ec   : > { %v2049_v51 = vstv %s2003_s21 }
 0x8ed   : > { %v1980_v46 = vmul.f32 1.442695, %v1979_v16  ;;  %v1984_v50 = vmul.f32 1.442695, %v1983_v36  ;;  %v1989_v3 = vmul.f32 1.442695, %v1988_v22  ;;  %vm2050_vm1 = vcmp.eq.s32.totalorder %v3732_v55, %v2049_v51 }
 0x8ee   : > { %vm2051_vm10 = vmand %vm3737_vm7, %vm2050_vm1 }
 0x8ef   : > { %3066 = vpow2.f32 %v1980_v46 }
 0x8f0   : > { %3068 = vpow2.f32 %v1984_v50 }
 0x8f1   : > { %3070 = vpow2.f32 %v1989_v3 }
 0x8f9   : > { %v3067_v34 = vpop.eup %3066 }
 0x8fa   : > { %v3069_v8 = vpop.eup %3068 }
 0x8fb   : > { %v1986_v48 = vadd.f32 %v3069_v8, %v3067_v34  ;;  %v3071_v5 = vpop.eup %3070  ;;  %v2076_v8 = vstv %s2075_s24 }
 0x8fd   : > { %v1991_v19 = vadd.f32 %v3071_v5, %v1986_v48 }
 0x8ff   : > { %3072 = vlog2.f32 %v1991_v19 }
 0x909   : > { %v3073_v59 = vpop.eup %3072 }
 0x90a   : > { %v1993_v30 = vmul.f32 0.6931472, %v3073_v59 }
 0x90c   : > { %v1994_v32 = vmul.f32 0.1, %v1993_v30 }
 0x90e   : > { %v1995_v57 = vsub.f32 %v1977_v61, %v1994_v32  ;;  %v2016_v61 = vrot.slane %v4143_v56, %v2006_v12 }
 0x910   : > { %v1996_v41 = vadd.f32 %v1995_v57, %v1966_v58  ;;  %v2017_v36 = vsel %vm1671_vm5, %v2016_v61, %v2012_v62 }
 0x912   : > { %v1997_v27 = vmin.f32 %v1996_v41, 1e+30 }
 0x914   : > { %2019 = vrot.lane.b32.xlu1 %v1997_v27, %s3155_s3  ;;  %v2001_v33 = vsel %vm2000_vm9, %v1997_v27, 0.0 }
 0x915   : > { %v2002_v25 = vadd.f32 %v2001_v33, %v1951_v37 }
 0x986   : > { %v2020_v53 = vpop.permute.xlu1 %2019 }
 0x987   : > { %v2022_v47 = vsel %vm1670_vm4, 1e+30, %v2020_v53  ;;  %v2077_v45 = vsel %vm1670_vm4, %v2076_v8, %v2020_v53  ;;  %v2057_v53 = vsub.s32 7, %v3713_v4 }
 0x988   : > { %v2027_v18 = vmin.f32 %v2022_v47, %v1997_v27 }
 0x98a   : > { %v2028_v63 = vmin.f32 %v2027_v18, %v2026_v52  ;;  %v2062_v18 = vrot.slane %v4140_v29, %v2057_v53 }
 0x98c   : > { %v2029_v9 = vsub.f32 %v2028_v63, %v2022_v47  ;;  %v2033_v6 = vsub.f32 %v2028_v63, %v1997_v27  ;;  %v2038_v13 = vsub.f32 %v2028_v63, %v2026_v52  ;;  %v2058_v47 = vrot.slane %v4137_v40, %v2057_v53 }
 0x98e   : > { %v2030_v21 = vmul.f32 10.0, %v2029_v9  ;;  %v2034_v20 = vmul.f32 10.0, %v2033_v6  ;;  %v2039_v10 = vmul.f32 10.0, %v2038_v13  ;;  %v2063_v9 = vsel %vm1672_vm6, %v2058_v47, %v2062_v18 }
 0x98f   : > { %v2100_v13 = vstv %s2054_s23  ;;  %vm2141_vm6 = vcmp.eq.s32.totalorder (%p1680_p8), %v3711_v42, 4 }
 0x990   : > { %v2031_v14 = vmul.f32 1.442695, %v2030_v21  ;;  %v2035_v11 = vmul.f32 1.442695, %v2034_v20  ;;  %v2040_v54 = vmul.f32 1.442695, %v2039_v10  ;;  %vm2101_vm11 = vcmp.eq.s32.totalorder %v3732_v55, %v2100_v13 }
 0x991   : > { %vm2102_vm12 = vmand %vm3737_vm7, %vm2101_vm11  ;;  %vm2138_vm7 = vcmp.eq.s32.totalorder (%p1680_p8), %v3711_v42, 3 }
 0x992   : > { %3074 = vpow2.f32 %v2031_v14 }
 0x993   : > { %3076 = vpow2.f32 %v2035_v11  ;;  %v3156_v11 = vmov (%p1680_p8), 0  }
 0x994   : > { %3078 = vpow2.f32 %v2040_v54  ;;  %3091 = vset.pattern.permute.xlu1 (%p1680_p8), %v3156_v11  ;;  %3090 = vset.pattern.permute.xlu0 (%p1680_p8), %v3156_v11 }
 0x99c   : > { %v3075_v1 = vpop.eup %3074 }
 0x99d   : > { %v3077_v43 = vpop.eup %3076 }
 0x99e   : > { %v2037_v35 = vadd.f32 %v3077_v43, %v3075_v1  ;;  %v3079_v37 = vpop.eup %3078 }
 0x9a0   : > { %v2042_v0 = vadd.f32 %v3079_v37, %v2037_v35 }
 0x9a2   : > { %3080 = vlog2.f32 %v2042_v0  ;;  %v2118_v0 = vadd.f32 (%p1680_p8), %v4108_v38, %v4105_v28 }
 0x9ac   : > { %v3081_v15 = vpop.eup %3080 }
 0x9ad   : > { %v2044_v49 = vmul.f32 0.6931472, %v3081_v15 }
 0x9af   : > { %v2045_v16 = vmul.f32 0.1, %v2044_v49 }
 0x9b1   : > { %v2046_v22 = vsub.f32 %v2028_v63, %v2045_v16  ;;  %v2067_v63 = vrot.slane %v4143_v56, %v2057_v53 }
 0x9b3   : > { %v2047_v46 = vadd.f32 %v2046_v22, %v2017_v36  ;;  %v2068_v20 = vsel %vm1671_vm5, %v2067_v63, %v2063_v9  ;;  %vm2135_vm5 = vcmp.eq.s32.totalorder (%p1680_p8), %v3711_v42, 2 }
 0x9b4   :  { %v2136_v39 = vsel (%p1680_p8), %vm2135_vm5, %v2118_v0, 0.0 }
 0x9b5   : > { %v2048_v50 = vmin.f32 %v2047_v46, 1e+30  }
 0x9b7   : > { %2070 = vrot.lane.b32.xlu0 %v2048_v50, %s3155_s3  ;;  %v2052_v3 = vsel %vm2051_vm10, %v2048_v50, 0.0  ;;  %v4367_v53 = vmov %v2048_v50 }
 0x9b8   : > { %v2053_v34 = vadd.f32 %v2052_v3, %v2002_v25 }
 0xa29   : > { %v2071_v48 = vpop.permute.xlu0 %2070 }
 0xa2a   : > { %v2073_v5 = vsel %vm1670_vm4, 1e+30, %v2071_v48 }
 0xa2b   : > { %v2078_v19 = vmin.f32 %v2073_v5, %v2048_v50 }
 0xa2d   : > { %v2079_v24 = vmin.f32 %v2078_v19, %v2077_v45 }
 0xa2f   : > { %v2080_v2 = vsub.f32 %v2079_v24, %v2073_v5  ;;  %v2084_v59 = vsub.f32 %v2079_v24, %v2048_v50  ;;  %v2089_v7 = vsub.f32 %v2079_v24, %v2077_v45  ;;  %v2154_v50 = vsel (%p1680_p8), %vm2153_vm8, %v4105_v28, 0.0 }
 0xa31   : > { %v2081_v26 = vmul.f32 10.0, %v2080_v2  ;;  %v2085_v30 = vmul.f32 10.0, %v2084_v59  ;;  %v2090_v17 = vmul.f32 10.0, %v2089_v7 }
 0xa33   : > { %v2082_v32 = vmul.f32 1.442695, %v2081_v26  ;;  %v2086_v58 = vmul.f32 1.442695, %v2085_v30  ;;  %v2091_v57 = vmul.f32 1.442695, %v2090_v17 }
 0xa35   : > { %3082 = vpow2.f32 %v2082_v32 }
 0xa36   : > { %3084 = vpow2.f32 %v2086_v58 }
 0xa37   : > { %3086 = vpow2.f32 %v2091_v57 }
 0xa3f   : > { %v3083_v41 = vpop.eup %3082 }
 0xa40   : > { %v3085_v27 = vpop.eup %3084 }
 0xa41   : > { %v2088_v33 = vadd.f32 %v3085_v27, %v3083_v41  ;;  %v3087_v25 = vpop.eup %3086 }
 0xa43   : > { %v2093_v60 = vadd.f32 %v3087_v25, %v2088_v33 }
 0xa45   : > { %3088 = vlog2.f32 %v2093_v60 }
 0xa4f   : > { %v3089_v52 = vpop.eup %3088 }
 0xa50   : > { %v2095_v6 = vmul.f32 0.6931472, %v3089_v52 }
 0xa52   : > { %v2096_v21 = vmul.f32 0.1, %v2095_v6 }
 0xa54   : > { %v2097_v10 = vsub.f32 %v2079_v24, %v2096_v21 }
 0xa56   : > { %v2098_v14 = vadd.f32 %v2097_v10, %v2068_v20 }
 0xa57   :  { %1682 = sbr.rel (!%p1680_p8) target bundleno = 1343 (0x53f), region = 46 }
 0xa58   : > { %v2099_v47 = vmin.f32 %v2098_v14, 1e+30  }
 0xa5a   : > { %v2103_v40 = vsel %vm2102_vm12, %v2099_v47, 0.0 }
 0xa5b   : > { %v2104_v29 = vadd.f32 %v2103_v40, %v2053_v34   ;;  %v2157_v34 = vsel (%p1680_p8), %vm2156_vm14, %v4108_v38, 0.0 }
 0xa5d   : > { %v4366_v6 = vmov %v2104_v29  ;;  %v2106_v56 = vsel (%p1680_p8), %vm2105_vm13, %v2104_v29, 0.0 }
 0xa5e   :  { %2107 = vadd.xlane.f32.xlu0 %v2106_v56 }
 0xaeb   :  { %v2108_v54 = vpop.xlane.xlu0 %2107 }
 0xaec   :  { %v2110_v1 = vrot.slane %v2108_v54, 1  ;;  %v2142_v61 = vsel %vm2141_vm6, %v2108_v54, 0.0  ;;  %v2139_v49 = vsel %vm2138_vm7, %v2108_v54, 0.0  ;;  %v2148_v51 = vsel %vm2147_vm0, %v2108_v54, 0.0 }
 0xaed   :  { %v2144_v36 = vrot.slane %v2142_v61, 1  ;;  %v2150_v46 = vrot.slane %v2148_v51, 2 }
 0xaee   :  { %v2112_v43 = vadd.f32 %v2110_v1, %v2108_v54 }
 0xaf0   :  { %v2113_v35 = vmul.f32 0.5, %v2112_v43 }
 0xaf2   :  { %v2115_v37 = vrot.slane %v2113_v35, 1 }
 0xaf4   :  { %v2117_v12 = vsub.f32 %v2108_v54, %v2115_v37 }
 0xaf6   :  { %2130 = vperm.xlu1 %3091, %v2117_v12   ;;  %v2119_v23 = vadd.f32 %v2118_v0, %v2117_v12 }
 0xaf8   :  { %2122 = vperm.xlu0 %3090, %v2119_v23  }
 0xb75   :  { %v2131_v4 = vpop.permute.xlu1 %2130 }
 0xb76   :  { %v2133_v31 = vsel %vm2127_vm15, %v2131_v4, 0.0 }
 0xb77   :  { %v2123_v55 = vpop.permute.xlu0 %2122 }
 0xb78   :  { %v2125_v44 = vsel %vm1670_vm4, %v2123_v55, 0.0  ;;  %vm2159_vm4 = vcmask 57344  }
 0xb79   :  { %v2134_v15 = vadd.f32 %v2133_v31, %v2125_v44 }
 0xb7b   :  { %v2137_v62 = vadd.f32 %v2136_v39, %v2134_v15 }
 0xb7d   :  { %v2140_v16 = vadd.f32 %v2139_v49, %v2137_v62 }
 0xb7f   :  { %v2146_v22 = vadd.f32 %v2144_v36, %v2140_v16 }
 0xb81   :  { %v2152_v3 = vadd.f32 %v2150_v46, %v2146_v22 }
 0xb83   :  { %v2155_v8 = vadd.f32 %v2154_v50, %v2152_v3 }
 0xb85   :  { %v2158_v48 = vadd.f32 %v2157_v34, %v2155_v8 }
 0xb87   :  { %2160 = vst.msk [vmem:[#allocation5] sm:$0x1] %vm2159_vm4, %v2158_v48 }
 0xb88   :  { %3103 = shalt.err (!%p3100_p13)
}
 0xb89   :  { %s3104_s30 = scalar_lea.hbm %s4351_s4, 16 }
 0xb8a   :  { %p3105_p0 = scmp.ne.s32.totalorder %s4351_s4, %s3104_s30  ;;  %p3108_p1 = scmp.lt.u32.totalorder %s3104_s30, %s4351_s4 }
 0xb8c   :  { %p3110_p2 = pnand %p3108_p1, %p3105_p0 }
 0xb8e   :  { %3113 = shalt.err (!%p3110_p2)
}
 0xb8f   :  { %2170 = dma.vmem_to_hbm [thread:$0]  %s2168_s26, 16, %s4351_s4, [#allocation6]  }
 0xb90   :  { %3130 = dma.done.wait [#allocation6], 16  }
 0xb91   :  { %3131 = vsyncadd [#allocation6], 4294967280 }
 0xb92   :  { %2174 = vsyncpa [#allocation6], 1 }

</bundles_post_ra>
